<compile_context>
chip_gen: v5e
topology: v5e:2x2
jax: 0.10.0
libtpu: 0.0.40
codegen_flags: <defaults>
</compile_context>

<pallas_src>
import functools

import jax
import jax.numpy as jnp
from jax.experimental import pallas as pl
from jax.experimental.pallas import tpu as pltpu


# ----------------------------------------------------------------------------
# Pallas kernel: transposed one-hot @ per-ktype LUT, lane-dense output
# ----------------------------------------------------------------------------
def _lut_lookup_kernel(idx_ref, lut_ref, out_ref):
    """idx_ref: (1,1,TM) int32, lut_ref: (1,up2,L2), out_ref: (1,up2,TM) f32."""
    idx = idx_ref[0]                                     # (1, TM), lane-dense
    lut_t = lut_ref[0]                                   # (up2, L2)
    l2 = lut_t.shape[1]
    tm = idx.shape[1]
    # Row r of the transposed one-hot selects LUT entry r: compare a dim-0
    # iota against the lane-dense indices (cheap sublane broadcast of idx).
    rows = jax.lax.broadcasted_iota(jnp.int32, (l2, tm), 0)
    onehot_t = (rows == idx).astype(lut_t.dtype)         # (L2, TM)
    # (up2, L2) @ (L2, TM) -> (up2, TM): output last dim is lane-dense.
    out_ref[0] = jnp.dot(lut_t, onehot_t,
                         preferred_element_type=jnp.float32)


def lut_lookup_pallas(idx2, lut3, *, tm=4096):
    """Gather lut3[k].T[idx2[k]] for every k in one Pallas call.

    idx2 : (K, Mk) int32 indices, row k indexes into LUT k only.
    lut3 : (K, up2, L2) transposed LUTs, already in the compute dtype.
    returns (K, up2, Mk) float32.
    """
    k, mk = idx2.shape
    _, up2, l2 = lut3.shape
    tm = max(128, (tm // 128) * 128)             # lane-aligned tile size
    tm = min(tm, ((mk + 127) // 128) * 128)      # don't over-pad tiny inputs
    n_tiles = (mk + tm - 1) // tm
    m_pad = n_tiles * tm
    idx3 = jnp.pad(idx2.astype(jnp.int32),
                   ((0, 0), (0, m_pad - mk))).reshape(k, 1, m_pad)

    out = pl.pallas_call(
        _lut_lookup_kernel,
        out_shape=jax.ShapeDtypeStruct((k, up2, m_pad), jnp.float32),
        grid_spec=pltpu.PrefetchScalarGridSpec(
            num_scalar_prefetch=0,
            grid=(k, n_tiles),
            in_specs=[
                # lane-dense idx tile; outer axis picks the ktype row
                pl.BlockSpec((1, 1, tm), lambda kt, i: (kt, 0, i)),
                # whole per-ktype LUT resident; re-DMA'd only when kt changes
                pl.BlockSpec((1, up2, l2), lambda kt, i: (kt, 0, 0)),
            ],
            out_specs=pl.BlockSpec((1, up2, tm), lambda kt, i: (kt, 0, i)),
        ),
        compiler_params=pltpu.CompilerParams(
            dimension_semantics=("parallel", "parallel"),
            vmem_limit_bytes=32 * 1024 * 1024),
    )(idx3, lut3)
    return out[:, :, :mk]                        # (K, up2, Mk) float32


def lut_lookup_ref(idx2, lut3, *, tm=4096):
    del tm
    lut_f = lut3.astype(jnp.float32)
    return jax.vmap(lambda lt, ix: jnp.take(lt, ix, axis=1))(lut_f, idx2)


# ----------------------------------------------------------------------------
# HDLUT forward (rot90 / replicate-pad / pixel-shuffle glue stays in plain JAX)
# ----------------------------------------------------------------------------
_PAD = {
    'h': ((0, 0), (0, 0), (0, 0), (0, 1)),   # F.pad (0,1,0,0): W right by 1
    'd': ((0, 0), (0, 0), (0, 1), (0, 1)),   # F.pad (0,1,0,1): W right, H bottom
}


def hdlut_forward(img_lr, h_weight, d_weight, L, upscale=2, tm=4096,
                  compute_dtype=jnp.float32, lookup=lut_lookup_pallas):
    B, C, H, W = img_lr.shape
    up2 = upscale * upscale

    # Hoisted once: per-ktype transposed LUTs (h -> row 0, d -> row 1), cast
    # to the compute dtype so up*up is the sublane dim inside the kernel.
    lut3 = jnp.stack([h_weight.T, d_weight.T], axis=0).astype(compute_dtype)

    # Build gather indices for all 8 (ktype, rotation) variants.  The rot90 /
    # pad / slice / mul-add glue is fused by XLA into the producer of idx2;
    # only idx2 round-trips HBM into the kernel.
    idx_rows, variants = [], []
    for ktype in ('h', 'd'):
        parts = []
        for r in (0, 1, 2, 3):
            x = jnp.rot90(img_lr, r, axes=(2, 3))
            Hr, Wr = x.shape[2], x.shape[3]
            xin = jnp.pad(x, _PAD[ktype], mode='edge').astype(jnp.int32)
            img_a = xin[:, :, 0:Hr, 0:Wr]
            if ktype == 'h':
                img_b = xin[:, :, 0:Hr, 1:1 + Wr]
            else:
                img_b = xin[:, :, 1:1 + Hr, 1:1 + Wr]
            parts.append((img_a * L + img_b).reshape(-1))
            if ktype == 'h':
                variants.append((r, Hr, Wr))
        idx_rows.append(jnp.concatenate(parts))
    idx2 = jnp.stack(idx_rows, axis=0)               # (2, 4*B*C*H*W) int32

    # One Pallas launch for all 8 variants (grid axis 0 = ktype).
    vals = lookup(idx2, lut3, tm=tm)                 # (2, up2, 4*M) float32

    # Pixel-shuffle, un-rotate and accumulate each variant (plain JAX glue).
    m = B * C * H * W
    out = jnp.zeros((B, C, H * upscale, W * upscale), jnp.float32)
    for ki in range(2):
        for vi, (r, Hr, Wr) in enumerate(variants):
            v = vals[ki, :, vi * m:(vi + 1) * m]     # (up2, m)
            tmp = v.reshape(upscale, upscale, B, C, Hr, Wr)
            tmp = tmp.transpose(2, 3, 4, 0, 5, 1).reshape(
                B, C, Hr * upscale, Wr * upscale)
            out = out + jnp.rot90(tmp, 4 - r, axes=(2, 3))
    return out / 2.0   # avg_factor


# ----------------------------------------------------------------------------
if __name__ == "__main__":
    # Small, deterministic setup.
    B, C, H, W = 2, 4, 16, 16
    L = 16            # LUT input range [0, L)
    upscale = 2

    key = jax.random.PRNGKey(0)
    k_img, k_h, k_d = jax.random.split(key, 3)

    # Quantized LR image with values in [0, L) (torch code casts to int64).
    img_lr = jax.random.randint(k_img, (B, C, H, W), 0, L, dtype=jnp.int32)

    # Deterministic synthetic LUT weights: shape (L*L, upscale*upscale).
    h_weight = jax.random.normal(k_h, (L * L, upscale * upscale), jnp.float32)
    d_weight = jax.random.normal(k_d, (L * L, upscale * upscale), jnp.float32)

    fwd = jax.jit(functools.partial(hdlut_forward, L=L, upscale=upscale,
                                    lookup=lut_lookup_pallas))
    out = jax.block_until_ready(fwd(img_lr, h_weight, d_weight))

    # Pure-JAX reference (jnp.take gather) for a silent correctness check.
    fwd_ref = jax.jit(functools.partial(hdlut_forward, L=L, upscale=upscale,
                                        lookup=lut_lookup_ref))
    out_ref = jax.block_until_ready(fwd_ref(img_lr, h_weight, d_weight))

    assert out.shape == (B, C, H * upscale, W * upscale)
    assert jnp.allclose(out, out_ref, atol=1e-5, rtol=1e-5)

    print("KERNEL_OK")
</pallas_src>

<mosaic_0001>
module attributes {stable_mosaic.version = 11 : i64} {
  func.func @_lut_lookup_kernel(%arg0: i32, %arg1: i32, %arg2: memref<1x1x4096xi32, #tpu.memory_space<vmem>>, %arg3: memref<1x4x256xf32, #tpu.memory_space<vmem>>, %arg4: memref<1x4x4096xf32, #tpu.memory_space<vmem>>) attributes {dimension_semantics = [#tpu.dimension_semantics<parallel>, #tpu.dimension_semantics<parallel>], iteration_bounds = array<i64: 2, 2>, scalar_prefetch = 0 : i64, scratch_operands = 0 : i64, tpu.core_type = #tpu.core_type<tc>, window_params = [{transform_indices = @transform_0, window_bounds = array<i64: 1, 1, 4096>}, {transform_indices = @transform_1, window_bounds = array<i64: 1, 4, 256>}, {transform_indices = @transform_2, window_bounds = array<i64: 1, 4, 4096>}]} {
    %c0 = arith.constant 0 : index
    %c0_0 = arith.constant 0 : index
    %c0_1 = arith.constant 0 : index
    %0 = vector.load %arg2[%c0, %c0_0, %c0_1] : memref<1x1x4096xi32, #tpu.memory_space<vmem>>, vector<1x1x4096xi32>
    %1 = vector.shape_cast %0 : vector<1x1x4096xi32> to vector<1x4096xi32>
    %c0_2 = arith.constant 0 : index
    %c0_3 = arith.constant 0 : index
    %c0_4 = arith.constant 0 : index
    %2 = vector.load %arg3[%c0_2, %c0_3, %c0_4] : memref<1x4x256xf32, #tpu.memory_space<vmem>>, vector<1x4x256xf32>
    %3 = vector.shape_cast %2 : vector<1x4x256xf32> to vector<4x256xf32>
    %4 = tpu.iota {dimensions = array<i32: 0>} : vector<256x4096xi32>
    %5 = vector.broadcast %1 : vector<1x4096xi32> to vector<256x4096xi32>
    %6 = arith.cmpi eq, %4, %5 : vector<256x4096xi32>
    %7 = arith.extui %6 : vector<256x4096xi1> to vector<256x4096xi32>
    %8 = arith.sitofp %7 : vector<256x4096xi32> to vector<256x4096xf32>
    %cst = arith.constant dense<0.000000e+00> : vector<4x4096xf32>
    %9 = tpu.matmul %3, %8, %cst {dimension_numbers = #tpu.dot_dimension_numbers<[1], [0], [0], [1], [0, 0, 1, 1], [], []>} : vector<4x256xf32>, vector<256x4096xf32>, vector<4x4096xf32> -> vector<4x4096xf32>
    %c0_5 = arith.constant 0 : index
    %c0_6 = arith.constant 0 : index
    %c0_7 = arith.constant 0 : index
    %10 = vector.load %arg4[%c0_5, %c0_6, %c0_7] : memref<1x4x4096xf32, #tpu.memory_space<vmem>>, vector<1x4x4096xf32>
    %11 = vector.shape_cast %10 : vector<1x4x4096xf32> to vector<4x4096xf32>
    %12 = vector.shape_cast %9 : vector<4x4096xf32> to vector<1x4x4096xf32>
    tpu.vector_store %arg4[%c0_5, %c0_6, %c0_7], %12 {strides = array<i32>} : memref<1x4x4096xf32, #tpu.memory_space<vmem>>, vector<1x4x4096xf32>,
    return
  }
  func.func @transform_0(%arg0: i32, %arg1: i32) -> (i32, i32, i32) {
    %c0_i32 = arith.constant 0 : i32
    %c0_i32_0 = arith.constant 0 : i32
    return %arg0, %c0_i32, %arg1 : i32, i32, i32
  }
  func.func @transform_1(%arg0: i32, %arg1: i32) -> (i32, i32, i32) {
    %c0_i32 = arith.constant 0 : i32
    %c0_i32_0 = arith.constant 0 : i32
    %c0_i32_1 = arith.constant 0 : i32
    return %arg0, %c0_i32, %c0_i32_0 : i32, i32, i32
  }
  func.func @transform_2(%arg0: i32, %arg1: i32) -> (i32, i32, i32) {
    %c0_i32 = arith.constant 0 : i32
    %c0_i32_0 = arith.constant 0 : i32
    return %arg0, %c0_i32, %arg1 : i32, i32, i32
  }
}

</mosaic_0001>

<bundles_post_ra>
// kernel: reverse.4
= control target key start
LH: loop header
LB: loop body
LE: loop exit
PB: predicated region body
PF: predicated region fallthrough
CT: control target
= control target key end

     0   :  { %v2_v0 = vlaneseq  ;;  %s223_s0 = inlined_call_operand.vmem [shape: s32[2,4,1,16], index: 0, kind: input, shape index: {}]   ;;  %s224_s1 = inlined_call_operand.vmem [shape: s32[2,4,1,16], index: 1, kind: output, shape index: {}]  }
   0x2   :  { %v3_v1 = vsub.s32 15, %v2_v0 }
   0x4   :  { %4 = vset.pattern.permute.xlu0 %v3_v1 }
   0x5   :  { %205 = vset.pattern.permute.xlu1 %v3_v1  ;;  %v33_v2 = vld [vmem:[%s223_s0] sm:$0xff]  ;;  %206 = vset.pattern.permute.xlu2 %v3_v1 }
   0x6   :  { %34 = vst [vmem:[#allocation1] sm:$0xff] %v33_v2 }
   0xd   :  { %v68_v3 = vld [vmem:[#allocation1] sm:$0x1]  ;;  %v61_v4 = vld [vmem:[#allocation1 + $0x2] sm:$0x1]  ;;  %v65_v5 = vld [vmem:[#allocation1 + $0x1] sm:$0x1] }
   0xe   :  { %69 = vst [vmem:[#allocation0] sm:$0x1] %v68_v3  ;;  %v57_v6 = vld [vmem:[#allocation1 + $0x3] sm:$0x1]  ;;  %v45_v7 = vld [vmem:[#allocation1 + $0x6] sm:$0x1] }
   0xf   :  { %63 = vst [vmem:[#allocation0 + $0x18] sm:$0x1] %v61_v4  ;;  %v41_v8 = vld [vmem:[#allocation1 + $0x7] sm:$0x1]  ;;  %v53_v9 = vld [vmem:[#allocation1 + $0x4] sm:$0x1] }
  0x10   :  { %67 = vst [vmem:[#allocation0 + $0x10] sm:$0x1] %v65_v5  ;;  %v49_v10 = vld [vmem:[#allocation1 + $0x5] sm:$0x1] }
  0x11   :  { %59 = vst [vmem:[#allocation0 + $0x30] sm:$0x1] %v57_v6 }
  0x12   :  { %47 = vst [vmem:[#allocation0 + $0x38] sm:$0x1] %v45_v7 }
  0x13   :  { %43 = vst [vmem:[#allocation0 + $0x8] sm:$0x1] %v41_v8 }
  0x14   :  { %55 = vst [vmem:[#allocation0 + $0x28] sm:$0x1] %v53_v9 }
  0x15   :  { %v70_v11 = vld [vmem:[#allocation0] sm:$0xff]  ;;  %51 = vst [vmem:[#allocation0 + $0x20] sm:$0x1] %v49_v10 }
  0x16   :  { %71 = vperm.xlu0 %4, %v70_v11   ;;  %v82_v12 = vld [vmem:[#allocation0 + $0x18] sm:$0xff] }
  0x17   :  { %83 = vperm.xlu1 %205, %v82_v12   ;;  %v76_v13 = vld [vmem:[#allocation0 + $0x10] sm:$0xff] }
  0x18   :  { %v88_v15 = vld [vmem:[#allocation0 + $0x30] sm:$0xff] }
  0x19   :  { %v106_v17 = vld [vmem:[#allocation0 + $0x38] sm:$0xff] }
  0x1a   :  { %v112_v18 = vld [vmem:[#allocation0 + $0x8] sm:$0xff] }
  0x1b   :  { %v94_v14 = vld [vmem:[#allocation0 + $0x28] sm:$0xff] }
  0x1c   :  { %95 = vperm.xlu2 %206, %v94_v14   ;;  %v100_v16 = vld [vmem:[#allocation0 + $0x20] sm:$0xff] }
  0x1e   :  { %77 = vperm.xlu0 %4, %v76_v13  }
  0x1f   :  { %89 = vperm.xlu1 %205, %v88_v15  }
  0x24   :  { %101 = vperm.xlu2 %206, %v100_v16  }
  0x26   :  { %107 = vperm.xlu0 %4, %v106_v17  }
  0x27   :  { %113 = vperm.xlu1 %205, %v112_v18  }
  0x76   :  { %v96_v19 = vpop.permute.xlu2 %95 }
  0x77   :  { %97 = vst [vmem:[#allocation2 + $0x28] sm:$0xff] %v96_v19 }
  0x7e   :  { %v141_v20 = vld [vmem:[#allocation2 + $0x28] sm:$0x1]  ;;  %v102_v21 = vpop.permute.xlu2 %101 }
  0x7f   :  { %145 = vst [vmem:[#allocation3 + $0x4] sm:$0x1] %v141_v20 }
  0x80   :  { %103 = vst [vmem:[#allocation2 + $0x8] sm:$0xff] %v102_v21 }
  0x87   :  { %v147_v22 = vld [vmem:[#allocation2 + $0x8] sm:$0x1] }
  0x88   :  { %v72_v23 = vpop.permute.xlu0 %71  ;;  %151 = vst [vmem:[#allocation3 + $0x5] sm:$0x1] %v147_v22 }
  0x89   :  { %73 = vst [vmem:[#allocation2] sm:$0xff] %v72_v23  ;;  %v84_v24 = vpop.permute.xlu1 %83 }
  0x8a   :  { %85 = vst [vmem:[#allocation2 + $0x10] sm:$0xff] %v84_v24 }
  0x90   :  { %v118_v25 = vld [vmem:[#allocation2] sm:$0x1]  ;;  %v78_v26 = vpop.permute.xlu0 %77 }
  0x91   :  { %121 = vst [vmem:[#allocation3] sm:$0x1] %v118_v25  ;;  %v129_v27 = vld [vmem:[#allocation2 + $0x10] sm:$0x1]  ;;  %v90_v28 = vpop.permute.xlu1 %89 }
  0x92   :  { %133 = vst [vmem:[#allocation3 + $0x2] sm:$0x1] %v129_v27 }
  0x93   :  { %79 = vst [vmem:[#allocation2 + $0x18] sm:$0xff] %v78_v26 }
  0x94   :  { %91 = vst [vmem:[#allocation2 + $0x20] sm:$0xff] %v90_v28 }
  0x98   :  { %v108_v29 = vpop.permute.xlu0 %107 }
  0x99   :  { %109 = vst [vmem:[#allocation2 + $0x30] sm:$0xff] %v108_v29  ;;  %v114_v30 = vpop.permute.xlu1 %113 }
  0x9a   :  { %v123_v31 = vld [vmem:[#allocation2 + $0x18] sm:$0x1]  ;;  %115 = vst [vmem:[#allocation2 + $0x38] sm:$0xff] %v114_v30 }
  0x9b   :  { %127 = vst [vmem:[#allocation3 + $0x1] sm:$0x1] %v123_v31  ;;  %v135_v32 = vld [vmem:[#allocation2 + $0x20] sm:$0x1] }
  0x9c   :  { %139 = vst [vmem:[#allocation3 + $0x3] sm:$0x1] %v135_v32 }
  0xa0   :  { %v153_v33 = vld [vmem:[#allocation2 + $0x30] sm:$0x1] }
  0xa1   :  { %157 = vst [vmem:[#allocation3 + $0x6] sm:$0x1] %v153_v33  ;;  %v159_v34 = vld [vmem:[#allocation2 + $0x38] sm:$0x1] }
  0xa2   :  { %163 = vst [vmem:[#allocation3 + $0x7] sm:$0x1] %v159_v34 }
  0xa9   :  { %v192_v35 = vld [vmem:[#allocation3] sm:$0xff] }
  0xaa   :  { %193 = vst [vmem:[%s224_s1] sm:$0xff] %v192_v35 }

// kernel: reverse.3
= control target key start
LH: loop header
LB: loop body
LE: loop exit
PB: predicated region body
PF: predicated region fallthrough
CT: control target
= control target key end

     0   :  { %v2_v0 = vlaneseq  ;;  %s441_s0 = inlined_call_operand.vmem [shape: s32[2,4,1,16], index: 0, kind: input, shape index: {}]   ;;  %s442_s1 = inlined_call_operand.vmem [shape: s32[2,4,1,16], index: 1, kind: output, shape index: {}]  }
   0x2   :  { %v3_v1 = vsub.s32 15, %v2_v0 }
   0x4   :  { %4 = vset.pattern.permute.xlu0 %v3_v1 }
   0x5   :  { %393 = vset.pattern.permute.xlu2 %v3_v1  ;;  %392 = vset.pattern.permute.xlu1 %v3_v1  ;;  %v137_v2 = vld [vmem:[#allocation1] sm:$0x1]  ;;  %v130_v3 = vld [vmem:[#allocation1 + $0x2] sm:$0x1]  ;;  %v122_v4 = vld [vmem:[#allocation1 + $0x4] sm:$0x1] }
   0x6   :  { %138 = vst [vmem:[#allocation0] sm:$0x1] %v137_v2  ;;  %v114_v5 = vld [vmem:[#allocation1 + $0x6] sm:$0x1]  ;;  %v106_v6 = vld [vmem:[#allocation1 + $0x8] sm:$0x1] }
   0x7   :  { %132 = vst [vmem:[#allocation0 + $0x10] sm:$0x1] %v130_v3  ;;  %v98_v7 = vld [vmem:[#allocation1 + $0xa] sm:$0x1]  ;;  %v26_v8 = vld [vmem:[%s441_s0 + $0x2] sm:$0x1] }
   0x8   :  { %124 = vst [vmem:[#allocation0 + $0x20] sm:$0x1] %v122_v4  ;;  %v24_v9 = vld [vmem:[%s441_s0 + $0x1] sm:$0x1]  ;;  %v22_v10 = vld [vmem:[%s441_s0] sm:$0x1] }
   0x9   :  { %116 = vst [vmem:[#allocation0 + $0x30] sm:$0x1] %v114_v5  ;;  %v28_v11 = vld [vmem:[%s441_s0 + $0x3] sm:$0x1]  ;;  %v82_v12 = vld [vmem:[#allocation1 + $0xe] sm:$0x1] }
   0xa   :  { %108 = vst [vmem:[#allocation0 + $0x40] sm:$0x1] %v106_v6  ;;  %v90_v13 = vld [vmem:[#allocation1 + $0xc] sm:$0x1]  ;;  %v34_v15 = vld [vmem:[%s441_s0 + $0x6] sm:$0x1] }
   0xb   :  { %100 = vst [vmem:[#allocation0 + $0x50] sm:$0x1] %v98_v7  ;;  %v32_v21 = vld [vmem:[%s441_s0 + $0x5] sm:$0x1]  ;;  %v30_v26 = vld [vmem:[%s441_s0 + $0x4] sm:$0x1] }
   0xc   :  { %27 = vst [vmem:[#allocation1 + $0x5] sm:$0x1] %v26_v8  ;;  %v36_v29 = vld [vmem:[%s441_s0 + $0x7] sm:$0x1]  ;;  %v152_v60 = vshrl.u32 %v2_v0, 7 }
   0xd   :  { %v140_v14 = vld [vmem:[#allocation0 + $0x7] ss:$-1 sm:$0xff]  ;;  %25 = vst [vmem:[#allocation1 + $0x3] sm:$0x1] %v24_v9 }
   0xe   :  { %v141_v16 = vrot.slane %v140_v14, 7  ;;  %v158_v17 = vld [vmem:[#allocation0 + $0x17] ss:$-1 sm:$0xff]  ;;  %23 = vst [vmem:[#allocation1 + $0x1] sm:$0x1] %v22_v10  ;;  %vm153_vm0 = vcmp.lt.s32.totalorder %v152_v60, 1 }
   0xf   :  { %v159_v18 = vrot.slane %v158_v17, 7  ;;  %v176_v19 = vld [vmem:[#allocation0 + $0x27] ss:$-1 sm:$0xff]  ;;  %29 = vst [vmem:[#allocation1 + $0x7] sm:$0x1] %v28_v11 }
  0x10   :  { %142 = vperm.xlu0 %4, %v141_v16   ;;  %v177_v20 = vrot.slane %v176_v19, 7  ;;  %84 = vst [vmem:[#allocation0 + $0x70] sm:$0x1] %v82_v12  ;;  %v194_v22 = vld [vmem:[#allocation0 + $0x37] ss:$-1 sm:$0xff] }
  0x11   :  { %160 = vperm.xlu1 %392, %v159_v18   ;;  %92 = vst [vmem:[#allocation0 + $0x60] sm:$0x1] %v90_v13  ;;  %v212_v23 = vld [vmem:[#allocation0 + $0x47] ss:$-1 sm:$0xff]  ;;  %v195_v27 = vrot.slane %v194_v22, 7 }
  0x12   :  { %178 = vperm.xlu2 %393, %v177_v20   ;;  %35 = vst [vmem:[#allocation1 + $0xd] sm:$0x1] %v34_v15  ;;  %v230_v24 = vld [vmem:[#allocation0 + $0x57] ss:$-1 sm:$0xff]  ;;  %v213_v30 = vrot.slane %v212_v23, 7 }
  0x13   :  { %v118_v25 = vld [vmem:[#allocation1 + $0x5] sm:$0x1]  ;;  %33 = vst [vmem:[#allocation1 + $0xb] sm:$0x1] %v32_v21  ;;  %v231_v32 = vrot.slane %v230_v24, 7 }
  0x14   :  { %120 = vst [vmem:[#allocation0 + $0x28] sm:$0x1] %v118_v25  ;;  %v126_v28 = vld [vmem:[#allocation1 + $0x3] sm:$0x1] }
  0x15   :  { %128 = vst [vmem:[#allocation0 + $0x18] sm:$0x1] %v126_v28  ;;  %v134_v31 = vld [vmem:[#allocation1 + $0x1] sm:$0x1] }
  0x16   :  { %136 = vst [vmem:[#allocation0 + $0x8] sm:$0x1] %v134_v31  ;;  %v110_v33 = vld [vmem:[#allocation1 + $0x7] sm:$0x1] }
  0x17   :  { %112 = vst [vmem:[#allocation0 + $0x38] sm:$0x1] %v110_v33  ;;  %v266_v45 = vld [vmem:[#allocation0 + $0x77] ss:$-1 sm:$0xff] }
  0x18   :  { %196 = vperm.xlu0 %4, %v195_v27   ;;  %31 = vst [vmem:[#allocation1 + $0x9] sm:$0x1] %v30_v26  ;;  %v248_v44 = vld [vmem:[#allocation0 + $0x67] ss:$-1 sm:$0xff]  ;;  %v267_v48 = vrot.slane %v266_v45, 7 }
  0x19   :  { %214 = vperm.xlu1 %392, %v213_v30   ;;  %v86_v34 = vld [vmem:[#allocation1 + $0xd] sm:$0x1]  ;;  %37 = vst [vmem:[#allocation1 + $0xf] sm:$0x1] %v36_v29  ;;  %v249_v47 = vrot.slane %v248_v44, 7 }
  0x1a   :  { %232 = vperm.xlu2 %393, %v231_v32   ;;  %88 = vst [vmem:[#allocation0 + $0x68] sm:$0x1] %v86_v34  ;;  %v94_v35 = vld [vmem:[#allocation1 + $0xb] sm:$0x1] }
  0x1b   :  { %v183_v36 = vld [vmem:[#allocation0 + $0x2f] ss:$-1 sm:$0xff]  ;;  %96 = vst [vmem:[#allocation0 + $0x58] sm:$0x1] %v94_v35 }
  0x1c   :  { %v165_v37 = vld [vmem:[#allocation0 + $0x1f] ss:$-1 sm:$0xff]  ;;  %v184_v40 = vrot.slane %v183_v36, 7 }
  0x1d   :  { %v166_v38 = vrot.slane %v165_v37, 7  ;;  %v147_v39 = vld [vmem:[#allocation0 + $0xf] ss:$-1 sm:$0xff] }
  0x1e   :  { %v148_v41 = vrot.slane %v147_v39, 7  ;;  %v201_v46 = vld [vmem:[#allocation0 + $0x3f] ss:$-1 sm:$0xff] }
  0x1f   :  { %v102_v42 = vld [vmem:[#allocation1 + $0x9] sm:$0x1]  ;;  %v202_v49 = vrot.slane %v201_v46, 7 }
  0x20   :  { %149 = vperm.xlu0 %4, %v148_v41   ;;  %104 = vst [vmem:[#allocation0 + $0x48] sm:$0x1] %v102_v42  ;;  %v78_v43 = vld [vmem:[#allocation1 + $0xf] sm:$0x1] }
  0x21   :  { %167 = vperm.xlu1 %392, %v166_v38   ;;  %80 = vst [vmem:[#allocation0 + $0x78] sm:$0x1] %v78_v43  ;;  %v255_v52 = vld [vmem:[#allocation0 + $0x6f] ss:$-1 sm:$0xff] }
  0x22   :  { %185 = vperm.xlu2 %393, %v184_v40   ;;  %v237_v51 = vld [vmem:[#allocation0 + $0x5f] ss:$-1 sm:$0xff]  ;;  %v256_v55 = vrot.slane %v255_v52, 7 }
  0x23   :  { %v238_v54 = vrot.slane %v237_v51, 7 }
  0x27   :  { %v219_v50 = vld [vmem:[#allocation0 + $0x4f] ss:$-1 sm:$0xff] }
  0x28   :  { %250 = vperm.xlu0 %4, %v249_v47   ;;  %v220_v53 = vrot.slane %v219_v50, 7  ;;  %v273_v56 = vld [vmem:[#allocation0 + $0x7f] ss:$-1 sm:$0xff] }
  0x29   :  { %268 = vperm.xlu1 %392, %v267_v48   ;;  %v274_v57 = vrot.slane %v273_v56, 7 }
  0x2a   :  { %203 = vperm.xlu2 %393, %v202_v49  }
  0x30   :  { %221 = vperm.xlu0 %4, %v220_v53  }
  0x31   :  { %239 = vperm.xlu1 %392, %v238_v54  }
  0x32   :  { %257 = vperm.xlu2 %393, %v256_v55  }
  0x38   :  { %275 = vperm.xlu0 %4, %v274_v57  }
  0x6c   :  { %v179_v58 = vpop.permute.xlu2 %178 }
  0x6d   :  { %180 = vst [vmem:[#allocation2 + $0x10] sm:$0xff] %v179_v58 }
  0x74   :  { %v233_v59 = vpop.permute.xlu2 %232 }
  0x75   :  { %234 = vst [vmem:[#allocation2 + $0x28] sm:$0xff] %v233_v59 }
  0x7c   :  { %v186_v61 = vpop.permute.xlu2 %185 }
  0x7d   :  { %190 = vst.msk [vmem:[#allocation2 + $0x10] sm:$0xff] %vm153_vm0, %v186_v61 }
  0x82   :  { %v143_v62 = vpop.permute.xlu0 %142 }
  0x83   :  { %144 = vst [vmem:[#allocation2] sm:$0xff] %v143_v62  ;;  %v161_v63 = vpop.permute.xlu1 %160 }
  0x84   :  { %v294_v0 = vld [vmem:[#allocation2 + $0x10] sm:$0x1]  ;;  %162 = vst [vmem:[#allocation2 + $0x8] sm:$0xff] %v161_v63  ;;  %v204_v1 = vpop.permute.xlu2 %203 }
  0x85   :  { %298 = vst [vmem:[#allocation3 + $0x2] sm:$0x1] %v294_v0 }
  0x8a   :  { %v197_v2 = vpop.permute.xlu0 %196 }
  0x8b   :  { %198 = vst [vmem:[#allocation2 + $0x18] sm:$0xff] %v197_v2  ;;  %v215_v3 = vpop.permute.xlu1 %214 }
  0x8c   :  { %208 = vst.msk [vmem:[#allocation2 + $0x18] sm:$0xff] %vm153_vm0, %v204_v1  ;;  %v258_v4 = vpop.permute.xlu2 %257 }
  0x8d   :  { %216 = vst [vmem:[#allocation2 + $0x20] sm:$0xff] %v215_v3 }
  0x92   :  { %v150_v5 = vpop.permute.xlu0 %149 }
  0x93   :  { %v300_v6 = vld [vmem:[#allocation2 + $0x18] sm:$0x1]  ;;  %v168_v7 = vpop.permute.xlu1 %167  ;;  %154 = vst.msk [vmem:[#allocation2] sm:$0xff] %vm153_vm0, %v150_v5 }
  0x94   :  { %304 = vst [vmem:[#allocation3 + $0x3] sm:$0x1] %v300_v6 }
  0x95   :  { %172 = vst.msk [vmem:[#allocation2 + $0x8] sm:$0xff] %vm153_vm0, %v168_v7 }
  0x9a   :  { %v283_v8 = vld [vmem:[#allocation2] sm:$0x1]  ;;  %v251_v9 = vpop.permute.xlu0 %250 }
  0x9b   :  { %286 = vst [vmem:[#allocation3] sm:$0x1] %v283_v8  ;;  %v269_v10 = vpop.permute.xlu1 %268 }
  0x9c   :  { %v288_v11 = vld [vmem:[#allocation2 + $0x8] sm:$0x1]  ;;  %270 = vst [vmem:[#allocation2 + $0x38] sm:$0xff] %v269_v10 }
  0x9d   :  { %292 = vst [vmem:[#allocation3 + $0x1] sm:$0x1] %v288_v11 }
  0x9e   :  { %252 = vst [vmem:[#allocation2 + $0x30] sm:$0xff] %v251_v9 }
  0x9f   :  { %262 = vst.msk [vmem:[#allocation2 + $0x30] sm:$0xff] %vm153_vm0, %v258_v4 }
  0xa2   :  { %v222_v12 = vpop.permute.xlu0 %221 }
  0xa3   :  { %v240_v13 = vpop.permute.xlu1 %239  ;;  %226 = vst.msk [vmem:[#allocation2 + $0x20] sm:$0xff] %vm153_vm0, %v222_v12 }
  0xa4   :  { %244 = vst.msk [vmem:[#allocation2 + $0x28] sm:$0xff] %vm153_vm0, %v240_v13 }
  0xa6   :  { %v318_v14 = vld [vmem:[#allocation2 + $0x30] sm:$0x1] }
  0xa7   :  { %322 = vst [vmem:[#allocation3 + $0x6] sm:$0x1] %v318_v14 }
  0xaa   :  { %v306_v15 = vld [vmem:[#allocation2 + $0x20] sm:$0x1]  ;;  %v276_v16 = vpop.permute.xlu0 %275 }
  0xab   :  { %v312_v17 = vld [vmem:[#allocation2 + $0x28] sm:$0x1]  ;;  %310 = vst [vmem:[#allocation3 + $0x4] sm:$0x1] %v306_v15 }
  0xac   :  { %316 = vst [vmem:[#allocation3 + $0x5] sm:$0x1] %v312_v17 }
  0xad   :  { %280 = vst.msk [vmem:[#allocation2 + $0x38] sm:$0xff] %vm153_vm0, %v276_v16 }
  0xb4   :  { %v324_v18 = vld [vmem:[#allocation2 + $0x38] sm:$0x1] }
  0xb5   :  { %328 = vst [vmem:[#allocation3 + $0x7] sm:$0x1] %v324_v18 }
  0xbc   :  { %v357_v19 = vld [vmem:[#allocation3] sm:$0xff] }
  0xbd   :  { %358 = vst [vmem:[%s442_s1] sm:$0xff] %v357_v19 }

// kernel: reverse.1
= control target key start
LH: loop header
LB: loop body
LE: loop exit
PB: predicated region body
PF: predicated region fallthrough
CT: control target
= control target key end

     0   :  { %v2_v0 = vlaneseq  ;;  %s446_s0 = inlined_call_operand.vmem [shape: s32[2,4,16,1], index: 0, kind: input, shape index: {}]   ;;  %s447_s1 = inlined_call_operand.vmem [shape: s32[2,4,16,1], index: 1, kind: output, shape index: {}]  }
   0x2   :  { %v3_v1 = vsub.s32 0, %v2_v0 }
   0x4   :  { %4 = vset.pattern.permute.xlu0 %v3_v1 }
   0x5   :  { %339 = vset.pattern.permute.xlu2 %v3_v1  ;;  %338 = vset.pattern.permute.xlu1 %v3_v1  ;;  %v73_v2 = vld [vmem:[%s446_s0 + $0x28] sm:$0xff]  ;;  %v69_v3 = vld [vmem:[%s446_s0 + $0x18] sm:$0xff]  ;;  %v71_v5 = vld [vmem:[%s446_s0 + $0x20] sm:$0xff] }
   0x6   :  { %v65_v4 = vld [vmem:[%s446_s0 + $0x8] sm:$0xff]  ;;  %74 = vst [vmem:[#allocation0 + $0x28] sm:$0xff] %v73_v2  ;;  %v67_v6 = vld [vmem:[%s446_s0 + $0x10] sm:$0xff]  ;;  %v63_v7 = vld [vmem:[%s446_s0] sm:$0xff] }
   0x7   :  { %70 = vst [vmem:[#allocation0 + $0x18] sm:$0xff] %v69_v3  ;;  %v81_v8 = vld [vmem:[%s446_s0 + $0x48] sm:$0xff]  ;;  %v75_v9 = vld [vmem:[%s446_s0 + $0x30] sm:$0xff]  ;;  %v77_v10 = vld [vmem:[%s446_s0 + $0x38] sm:$0xff] }
   0x8   :  { %66 = vst [vmem:[#allocation0 + $0x8] sm:$0xff] %v65_v4  ;;  %v83_v11 = vld [vmem:[%s446_s0 + $0x50] sm:$0xff]  ;;  %v85_v13 = vld [vmem:[%s446_s0 + $0x58] sm:$0xff]  ;;  %v79_v15 = vld [vmem:[%s446_s0 + $0x40] sm:$0xff] }
   0x9   :  { %72 = vst [vmem:[#allocation0 + $0x20] sm:$0xff] %v71_v5  ;;  %v93_v17 = vld [vmem:[%s446_s0 + $0x78] sm:$0xff]  ;;  %v87_v18 = vld [vmem:[%s446_s0 + $0x60] sm:$0xff]  ;;  %v89_v19 = vld [vmem:[%s446_s0 + $0x68] sm:$0xff] }
   0xa   :  { %68 = vst [vmem:[#allocation0 + $0x10] sm:$0xff] %v67_v6  ;;  %v91_v20 = vld [vmem:[%s446_s0 + $0x70] sm:$0xff] }
   0xb   :  { %64 = vst [vmem:[#allocation0] sm:$0xff] %v63_v7 }
   0xc   :  { %82 = vst [vmem:[#allocation0 + $0x48] sm:$0xff] %v81_v8 }
   0xd   :  { %v128_v12 = vld [vmem:[#allocation0 + $0x2f] ss:$-1 sm:$0xff]  ;;  %76 = vst [vmem:[#allocation0 + $0x30] sm:$0xff] %v75_v9 }
   0xe   :  { %129 = vperm.xlu2 %339, %v128_v12   ;;  %v114_v14 = vld [vmem:[#allocation0 + $0x1f] ss:$-1 sm:$0xff]  ;;  %78 = vst [vmem:[#allocation0 + $0x38] sm:$0xff] %v77_v10 }
   0xf   :  { %115 = vperm.xlu1 %338, %v114_v14   ;;  %v100_v16 = vld [vmem:[#allocation0 + $0xf] ss:$-1 sm:$0xff]  ;;  %84 = vst [vmem:[#allocation0 + $0x50] sm:$0xff] %v83_v11 }
  0x10   :  { %101 = vperm.xlu0 %4, %v100_v16   ;;  %86 = vst [vmem:[#allocation0 + $0x58] sm:$0xff] %v85_v13  ;;  %v134_v21 = vld [vmem:[#allocation0 + $0x27] ss:$-1 sm:$0xff] }
  0x11   :  { %80 = vst [vmem:[#allocation0 + $0x40] sm:$0xff] %v79_v15  ;;  %v120_v22 = vld [vmem:[#allocation0 + $0x17] ss:$-1 sm:$0xff] }
  0x12   :  { %94 = vst [vmem:[#allocation0 + $0x78] sm:$0xff] %v93_v17  ;;  %v106_v23 = vld [vmem:[#allocation0 + $0x7] ss:$-1 sm:$0xff] }
  0x13   :  { %88 = vst [vmem:[#allocation0 + $0x60] sm:$0xff] %v87_v18  ;;  %v156_v24 = vld [vmem:[#allocation0 + $0x4f] ss:$-1 sm:$0xff] }
  0x14   :  { %90 = vst [vmem:[#allocation0 + $0x68] sm:$0xff] %v89_v19  ;;  %v148_v25 = vld [vmem:[#allocation0 + $0x37] ss:$-1 sm:$0xff] }
  0x15   :  { %92 = vst [vmem:[#allocation0 + $0x70] sm:$0xff] %v91_v20  ;;  %v142_v26 = vld [vmem:[#allocation0 + $0x3f] ss:$-1 sm:$0xff] }
  0x16   :  { %135 = vperm.xlu2 %339, %v134_v21   ;;  %v176_v27 = vld [vmem:[#allocation0 + $0x57] ss:$-1 sm:$0xff] }
  0x17   :  { %121 = vperm.xlu1 %338, %v120_v22   ;;  %v170_v28 = vld [vmem:[#allocation0 + $0x5f] ss:$-1 sm:$0xff] }
  0x18   :  { %107 = vperm.xlu0 %4, %v106_v23   ;;  %v162_v29 = vld [vmem:[#allocation0 + $0x47] ss:$-1 sm:$0xff] }
  0x19   :  { %v198_v30 = vld [vmem:[#allocation0 + $0x7f] ss:$-1 sm:$0xff] }
  0x1a   :  { %v190_v31 = vld [vmem:[#allocation0 + $0x67] ss:$-1 sm:$0xff] }
  0x1b   :  { %v184_v32 = vld [vmem:[#allocation0 + $0x6f] ss:$-1 sm:$0xff] }
  0x1c   :  { %v204_v33 = vld [vmem:[#allocation0 + $0x77] ss:$-1 sm:$0xff] }
  0x1e   :  { %157 = vperm.xlu2 %339, %v156_v24  }
  0x1f   :  { %149 = vperm.xlu1 %338, %v148_v25  }
  0x20   :  { %143 = vperm.xlu0 %4, %v142_v26  }
  0x26   :  { %177 = vperm.xlu2 %339, %v176_v27  }
  0x27   :  { %171 = vperm.xlu1 %338, %v170_v28  }
  0x28   :  { %163 = vperm.xlu0 %4, %v162_v29  }
  0x2e   :  { %199 = vperm.xlu2 %339, %v198_v30  }
  0x2f   :  { %191 = vperm.xlu1 %338, %v190_v31  }
  0x30   :  { %185 = vperm.xlu0 %4, %v184_v32  }
  0x38   :  { %205 = vperm.xlu0 %4, %v204_v33  }
  0x68   :  { %v130_v34 = vpop.permute.xlu2 %129 }
  0x69   :  { %275 = vst [vmem:[%s447_s1 + $0x20] sm:$0xff] %v130_v34 }
  0x70   :  { %v136_v35 = vpop.permute.xlu2 %135 }
  0x71   :  { %277 = vst [vmem:[%s447_s1 + $0x28] sm:$0xff] %v136_v35 }
  0x78   :  { %v158_v36 = vpop.permute.xlu2 %157 }
  0x79   :  { %283 = vst [vmem:[%s447_s1 + $0x40] sm:$0xff] %v158_v36 }
  0x80   :  { %v178_v37 = vpop.permute.xlu2 %177 }
  0x81   :  { %289 = vst [vmem:[%s447_s1 + $0x58] sm:$0xff] %v178_v37  ;;  %v116_v38 = vpop.permute.xlu1 %115 }
  0x82   :  { %271 = vst [vmem:[%s447_s1 + $0x10] sm:$0xff] %v116_v38  ;;  %v102_v39 = vpop.permute.xlu0 %101 }
  0x83   :  { %267 = vst [vmem:[%s447_s1] sm:$0xff] %v102_v39 }
  0x88   :  { %v200_v40 = vpop.permute.xlu2 %199 }
  0x89   :  { %295 = vst [vmem:[%s447_s1 + $0x70] sm:$0xff] %v200_v40  ;;  %v122_v41 = vpop.permute.xlu1 %121 }
  0x8a   :  { %273 = vst [vmem:[%s447_s1 + $0x18] sm:$0xff] %v122_v41  ;;  %v108_v42 = vpop.permute.xlu0 %107 }
  0x8b   :  { %269 = vst [vmem:[%s447_s1 + $0x8] sm:$0xff] %v108_v42 }
  0x91   :  { %v150_v43 = vpop.permute.xlu1 %149 }
  0x92   :  { %281 = vst [vmem:[%s447_s1 + $0x38] sm:$0xff] %v150_v43  ;;  %v144_v44 = vpop.permute.xlu0 %143 }
  0x93   :  { %279 = vst [vmem:[%s447_s1 + $0x30] sm:$0xff] %v144_v44 }
  0x99   :  { %v172_v45 = vpop.permute.xlu1 %171 }
  0x9a   :  { %287 = vst [vmem:[%s447_s1 + $0x50] sm:$0xff] %v172_v45  ;;  %v164_v46 = vpop.permute.xlu0 %163 }
  0x9b   :  { %285 = vst [vmem:[%s447_s1 + $0x48] sm:$0xff] %v164_v46 }
  0xa1   :  { %v192_v47 = vpop.permute.xlu1 %191 }
  0xa2   :  { %293 = vst [vmem:[%s447_s1 + $0x68] sm:$0xff] %v192_v47  ;;  %v186_v48 = vpop.permute.xlu0 %185 }
  0xa3   :  { %291 = vst [vmem:[%s447_s1 + $0x60] sm:$0xff] %v186_v48 }
  0xaa   :  { %v206_v49 = vpop.permute.xlu0 %205 }
  0xab   :  { %297 = vst [vmem:[%s447_s1 + $0x78] sm:$0xff] %v206_v49 }

// kernel: squeeze.9
= control target key start
LH: loop header
LB: loop body
LE: loop exit
PB: predicated region body
PF: predicated region fallthrough
CT: control target
= control target key end

     0   :  { %vm243_vm0 = vcmask 1047556   ;;  %s1158_s30 = smov 112   ;;  %s1160_s10 = smov 80   ;;  %vm67_vm1 = vcmask 130048   ;;  %s2039_s0 = inlined_call_operand.vmem [shape: f32[1,4,2048], index: 0, kind: input, shape index: {}]   ;;  %s2040_s1 = inlined_call_operand.vmem [shape: f32[2,2,2,4,16,16], index: 1, kind: output, shape index: {}]  }
   0x1   :  { %v973_v0 = vld [vmem:[%s2039_s0 + $0xc] sm:$0xf]  ;;  %v974_v1 = vld [vmem:[%s2039_s0 + $0x8] sm:$0xf]  ;;  %v975_v2 = vld [vmem:[%s2039_s0 + $0x4] sm:$0xf] }
   0x2   :  { %55 = vst [vmem:[#allocation0 + $0x18] sm:$0xf] %v973_v0  ;;  %v64_v3 = vld [vmem:[%s2039_s0] sm:$0xf]  ;;  %v969_v4 = vld [vmem:[%s2039_s0 + $0x1c] sm:$0xf] }
   0x3   :  { %59 = vst [vmem:[#allocation0 + $0x10] sm:$0xf] %v974_v1  ;;  %v970_v5 = vld [vmem:[%s2039_s0 + $0x18] sm:$0xf]  ;;  %v971_v6 = vld [vmem:[%s2039_s0 + $0x14] sm:$0xf] }
   0x4   :  { %63 = vst [vmem:[#allocation0 + $0x8] sm:$0xf] %v975_v2  ;;  %v972_v7 = vld [vmem:[%s2039_s0 + $0x10] sm:$0xf]  ;;  %v961_v8 = vld [vmem:[%s2039_s0 + $0x3c] sm:$0xf] }
   0x5   :  { %65 = vst [vmem:[#allocation0] sm:$0xf] %v64_v3  ;;  %v962_v9 = vld [vmem:[%s2039_s0 + $0x38] sm:$0xf]  ;;  %v963_v10 = vld [vmem:[%s2039_s0 + $0x34] sm:$0xf] }
   0x6   :  { %39 = vst [vmem:[#allocation0 + $0x38] sm:$0xf] %v969_v4  ;;  %v964_v11 = vld [vmem:[%s2039_s0 + $0x30] sm:$0xf]  ;;  %v965_v16 = vld [vmem:[%s2039_s0 + $0x2c] sm:$0xf] }
   0x7   :  { %43 = vst [vmem:[#allocation0 + $0x30] sm:$0xf] %v970_v5  ;;  %v966_v21 = vld [vmem:[%s2039_s0 + $0x28] sm:$0xf]  ;;  %v967_v22 = vld [vmem:[%s2039_s0 + $0x24] sm:$0xf] }
   0x8   :  { %47 = vst [vmem:[#allocation0 + $0x28] sm:$0xf] %v971_v6  ;;  %v968_v26 = vld [vmem:[%s2039_s0 + $0x20] sm:$0xf]  ;;  %s1159_s0 = smov 96   ;;  %s1161_s11 = smov 64  }
   0x9   :  { %51 = vst [vmem:[#allocation0 + $0x20] sm:$0xf] %v972_v7  ;;  %s1162_s12 = smov 48   ;;  %s1163_s13 = smov 32  }
   0xa   :  { %7 = vst [vmem:[#allocation0 + $0x78] sm:$0xf] %v961_v8 }
   0xb   :  { %11 = vst [vmem:[#allocation0 + $0x70] sm:$0xf] %v962_v9 }
   0xc   :  { %v240_v12 = vld [vmem:[#allocation0] ss:$8 sm:$0xf]   ;;  %v242_v13 = vld [vmem:[#allocation0 - $0x1f] ss:$8 sm:$0xf0]  }
   0xd   :  { %v244_v14 = vsel %vm243_vm0, %v242_v13, %v240_v12  ;;  %v253_v15 = vld [vmem:[#allocation0 + $0x2] ss:$8 sm:$0xf]   ;;  %15 = vst [vmem:[#allocation0 + $0x68] sm:$0xf] %v963_v10 }
   0xe   :  { %245 = vrot.lane.b32.xlu0 %v244_v14, %s1158_s30  ;;  %v255_v17 = vld [vmem:[#allocation0 - $0x1d] ss:$8 sm:$0xf0]   ;;  %19 = vst [vmem:[#allocation0 + $0x60] sm:$0xf] %v964_v11 }
   0xf   :  { %v257_v23 = vsel %vm243_vm0, %v255_v17, %v253_v15  ;;  %23 = vst [vmem:[#allocation0 + $0x58] sm:$0xf] %v965_v16  ;;  %v356_v36 = vld [vmem:[#allocation0 + $0x2] ss:$8 sm:$0xf]  }
  0x10   :  { %v266_v18 = vld [vmem:[#allocation0 + $0x20] ss:$8 sm:$0xf]   ;;  %v268_v19 = vld [vmem:[#allocation0 + $0x1] ss:$8 sm:$0xf0]  }
  0x11   :  { %v270_v20 = vsel %vm243_vm0, %v268_v19, %v266_v18  ;;  %v279_v24 = vld [vmem:[#allocation0 + $0x22] ss:$8 sm:$0xf]   ;;  %v281_v25 = vld [vmem:[#allocation0 + $0x3] ss:$8 sm:$0xf0]  }
  0x12   :  { %271 = vrot.lane.b32.xlu1 %v270_v20, %s1158_s30  ;;  %27 = vst [vmem:[#allocation0 + $0x50] sm:$0xf] %v966_v21  ;;  %v283_v27 = vsel %vm243_vm0, %v281_v25, %v279_v24  ;;  %v358_v37 = vld [vmem:[#allocation0 - $0x1d] ss:$8 sm:$0xf0]  }
  0x13   :  { %31 = vst [vmem:[#allocation0 + $0x48] sm:$0xf] %v967_v22  ;;  %v360_v39 = vsel %vm243_vm0, %v358_v37, %v356_v36  ;;  %v369_v42 = vld [vmem:[#allocation0 + $0x20] ss:$8 sm:$0xf]  }
  0x14   :  { %35 = vst [vmem:[#allocation0 + $0x40] sm:$0xf] %v968_v26  ;;  %v371_v43 = vld [vmem:[#allocation0 + $0x1] ss:$8 sm:$0xf0]  }
  0x15   :  { %v318_v28 = vld [vmem:[#allocation0 + $0x60] ss:$8 sm:$0xf]   ;;  %v320_v29 = vld [vmem:[#allocation0 + $0x41] ss:$8 sm:$0xf0]   ;;  %v373_v45 = vsel %vm243_vm0, %v371_v43, %v369_v42 }
  0x16   :  { %258 = vrot.lane.b32.xlu0 %v257_v23, %s1158_s30  ;;  %v322_v30 = vsel %vm243_vm0, %v320_v29, %v318_v28  ;;  %v331_v31 = vld [vmem:[#allocation0 + $0x62] ss:$8 sm:$0xf]   ;;  %v333_v32 = vld [vmem:[#allocation0 + $0x43] ss:$8 sm:$0xf0]  }
  0x17   :  { %v335_v33 = vsel %vm243_vm0, %v333_v32, %v331_v31  ;;  %v343_v49 = vld [vmem:[#allocation0] ss:$8 sm:$0xf]   ;;  %v345_v50 = vld [vmem:[#allocation0 - $0x1f] ss:$8 sm:$0xf0]  }
  0x18   :  { %v347_v53 = vsel %vm243_vm0, %v345_v50, %v343_v49  ;;  %v434_v55 = vld [vmem:[#allocation0 + $0x62] ss:$8 sm:$0xf]   ;;  %v436_v56 = vld [vmem:[#allocation0 + $0x43] ss:$8 sm:$0xf0]  }
  0x19   :  { %v438_v57 = vsel %vm243_vm0, %v436_v56, %v434_v55  ;;  %v382_v58 = vld [vmem:[#allocation0 + $0x22] ss:$8 sm:$0xf]   ;;  %v384_v59 = vld [vmem:[#allocation0 + $0x3] ss:$8 sm:$0xf0]  }
  0x1a   :  { %284 = vrot.lane.b32.xlu1 %v283_v27, %s1158_s30  ;;  %v446_v60 = vld [vmem:[#allocation0] ss:$8 sm:$0xf]   ;;  %v448_v61 = vld [vmem:[#allocation0 - $0x1f] ss:$8 sm:$0xf0]   ;;  %v386_v62 = vsel %vm243_vm0, %v384_v59, %v382_v58 }
  0x1b   :  { %v292_v34 = vld [vmem:[#allocation0 + $0x40] ss:$8 sm:$0xf]   ;;  %v294_v35 = vld [vmem:[#allocation0 + $0x21] ss:$8 sm:$0xf0]   ;;  %v450_v63 = vsel %vm243_vm0, %v448_v61, %v446_v60 }
  0x1c   :  { %v296_v38 = vsel %vm243_vm0, %v294_v35, %v292_v34  ;;  %v305_v40 = vld [vmem:[#allocation0 + $0x42] ss:$8 sm:$0xf]   ;;  %v307_v41 = vld [vmem:[#allocation0 + $0x23] ss:$8 sm:$0xf0]  }
  0x1d   :  { %297 = vrot.lane.b32.xlu2 %v296_v38, %s1158_s30  ;;  %v309_v44 = vsel %vm243_vm0, %v307_v41, %v305_v40  ;;  %v395_v46 = vld [vmem:[#allocation0 + $0x40] ss:$8 sm:$0xf]   ;;  %v397_v47 = vld [vmem:[#allocation0 + $0x21] ss:$8 sm:$0xf0]  }
  0x1e   :  { %323 = vrot.lane.b32.xlu0 %v322_v30, %s1158_s30  ;;  %v399_v48 = vsel %vm243_vm0, %v397_v47, %v395_v46  ;;  %v408_v51 = vld [vmem:[#allocation0 + $0x42] ss:$8 sm:$0xf]   ;;  %v410_v52 = vld [vmem:[#allocation0 + $0x23] ss:$8 sm:$0xf0]  }
  0x1f   :  { %v412_v54 = vsel %vm243_vm0, %v410_v52, %v408_v51  ;;  %v472_v0 = vld [vmem:[#allocation0 + $0x20] ss:$8 sm:$0xf]   ;;  %v474_v1 = vld [vmem:[#allocation0 + $0x1] ss:$8 sm:$0xf0]  }
  0x20   :  { %v476_v2 = vsel %vm243_vm0, %v474_v1, %v472_v0  ;;  %v421_v3 = vld [vmem:[#allocation0 + $0x60] ss:$8 sm:$0xf]   ;;  %v423_v4 = vld [vmem:[#allocation0 + $0x41] ss:$8 sm:$0xf0]  }
  0x21   :  { %v485_v5 = vld [vmem:[#allocation0 + $0x22] ss:$8 sm:$0xf]   ;;  %v487_v6 = vld [vmem:[#allocation0 + $0x3] ss:$8 sm:$0xf0]   ;;  %v425_v7 = vsel %vm243_vm0, %v423_v4, %v421_v3 }
  0x22   :  { %336 = vrot.lane.b32.xlu1 %v335_v33, %s1158_s30  ;;  %v489_v8 = vsel %vm243_vm0, %v487_v6, %v485_v5  ;;  %v511_v9 = vld [vmem:[#allocation0 + $0x42] ss:$8 sm:$0xf]   ;;  %v513_v10 = vld [vmem:[#allocation0 + $0x23] ss:$8 sm:$0xf0]  }
  0x23   :  { %v515_v11 = vsel %vm243_vm0, %v513_v10, %v511_v9  ;;  %v459_v12 = vld [vmem:[#allocation0 + $0x2] ss:$8 sm:$0xf]   ;;  %v461_v13 = vld [vmem:[#allocation0 - $0x1d] ss:$8 sm:$0xf0]  }
  0x24   :  { %v524_v14 = vld [vmem:[#allocation0 + $0x60] ss:$8 sm:$0xf]   ;;  %v526_v15 = vld [vmem:[#allocation0 + $0x41] ss:$8 sm:$0xf0]   ;;  %v463_v16 = vsel %vm243_vm0, %v461_v13, %v459_v12 }
  0x25   :  { %310 = vrot.lane.b32.xlu2 %v309_v44, %s1158_s30  ;;  %v528_v17 = vsel %vm243_vm0, %v526_v15, %v524_v14  ;;  %v549_v18 = vld [vmem:[#allocation0] ss:$8 sm:$0xf]   ;;  %v551_v19 = vld [vmem:[#allocation0 - $0x1f] ss:$8 sm:$0xf0]  }
  0x26   :  { %361 = vrot.lane.b32.xlu0 %v360_v39, %s1159_s0  ;;  %v553_v20 = vsel %vm243_vm0, %v551_v19, %v549_v18  ;;  %v498_v21 = vld [vmem:[#allocation0 + $0x40] ss:$8 sm:$0xf]   ;;  %v500_v22 = vld [vmem:[#allocation0 + $0x21] ss:$8 sm:$0xf0]  }
  0x27   :  { %v562_v23 = vld [vmem:[#allocation0 + $0x2] ss:$8 sm:$0xf]   ;;  %v564_v24 = vld [vmem:[#allocation0 - $0x1d] ss:$8 sm:$0xf0]   ;;  %v502_v25 = vsel %vm243_vm0, %v500_v22, %v498_v21 }
  0x28   :  { %v566_v26 = vsel %vm243_vm0, %v564_v24, %v562_v23  ;;  %v588_v27 = vld [vmem:[#allocation0 + $0x22] ss:$8 sm:$0xf]   ;;  %v590_v28 = vld [vmem:[#allocation0 + $0x3] ss:$8 sm:$0xf0]  }
  0x29   :  { %v592_v29 = vsel %vm243_vm0, %v590_v28, %v588_v27  ;;  %v537_v30 = vld [vmem:[#allocation0 + $0x62] ss:$8 sm:$0xf]   ;;  %v539_v31 = vld [vmem:[#allocation0 + $0x43] ss:$8 sm:$0xf0]  }
  0x2a   :  { %374 = vrot.lane.b32.xlu1 %v373_v45, %s1159_s0  ;;  %v601_v32 = vld [vmem:[#allocation0 + $0x40] ss:$8 sm:$0xf]   ;;  %v603_v33 = vld [vmem:[#allocation0 + $0x21] ss:$8 sm:$0xf0]   ;;  %v541_v34 = vsel %vm243_vm0, %v539_v31, %v537_v30 }
  0x2b   :  { %v605_v35 = vsel %vm243_vm0, %v603_v33, %v601_v32  ;;  %v627_v36 = vld [vmem:[#allocation0 + $0x60] ss:$8 sm:$0xf]   ;;  %v629_v37 = vld [vmem:[#allocation0 + $0x41] ss:$8 sm:$0xf0]  }
  0x2c   :  { %v631_v38 = vsel %vm243_vm0, %v629_v37, %v627_v36  ;;  %v575_v39 = vld [vmem:[#allocation0 + $0x20] ss:$8 sm:$0xf]   ;;  %v577_v40 = vld [vmem:[#allocation0 + $0x1] ss:$8 sm:$0xf0]  }
  0x2d   :  { %348 = vrot.lane.b32.xlu2 %v347_v53, %s1159_s0  ;;  %v640_v41 = vld [vmem:[#allocation0 + $0x62] ss:$8 sm:$0xf]   ;;  %v642_v42 = vld [vmem:[#allocation0 + $0x43] ss:$8 sm:$0xf0]   ;;  %v579_v43 = vsel %vm243_vm0, %v577_v40, %v575_v39 }
  0x2e   :  { %400 = vrot.lane.b32.xlu0 %v399_v48, %s1159_s0  ;;  %v644_v44 = vsel %vm243_vm0, %v642_v42, %v640_v41  ;;  %v665_v45 = vld [vmem:[#allocation0 + $0x2] ss:$8 sm:$0xf]   ;;  %v667_v46 = vld [vmem:[#allocation0 - $0x1d] ss:$8 sm:$0xf0]  }
  0x2f   :  { %v669_v47 = vsel %vm243_vm0, %v667_v46, %v665_v45  ;;  %v614_v48 = vld [vmem:[#allocation0 + $0x42] ss:$8 sm:$0xf]   ;;  %v616_v49 = vld [vmem:[#allocation0 + $0x23] ss:$8 sm:$0xf0]  }
  0x30   :  { %v678_v50 = vld [vmem:[#allocation0 + $0x20] ss:$8 sm:$0xf]   ;;  %v680_v51 = vld [vmem:[#allocation0 + $0x1] ss:$8 sm:$0xf0]   ;;  %v618_v52 = vsel %vm243_vm0, %v616_v49, %v614_v48 }
  0x31   :  { %v682_v53 = vsel %vm243_vm0, %v680_v51, %v678_v50  ;;  %v706_v55 = vld [vmem:[#allocation0 + $0x21] ss:$8 sm:$0xf0]   ;;  %v717_v59 = vld [vmem:[#allocation0 + $0x42] ss:$8 sm:$0xf]  }
  0x32   :  { %413 = vrot.lane.b32.xlu1 %v412_v54, %s1159_s0  ;;  %v704_v54 = vld [vmem:[#allocation0 + $0x40] ss:$8 sm:$0xf]   ;;  %v654_v58 = vld [vmem:[#allocation0 - $0x1f] ss:$8 sm:$0xf0]  }
  0x33   :  { %v708_v56 = vsel %vm243_vm0, %v706_v55, %v704_v54  ;;  %v719_v60 = vld [vmem:[#allocation0 + $0x23] ss:$8 sm:$0xf0]   ;;  %v755_v4 = vld [vmem:[#allocation0] ss:$8 sm:$0xf]  }
  0x34   :  { %v745_v0 = vld [vmem:[#allocation0 + $0x43] ss:$8 sm:$0xf0]   ;;  %v757_v5 = vld [vmem:[#allocation0 - $0x1f] ss:$8 sm:$0xf0]  }
  0x35   :  { %387 = vrot.lane.b32.xlu2 %v386_v62, %s1159_s0  ;;  %v721_v62 = vsel %vm243_vm0, %v719_v60, %v717_v59  ;;  %v693_v3 = vld [vmem:[#allocation0 + $0x3] ss:$8 sm:$0xf0]   ;;  %v783_v9 = vld [vmem:[#allocation0 + $0x1] ss:$8 sm:$0xf0]  }
  0x36   :  { %439 = vrot.lane.b32.xlu0 %v438_v57, %s1159_s0  ;;  %v652_v57 = vld [vmem:[#allocation0] ss:$8 sm:$0xf]   ;;  %v794_v10 = vld [vmem:[#allocation0 + $0x22] ss:$8 sm:$0xf]  }
  0x37   :  { %v656_v61 = vsel %vm243_vm0, %v654_v58, %v652_v57  ;;  %v730_v13 = vld [vmem:[#allocation0 + $0x60] ss:$8 sm:$0xf]   ;;  %v732_v14 = vld [vmem:[#allocation0 + $0x41] ss:$8 sm:$0xf0]  }
  0x38   :  { %v796_v15 = vld [vmem:[#allocation0 + $0x3] ss:$8 sm:$0xf0]   ;;  %v820_v19 = vld [vmem:[#allocation0 + $0x42] ss:$8 sm:$0xf]  }
  0x39   :  { %v833_v21 = vld [vmem:[#allocation0 + $0x60] ss:$8 sm:$0xf]   ;;  %v768_v24 = vld [vmem:[#allocation0 + $0x2] ss:$8 sm:$0xf]  }
  0x3a   :  { %451 = vrot.lane.b32.xlu1 %v450_v63, %s1160_s10  ;;  %v743_v63 = vld [vmem:[#allocation0 + $0x62] ss:$8 sm:$0xf]   ;;  %v835_v27 = vld [vmem:[#allocation0 + $0x41] ss:$8 sm:$0xf0]  }
  0x3b   :  { %v747_v1 = vsel %vm243_vm0, %v745_v0, %v743_v63  ;;  %v858_v31 = vld [vmem:[#allocation0] ss:$8 sm:$0xf]   ;;  %v860_v32 = vld [vmem:[#allocation0 - $0x1f] ss:$8 sm:$0xf0]  }
  0x3c   :  { %v871_v33 = vld [vmem:[#allocation0 + $0x2] ss:$8 sm:$0xf]   ;;  %v807_v36 = vld [vmem:[#allocation0 + $0x40] ss:$8 sm:$0xf]  }
  0x3d   :  { %426 = vrot.lane.b32.xlu2 %v425_v7, %s1159_s0  ;;  %v759_v7 = vsel %vm243_vm0, %v757_v5, %v755_v4  ;;  %v809_v37 = vld [vmem:[#allocation0 + $0x21] ss:$8 sm:$0xf0]   ;;  %v873_v39 = vld [vmem:[#allocation0 - $0x1d] ss:$8 sm:$0xf0]  }
  0x3e   :  { %477 = vrot.lane.b32.xlu0 %v476_v2, %s1160_s10  ;;  %v691_v2 = vld [vmem:[#allocation0 + $0x22] ss:$8 sm:$0xf]   ;;  %v811_v40 = vsel %vm243_vm0, %v809_v37, %v807_v36  ;;  %v875_v41 = vsel %vm243_vm0, %v873_v39, %v871_v33  ;;  %v910_v45 = vld [vmem:[#allocation0 + $0x40] ss:$8 sm:$0xf]  }
  0x3f   :  { %v695_v6 = vsel %vm243_vm0, %v693_v3, %v691_v2  ;;  %v846_v48 = vld [vmem:[#allocation0 + $0x62] ss:$8 sm:$0xf]   ;;  %v848_v49 = vld [vmem:[#allocation0 + $0x43] ss:$8 sm:$0xf0]  }
  0x40   :  { %v912_v51 = vld [vmem:[#allocation0 + $0x21] ss:$8 sm:$0xf0]   ;;  %v936_v55 = vld [vmem:[#allocation0 + $0x60] ss:$8 sm:$0xf]  }
  0x41   :  { %v949_v57 = vld [vmem:[#allocation0 + $0x62] ss:$8 sm:$0xf]   ;;  %v884_v60 = vld [vmem:[#allocation0 + $0x20] ss:$8 sm:$0xf]  }
  0x42   :  { %490 = vrot.lane.b32.xlu1 %v489_v8, %s1160_s10  ;;  %v781_v8 = vld [vmem:[#allocation0 + $0x20] ss:$8 sm:$0xf]   ;;  %v951_v63 = vld [vmem:[#allocation0 + $0x43] ss:$8 sm:$0xf0]  }
  0x43   :  { %v923_v4 = vld [vmem:[#allocation0 + $0x42] ss:$8 sm:$0xf]   ;;  %v925_v5 = vld [vmem:[#allocation0 + $0x23] ss:$8 sm:$0xf0]  }
  0x45   :  { %464 = vrot.lane.b32.xlu2 %v463_v16, %s1160_s10  ;;  %v734_v16 = vsel %vm243_vm0, %v732_v14, %v730_v13 }
  0x46   :  { %516 = vrot.lane.b32.xlu0 %v515_v11, %s1160_s10  ;;  %v785_v11 = vsel %vm243_vm0, %v783_v9, %v781_v8 }
  0x4a   :  { %529 = vrot.lane.b32.xlu1 %v528_v17, %s1160_s10  ;;  %v798_v17 = vsel %vm243_vm0, %v796_v15, %v794_v10 }
  0x4d   :  { %503 = vrot.lane.b32.xlu2 %v502_v25, %s1160_s10  ;;  %v770_v25 = vld [vmem:[#allocation0 - $0x1d] ss:$8 sm:$0xf0]  }
  0x4e   :  { %554 = vrot.lane.b32.xlu0 %v553_v20, %s1161_s11  ;;  %v822_v20 = vld [vmem:[#allocation0 + $0x23] ss:$8 sm:$0xf0]   ;;  %v772_v28 = vsel %vm243_vm0, %v770_v25, %v768_v24 }
  0x4f   :  { %v824_v22 = vsel %vm243_vm0, %v822_v20, %v820_v19 }
  0x52   :  { %567 = vrot.lane.b32.xlu1 %v566_v26, %s1161_s11 }
  0x55   :  { %542 = vrot.lane.b32.xlu2 %v541_v34, %s1160_s10  ;;  %v862_v34 = vsel %vm243_vm0, %v860_v32, %v858_v31  ;;  %s1164_s10 = smov 16  }
  0x56   :  { %593 = vrot.lane.b32.xlu0 %v592_v29, %s1161_s11  ;;  %v837_v29 = vsel %vm243_vm0, %v835_v27, %v833_v21 }
  0x5a   :  { %606 = vrot.lane.b32.xlu1 %v605_v35, %s1161_s11 }
  0x5d   :  { %580 = vrot.lane.b32.xlu2 %v579_v43, %s1161_s11  ;;  %v897_v43 = vld [vmem:[#allocation0 + $0x22] ss:$8 sm:$0xf]  }
  0x5e   :  { %632 = vrot.lane.b32.xlu0 %v631_v38, %s1161_s11 }
  0x62   :  { %645 = vrot.lane.b32.xlu1 %v644_v44, %s1161_s11  ;;  %v899_v44 = vld [vmem:[#allocation0 + $0x3] ss:$8 sm:$0xf0]  }
  0x63   :  { %v901_v46 = vsel %vm243_vm0, %v899_v44, %v897_v43 }
  0x65   :  { %619 = vrot.lane.b32.xlu2 %v618_v52, %s1161_s11  ;;  %v850_v52 = vsel %vm243_vm0, %v848_v49, %v846_v48  ;;  %v87_v48 = vld [vmem:[#allocation0 + $0x10] sm:$0xf]  }
  0x66   :  { %670 = vrot.lane.b32.xlu0 %v669_v47, %s1162_s12  ;;  %983 = vst.msk [vmem:[%s2040_s1 + $0x10] sm:$0x1] %vm67_vm1, %v87_v48  }
  0x67   :  { %984 = vst.msk [vmem:[%s2040_s1 + $0x8f] sm:$0x2] %vm67_vm1, %v87_v48  }
  0x68   :  { %985 = vst.msk [vmem:[%s2040_s1 + $0x10e] sm:$0x4] %vm67_vm1, %v87_v48  }
  0x69   :  { %986 = vst.msk [vmem:[%s2040_s1 + $0x18d] sm:$0x8] %vm67_vm1, %v87_v48  }
  0x6a   :  { %683 = vrot.lane.b32.xlu1 %v682_v53, %s1162_s12  ;;  %v914_v53 = vsel %vm243_vm0, %v912_v51, %v910_v45  ;;  %v76_v45 = vld [vmem:[#allocation0 + $0x8] sm:$0xf]   ;;  %v98_v51 = vld [vmem:[#allocation0 + $0x18] sm:$0xf]  }
  0x6b   :  { %979 = vst.msk [vmem:[%s2040_s1 + $0x8] sm:$0x1] %vm67_vm1, %v76_v45  }
  0x6c   :  { %980 = vst.msk [vmem:[%s2040_s1 + $0x87] sm:$0x2] %vm67_vm1, %v76_v45  }
  0x6d   :  { %657 = vrot.lane.b32.xlu2 %v656_v61, %s1162_s12  ;;  %v886_v61 = vld [vmem:[#allocation0 + $0x1] ss:$8 sm:$0xf0]   ;;  %981 = vst.msk [vmem:[%s2040_s1 + $0x106] sm:$0x4] %vm67_vm1, %v76_v45  }
  0x6e   :  { %709 = vrot.lane.b32.xlu0 %v708_v56, %s1162_s12  ;;  %v938_v56 = vld [vmem:[#allocation0 + $0x41] ss:$8 sm:$0xf0]   ;;  %v888_v0 = vsel %vm243_vm0, %v886_v61, %v884_v60  ;;  %982 = vst.msk [vmem:[%s2040_s1 + $0x185] sm:$0x8] %vm67_vm1, %v76_v45  }
  0x6f   :  { %v940_v58 = vsel %vm243_vm0, %v938_v56, %v936_v55  ;;  %987 = vst.msk [vmem:[%s2040_s1 + $0x18] sm:$0x1] %vm67_vm1, %v98_v51   ;;  %v142_v55 = vld [vmem:[#allocation0 + $0x38] sm:$0xf]   ;;  %v153_v56 = vld [vmem:[#allocation0 + $0x40] sm:$0xf]  }
  0x70   :  { %988 = vst.msk [vmem:[%s2040_s1 + $0x97] sm:$0x2] %vm67_vm1, %v98_v51   ;;  %v197_v60 = vld [vmem:[#allocation0 + $0x60] sm:$0xf]   ;;  %v208_v61 = vld [vmem:[#allocation0 + $0x68] sm:$0xf]  }
  0x71   :  { %989 = vst.msk [vmem:[%s2040_s1 + $0x116] sm:$0x4] %vm67_vm1, %v98_v51  }
  0x72   :  { %722 = vrot.lane.b32.xlu1 %v721_v62, %s1162_s12  ;;  %990 = vst.msk [vmem:[%s2040_s1 + $0x195] sm:$0x8] %vm67_vm1, %v98_v51  }
  0x73   :  { %1003 = vst.msk [vmem:[%s2040_s1 + $0x38] sm:$0x1] %vm67_vm1, %v142_v55  }
  0x74   :  { %1004 = vst.msk [vmem:[%s2040_s1 + $0xb7] sm:$0x2] %vm67_vm1, %v142_v55  }
  0x75   :  { %696 = vrot.lane.b32.xlu2 %v695_v6, %s1162_s12  ;;  %1005 = vst.msk [vmem:[%s2040_s1 + $0x136] sm:$0x4] %vm67_vm1, %v142_v55  }
  0x76   :  { %748 = vrot.lane.b32.xlu0 %v747_v1, %s1162_s12  ;;  %v953_v1 = vsel %vm243_vm0, %v951_v63, %v949_v57  ;;  %1006 = vst.msk [vmem:[%s2040_s1 + $0x1b5] sm:$0x8] %vm67_vm1, %v142_v55   ;;  %v164_v57 = vld [vmem:[#allocation0 + $0x48] sm:$0xf]   ;;  %v230_v63 = vld [vmem:[#allocation0 + $0x78] sm:$0xf]  }
  0x77   :  { %v298_v12 = vpop.permute.xlu2 %297   ;;  %1007 = vst.msk [vmem:[%s2040_s1 + $0x40] sm:$0x1] %vm67_vm1, %v153_v56  }
  0x78   :  { %1047 = vst.msk [vmem:[%s2040_s1 + $0x41] ss:$8 sm:$0xf] %vm67_vm1, %v298_v12  }
  0x79   :  { %1048 = vst.msk [vmem:[%s2040_s1 + $0xa1] ss:$8 sm:$0xf0] %vm67_vm1, %v298_v12  }
  0x7a   :  { %760 = vrot.lane.b32.xlu1 %v759_v7, %s1163_s13  ;;  %v927_v7 = vsel %vm243_vm0, %v925_v5, %v923_v4  ;;  %1008 = vst.msk [vmem:[%s2040_s1 + $0xbf] sm:$0x2] %vm67_vm1, %v153_v56  }
  0x7b   :  { %1009 = vst.msk [vmem:[%s2040_s1 + $0x13e] sm:$0x4] %vm67_vm1, %v153_v56  }
  0x7c   :  { %1010 = vst.msk [vmem:[%s2040_s1 + $0x1bd] sm:$0x8] %vm67_vm1, %v153_v56  }
  0x7d   :  { %735 = vrot.lane.b32.xlu2 %v734_v16, %s1162_s12  ;;  %1011 = vst.msk [vmem:[%s2040_s1 + $0x48] sm:$0x1] %vm67_vm1, %v164_v57  }
  0x7e   :  { %786 = vrot.lane.b32.xlu0 %v785_v11, %s1163_s13  ;;  %1012 = vst.msk [vmem:[%s2040_s1 + $0xc7] sm:$0x2] %vm67_vm1, %v164_v57  }
  0x7f   :  { %v311_v23 = vpop.permute.xlu2 %310   ;;  %1013 = vst.msk [vmem:[%s2040_s1 + $0x146] sm:$0x4] %vm67_vm1, %v164_v57  }
  0x80   :  { %v246_v18 = vpop.permute.xlu0 %245   ;;  %1049 = vst.msk [vmem:[%s2040_s1 + $0x141] ss:$8 sm:$0xf] %vm67_vm1, %v311_v23  }
  0x81   :  { %1039 = vst.msk [vmem:[%s2040_s1 + $0x1] ss:$8 sm:$0xf] %vm67_vm1, %v246_v18  }
  0x82   :  { %799 = vrot.lane.b32.xlu1 %v798_v17, %s1163_s13  ;;  %1040 = vst.msk [vmem:[%s2040_s1 + $0x61] ss:$8 sm:$0xf0] %vm67_vm1, %v246_v18  }
  0x83   :  { %1050 = vst.msk [vmem:[%s2040_s1 + $0x1a1] ss:$8 sm:$0xf0] %vm67_vm1, %v311_v23  }
  0x84   :  { %v272_v26 = vpop.permute.xlu1 %271   ;;  %1014 = vst.msk [vmem:[%s2040_s1 + $0x1c5] sm:$0x8] %vm67_vm1, %v164_v57  }
  0x85   :  { %1043 = vst.msk [vmem:[%s2040_s1 + $0x21] ss:$8 sm:$0xf] %vm67_vm1, %v272_v26   ;;  %773 = vrot.lane.b32.xlu2 %v772_v28, %s1163_s13 }
  0x86   :  { %1044 = vst.msk [vmem:[%s2040_s1 + $0x81] ss:$8 sm:$0xf0] %vm67_vm1, %v272_v26   ;;  %825 = vrot.lane.b32.xlu0 %v824_v22, %s1163_s13 }
  0x87   :  { %v349_v35 = vpop.permute.xlu2 %348   ;;  %1023 = vst.msk [vmem:[%s2040_s1 + $0x60] sm:$0x1] %vm67_vm1, %v197_v60  }
  0x88   :  { %v259_v30 = vpop.permute.xlu0 %258   ;;  %1055 = vst.msk [vmem:[%s2040_s1 + $0x2] ss:$8 sm:$0xf] %vm67_vm1, %v349_v35  }
  0x89   :  { %1041 = vst.msk [vmem:[%s2040_s1 + $0x101] ss:$8 sm:$0xf] %vm67_vm1, %v259_v30  }
  0x8a   :  { %838 = vrot.lane.b32.xlu1 %v837_v29, %s1163_s13  ;;  %1042 = vst.msk [vmem:[%s2040_s1 + $0x161] ss:$8 sm:$0xf0] %vm67_vm1, %v259_v30  }
  0x8b   :  { %1056 = vst.msk [vmem:[%s2040_s1 + $0x62] ss:$8 sm:$0xf0] %vm67_vm1, %v349_v35  }
  0x8c   :  { %v285_v38 = vpop.permute.xlu1 %284   ;;  %1024 = vst.msk [vmem:[%s2040_s1 + $0xdf] sm:$0x2] %vm67_vm1, %v197_v60  }
  0x8d   :  { %1045 = vst.msk [vmem:[%s2040_s1 + $0x121] ss:$8 sm:$0xf] %vm67_vm1, %v285_v38   ;;  %812 = vrot.lane.b32.xlu2 %v811_v40, %s1163_s13 }
  0x8e   :  { %1046 = vst.msk [vmem:[%s2040_s1 + $0x181] ss:$8 sm:$0xf0] %vm67_vm1, %v285_v38   ;;  %863 = vrot.lane.b32.xlu0 %v862_v34, %s1164_s10  ;;  %v66_v38 = vld [vmem:[#allocation0] sm:$0xf]  }
  0x8f   :  { %v388_v47 = vpop.permute.xlu2 %387   ;;  %68 = vst.msk [vmem:[%s2040_s1] sm:$0x1] %vm67_vm1, %v66_v38  }
  0x90   :  { %v324_v42 = vpop.permute.xlu0 %323   ;;  %1061 = vst.msk [vmem:[%s2040_s1 + $0x122] ss:$8 sm:$0xf] %vm67_vm1, %v388_v47  }
  0x91   :  { %1051 = vst.msk [vmem:[%s2040_s1 + $0x61] ss:$8 sm:$0xf] %vm67_vm1, %v324_v42  }
  0x92   :  { %876 = vrot.lane.b32.xlu1 %v875_v41, %s1164_s10  ;;  %1052 = vst.msk [vmem:[%s2040_s1 + $0xc1] ss:$8 sm:$0xf0] %vm67_vm1, %v324_v42  }
  0x93   :  { %1062 = vst.msk [vmem:[%s2040_s1 + $0x182] ss:$8 sm:$0xf0] %vm67_vm1, %v388_v47  }
  0x94   :  { %v337_v50 = vpop.permute.xlu1 %336   ;;  %976 = vst.msk [vmem:[%s2040_s1 + $0x7f] sm:$0x2] %vm67_vm1, %v66_v38  }
  0x95   :  { %1053 = vst.msk [vmem:[%s2040_s1 + $0x161] ss:$8 sm:$0xf] %vm67_vm1, %v337_v50   ;;  %851 = vrot.lane.b32.xlu2 %v850_v52, %s1163_s13  ;;  %v109_v52 = vld [vmem:[#allocation0 + $0x20] sm:$0xf]  }
  0x96   :  { %1054 = vst.msk [vmem:[%s2040_s1 + $0x1c1] ss:$8 sm:$0xf0] %vm67_vm1, %v337_v50   ;;  %902 = vrot.lane.b32.xlu0 %v901_v46, %s1164_s10 }
  0x97   :  { %v427_v59 = vpop.permute.xlu2 %426   ;;  %977 = vst.msk [vmem:[%s2040_s1 + $0xfe] sm:$0x4] %vm67_vm1, %v66_v38  }
  0x98   :  { %v362_v54 = vpop.permute.xlu0 %361   ;;  %1067 = vst.msk [vmem:[%s2040_s1 + $0x62] ss:$8 sm:$0xf] %vm67_vm1, %v427_v59  }
  0x99   :  { %1057 = vst.msk [vmem:[%s2040_s1 + $0x102] ss:$8 sm:$0xf] %vm67_vm1, %v362_v54  }
  0x9a   :  { %915 = vrot.lane.b32.xlu1 %v914_v53, %s1164_s10  ;;  %1058 = vst.msk [vmem:[%s2040_s1 + $0x162] ss:$8 sm:$0xf0] %vm67_vm1, %v362_v54   ;;  %v120_v53 = vld [vmem:[#allocation0 + $0x28] sm:$0xf]  }
  0x9b   :  { %1068 = vst.msk [vmem:[%s2040_s1 + $0xc2] ss:$8 sm:$0xf0] %vm67_vm1, %v427_v59   ;;  %v131_v54 = vld [vmem:[#allocation0 + $0x30] sm:$0xf]  }
  0x9c   :  { %v375_v62 = vpop.permute.xlu1 %374   ;;  %978 = vst.msk [vmem:[%s2040_s1 + $0x17d] sm:$0x8] %vm67_vm1, %v66_v38   ;;  %v186_v59 = vld [vmem:[#allocation0 + $0x58] sm:$0xf]  }
  0x9d   :  { %1059 = vst.msk [vmem:[%s2040_s1 + $0x22] ss:$8 sm:$0xf] %vm67_vm1, %v375_v62   ;;  %889 = vrot.lane.b32.xlu2 %v888_v0, %s1164_s10 }
  0x9e   :  { %1060 = vst.msk [vmem:[%s2040_s1 + $0x82] ss:$8 sm:$0xf0] %vm67_vm1, %v375_v62   ;;  %941 = vrot.lane.b32.xlu0 %v940_v58, %s1164_s10  ;;  %v175_v58 = vld [vmem:[#allocation0 + $0x50] sm:$0xf]  }
  0x9f   :  { %v465_v3 = vpop.permute.xlu2 %464   ;;  %991 = vst.msk [vmem:[%s2040_s1 + $0x20] sm:$0x1] %vm67_vm1, %v109_v52   ;;  %v219_v62 = vld [vmem:[#allocation0 + $0x70] sm:$0xf]  }
  0xa0   :  { %v401_v2 = vpop.permute.xlu0 %400   ;;  %1073 = vst.msk [vmem:[%s2040_s1 + $0x103] ss:$8 sm:$0xf] %vm67_vm1, %v465_v3  }
  0xa1   :  { %1063 = vst.msk [vmem:[%s2040_s1 + $0x42] ss:$8 sm:$0xf] %vm67_vm1, %v401_v2  }
  0xa2   :  { %954 = vrot.lane.b32.xlu1 %v953_v1, %s1164_s10  ;;  %1064 = vst.msk [vmem:[%s2040_s1 + $0xa2] ss:$8 sm:$0xf0] %vm67_vm1, %v401_v2  }
  0xa3   :  { %1074 = vst.msk [vmem:[%s2040_s1 + $0x163] ss:$8 sm:$0xf0] %vm67_vm1, %v465_v3  }
  0xa4   :  { %v414_v6 = vpop.permute.xlu1 %413   ;;  %992 = vst.msk [vmem:[%s2040_s1 + $0x9f] sm:$0x2] %vm67_vm1, %v109_v52  }
  0xa5   :  { %1065 = vst.msk [vmem:[%s2040_s1 + $0x142] ss:$8 sm:$0xf] %vm67_vm1, %v414_v6   ;;  %928 = vrot.lane.b32.xlu2 %v927_v7, %s1164_s10 }
  0xa6   :  { %1066 = vst.msk [vmem:[%s2040_s1 + $0x1a2] ss:$8 sm:$0xf0] %vm67_vm1, %v414_v6  }
  0xa7   :  { %v504_v9 = vpop.permute.xlu2 %503   ;;  %993 = vst.msk [vmem:[%s2040_s1 + $0x11e] sm:$0x4] %vm67_vm1, %v109_v52  }
  0xa8   :  { %v440_v8 = vpop.permute.xlu0 %439   ;;  %1079 = vst.msk [vmem:[%s2040_s1 + $0x43] ss:$8 sm:$0xf] %vm67_vm1, %v504_v9  }
  0xa9   :  { %1069 = vst.msk [vmem:[%s2040_s1 + $0x162] ss:$8 sm:$0xf] %vm67_vm1, %v440_v8  }
  0xaa   :  { %1070 = vst.msk [vmem:[%s2040_s1 + $0x1c2] ss:$8 sm:$0xf0] %vm67_vm1, %v440_v8  }
  0xab   :  { %1080 = vst.msk [vmem:[%s2040_s1 + $0xa3] ss:$8 sm:$0xf0] %vm67_vm1, %v504_v9  }
  0xac   :  { %v452_v10 = vpop.permute.xlu1 %451   ;;  %994 = vst.msk [vmem:[%s2040_s1 + $0x19d] sm:$0x8] %vm67_vm1, %v109_v52  }
  0xad   :  { %1071 = vst.msk [vmem:[%s2040_s1 + $0x3] ss:$8 sm:$0xf] %vm67_vm1, %v452_v10  }
  0xae   :  { %1072 = vst.msk [vmem:[%s2040_s1 + $0x63] ss:$8 sm:$0xf0] %vm67_vm1, %v452_v10  }
  0xaf   :  { %v543_v12 = vpop.permute.xlu2 %542   ;;  %995 = vst.msk [vmem:[%s2040_s1 + $0x28] sm:$0x1] %vm67_vm1, %v120_v53  }
  0xb0   :  { %v478_v11 = vpop.permute.xlu0 %477   ;;  %1085 = vst.msk [vmem:[%s2040_s1 + $0x163] ss:$8 sm:$0xf] %vm67_vm1, %v543_v12  }
  0xb1   :  { %1075 = vst.msk [vmem:[%s2040_s1 + $0x23] ss:$8 sm:$0xf] %vm67_vm1, %v478_v11  }
  0xb2   :  { %1076 = vst.msk [vmem:[%s2040_s1 + $0x83] ss:$8 sm:$0xf0] %vm67_vm1, %v478_v11  }
  0xb3   :  { %1086 = vst.msk [vmem:[%s2040_s1 + $0x1c3] ss:$8 sm:$0xf0] %vm67_vm1, %v543_v12  }
  0xb4   :  { %v491_v13 = vpop.permute.xlu1 %490   ;;  %996 = vst.msk [vmem:[%s2040_s1 + $0xa7] sm:$0x2] %vm67_vm1, %v120_v53  }
  0xb5   :  { %1077 = vst.msk [vmem:[%s2040_s1 + $0x123] ss:$8 sm:$0xf] %vm67_vm1, %v491_v13  }
  0xb6   :  { %1078 = vst.msk [vmem:[%s2040_s1 + $0x183] ss:$8 sm:$0xf0] %vm67_vm1, %v491_v13  }
  0xb7   :  { %v581_v15 = vpop.permute.xlu2 %580   ;;  %997 = vst.msk [vmem:[%s2040_s1 + $0x126] sm:$0x4] %vm67_vm1, %v120_v53  }
  0xb8   :  { %v517_v14 = vpop.permute.xlu0 %516   ;;  %1091 = vst.msk [vmem:[%s2040_s1 + $0x24] ss:$8 sm:$0xf] %vm67_vm1, %v581_v15  }
  0xb9   :  { %1081 = vst.msk [vmem:[%s2040_s1 + $0x143] ss:$8 sm:$0xf] %vm67_vm1, %v517_v14  }
  0xba   :  { %1082 = vst.msk [vmem:[%s2040_s1 + $0x1a3] ss:$8 sm:$0xf0] %vm67_vm1, %v517_v14  }
  0xbb   :  { %1092 = vst.msk [vmem:[%s2040_s1 + $0x84] ss:$8 sm:$0xf0] %vm67_vm1, %v581_v15  }
  0xbc   :  { %v530_v16 = vpop.permute.xlu1 %529   ;;  %998 = vst.msk [vmem:[%s2040_s1 + $0x1a5] sm:$0x8] %vm67_vm1, %v120_v53  }
  0xbd   :  { %1083 = vst.msk [vmem:[%s2040_s1 + $0x63] ss:$8 sm:$0xf] %vm67_vm1, %v530_v16  }
  0xbe   :  { %1084 = vst.msk [vmem:[%s2040_s1 + $0xc3] ss:$8 sm:$0xf0] %vm67_vm1, %v530_v16  }
  0xbf   :  { %v620_v18 = vpop.permute.xlu2 %619   ;;  %999 = vst.msk [vmem:[%s2040_s1 + $0x30] sm:$0x1] %vm67_vm1, %v131_v54  }
  0xc0   :  { %v555_v17 = vpop.permute.xlu0 %554   ;;  %1097 = vst.msk [vmem:[%s2040_s1 + $0x144] ss:$8 sm:$0xf] %vm67_vm1, %v620_v18  }
  0xc1   :  { %1087 = vst.msk [vmem:[%s2040_s1 + $0x4] ss:$8 sm:$0xf] %vm67_vm1, %v555_v17  }
  0xc2   :  { %1088 = vst.msk [vmem:[%s2040_s1 + $0x64] ss:$8 sm:$0xf0] %vm67_vm1, %v555_v17  }
  0xc3   :  { %1098 = vst.msk [vmem:[%s2040_s1 + $0x1a4] ss:$8 sm:$0xf0] %vm67_vm1, %v620_v18  }
  0xc4   :  { %v568_v19 = vpop.permute.xlu1 %567   ;;  %1000 = vst.msk [vmem:[%s2040_s1 + $0xaf] sm:$0x2] %vm67_vm1, %v131_v54  }
  0xc5   :  { %1089 = vst.msk [vmem:[%s2040_s1 + $0x104] ss:$8 sm:$0xf] %vm67_vm1, %v568_v19  }
  0xc6   :  { %1090 = vst.msk [vmem:[%s2040_s1 + $0x164] ss:$8 sm:$0xf0] %vm67_vm1, %v568_v19  }
  0xc7   :  { %v658_v21 = vpop.permute.xlu2 %657   ;;  %1001 = vst.msk [vmem:[%s2040_s1 + $0x12e] sm:$0x4] %vm67_vm1, %v131_v54  }
  0xc8   :  { %v594_v20 = vpop.permute.xlu0 %593   ;;  %1103 = vst.msk [vmem:[%s2040_s1 + $0x5] ss:$8 sm:$0xf] %vm67_vm1, %v658_v21  }
  0xc9   :  { %1093 = vst.msk [vmem:[%s2040_s1 + $0x124] ss:$8 sm:$0xf] %vm67_vm1, %v594_v20  }
  0xca   :  { %1094 = vst.msk [vmem:[%s2040_s1 + $0x184] ss:$8 sm:$0xf0] %vm67_vm1, %v594_v20  }
  0xcb   :  { %1104 = vst.msk [vmem:[%s2040_s1 + $0x65] ss:$8 sm:$0xf0] %vm67_vm1, %v658_v21  }
  0xcc   :  { %v607_v22 = vpop.permute.xlu1 %606   ;;  %1002 = vst.msk [vmem:[%s2040_s1 + $0x1ad] sm:$0x8] %vm67_vm1, %v131_v54  }
  0xcd   :  { %1095 = vst.msk [vmem:[%s2040_s1 + $0x44] ss:$8 sm:$0xf] %vm67_vm1, %v607_v22  }
  0xce   :  { %1096 = vst.msk [vmem:[%s2040_s1 + $0xa4] ss:$8 sm:$0xf0] %vm67_vm1, %v607_v22  }
  0xcf   :  { %v697_v24 = vpop.permute.xlu2 %696   ;;  %1015 = vst.msk [vmem:[%s2040_s1 + $0x50] sm:$0x1] %vm67_vm1, %v175_v58  }
  0xd0   :  { %v633_v23 = vpop.permute.xlu0 %632   ;;  %1109 = vst.msk [vmem:[%s2040_s1 + $0x125] ss:$8 sm:$0xf] %vm67_vm1, %v697_v24  }
  0xd1   :  { %1099 = vst.msk [vmem:[%s2040_s1 + $0x64] ss:$8 sm:$0xf] %vm67_vm1, %v633_v23  }
  0xd2   :  { %1100 = vst.msk [vmem:[%s2040_s1 + $0xc4] ss:$8 sm:$0xf0] %vm67_vm1, %v633_v23  }
  0xd3   :  { %1110 = vst.msk [vmem:[%s2040_s1 + $0x185] ss:$8 sm:$0xf0] %vm67_vm1, %v697_v24  }
  0xd4   :  { %v646_v25 = vpop.permute.xlu1 %645   ;;  %1016 = vst.msk [vmem:[%s2040_s1 + $0xcf] sm:$0x2] %vm67_vm1, %v175_v58  }
  0xd5   :  { %1101 = vst.msk [vmem:[%s2040_s1 + $0x164] ss:$8 sm:$0xf] %vm67_vm1, %v646_v25  }
  0xd6   :  { %1102 = vst.msk [vmem:[%s2040_s1 + $0x1c4] ss:$8 sm:$0xf0] %vm67_vm1, %v646_v25  }
  0xd7   :  { %v736_v27 = vpop.permute.xlu2 %735   ;;  %1017 = vst.msk [vmem:[%s2040_s1 + $0x14e] sm:$0x4] %vm67_vm1, %v175_v58  }
  0xd8   :  { %v671_v26 = vpop.permute.xlu0 %670   ;;  %1115 = vst.msk [vmem:[%s2040_s1 + $0x65] ss:$8 sm:$0xf] %vm67_vm1, %v736_v27  }
  0xd9   :  { %1105 = vst.msk [vmem:[%s2040_s1 + $0x105] ss:$8 sm:$0xf] %vm67_vm1, %v671_v26  }
  0xda   :  { %1106 = vst.msk [vmem:[%s2040_s1 + $0x165] ss:$8 sm:$0xf0] %vm67_vm1, %v671_v26  }
  0xdb   :  { %1116 = vst.msk [vmem:[%s2040_s1 + $0xc5] ss:$8 sm:$0xf0] %vm67_vm1, %v736_v27  }
  0xdc   :  { %v684_v28 = vpop.permute.xlu1 %683   ;;  %1018 = vst.msk [vmem:[%s2040_s1 + $0x1cd] sm:$0x8] %vm67_vm1, %v175_v58  }
  0xdd   :  { %1107 = vst.msk [vmem:[%s2040_s1 + $0x25] ss:$8 sm:$0xf] %vm67_vm1, %v684_v28  }
  0xde   :  { %1108 = vst.msk [vmem:[%s2040_s1 + $0x85] ss:$8 sm:$0xf0] %vm67_vm1, %v684_v28  }
  0xdf   :  { %v774_v30 = vpop.permute.xlu2 %773   ;;  %1019 = vst.msk [vmem:[%s2040_s1 + $0x58] sm:$0x1] %vm67_vm1, %v186_v59  }
  0xe0   :  { %v710_v29 = vpop.permute.xlu0 %709   ;;  %1121 = vst.msk [vmem:[%s2040_s1 + $0x106] ss:$8 sm:$0xf] %vm67_vm1, %v774_v30  }
  0xe1   :  { %1111 = vst.msk [vmem:[%s2040_s1 + $0x45] ss:$8 sm:$0xf] %vm67_vm1, %v710_v29  }
  0xe2   :  { %1112 = vst.msk [vmem:[%s2040_s1 + $0xa5] ss:$8 sm:$0xf0] %vm67_vm1, %v710_v29  }
  0xe3   :  { %1122 = vst.msk [vmem:[%s2040_s1 + $0x166] ss:$8 sm:$0xf0] %vm67_vm1, %v774_v30  }
  0xe4   :  { %v723_v31 = vpop.permute.xlu1 %722   ;;  %1020 = vst.msk [vmem:[%s2040_s1 + $0xd7] sm:$0x2] %vm67_vm1, %v186_v59  }
  0xe5   :  { %1113 = vst.msk [vmem:[%s2040_s1 + $0x145] ss:$8 sm:$0xf] %vm67_vm1, %v723_v31  }
  0xe6   :  { %1114 = vst.msk [vmem:[%s2040_s1 + $0x1a5] ss:$8 sm:$0xf0] %vm67_vm1, %v723_v31  }
  0xe7   :  { %v813_v33 = vpop.permute.xlu2 %812   ;;  %1021 = vst.msk [vmem:[%s2040_s1 + $0x156] sm:$0x4] %vm67_vm1, %v186_v59  }
  0xe8   :  { %v749_v32 = vpop.permute.xlu0 %748   ;;  %1127 = vst.msk [vmem:[%s2040_s1 + $0x46] ss:$8 sm:$0xf] %vm67_vm1, %v813_v33  }
  0xe9   :  { %1117 = vst.msk [vmem:[%s2040_s1 + $0x165] ss:$8 sm:$0xf] %vm67_vm1, %v749_v32  }
  0xea   :  { %1118 = vst.msk [vmem:[%s2040_s1 + $0x1c5] ss:$8 sm:$0xf0] %vm67_vm1, %v749_v32  }
  0xeb   :  { %1128 = vst.msk [vmem:[%s2040_s1 + $0xa6] ss:$8 sm:$0xf0] %vm67_vm1, %v813_v33  }
  0xec   :  { %v761_v34 = vpop.permute.xlu1 %760   ;;  %1022 = vst.msk [vmem:[%s2040_s1 + $0x1d5] sm:$0x8] %vm67_vm1, %v186_v59  }
  0xed   :  { %1119 = vst.msk [vmem:[%s2040_s1 + $0x6] ss:$8 sm:$0xf] %vm67_vm1, %v761_v34  }
  0xee   :  { %1120 = vst.msk [vmem:[%s2040_s1 + $0x66] ss:$8 sm:$0xf0] %vm67_vm1, %v761_v34  }
  0xef   :  { %v852_v36 = vpop.permute.xlu2 %851   ;;  %1025 = vst.msk [vmem:[%s2040_s1 + $0x15e] sm:$0x4] %vm67_vm1, %v197_v60  }
  0xf0   :  { %v787_v35 = vpop.permute.xlu0 %786   ;;  %1133 = vst.msk [vmem:[%s2040_s1 + $0x166] ss:$8 sm:$0xf] %vm67_vm1, %v852_v36  }
  0xf1   :  { %1123 = vst.msk [vmem:[%s2040_s1 + $0x26] ss:$8 sm:$0xf] %vm67_vm1, %v787_v35  }
  0xf2   :  { %1124 = vst.msk [vmem:[%s2040_s1 + $0x86] ss:$8 sm:$0xf0] %vm67_vm1, %v787_v35  }
  0xf3   :  { %1134 = vst.msk [vmem:[%s2040_s1 + $0x1c6] ss:$8 sm:$0xf0] %vm67_vm1, %v852_v36  }
  0xf4   :  { %v800_v37 = vpop.permute.xlu1 %799   ;;  %1026 = vst.msk [vmem:[%s2040_s1 + $0x1dd] sm:$0x8] %vm67_vm1, %v197_v60  }
  0xf5   :  { %1125 = vst.msk [vmem:[%s2040_s1 + $0x126] ss:$8 sm:$0xf] %vm67_vm1, %v800_v37  }
  0xf6   :  { %1126 = vst.msk [vmem:[%s2040_s1 + $0x186] ss:$8 sm:$0xf0] %vm67_vm1, %v800_v37  }
  0xf7   :  { %v890_v40 = vpop.permute.xlu2 %889   ;;  %1027 = vst.msk [vmem:[%s2040_s1 + $0x68] sm:$0x1] %vm67_vm1, %v208_v61  }
  0xf8   :  { %v826_v39 = vpop.permute.xlu0 %825   ;;  %1139 = vst.msk [vmem:[%s2040_s1 + $0x27] ss:$8 sm:$0xf] %vm67_vm1, %v890_v40  }
  0xf9   :  { %1129 = vst.msk [vmem:[%s2040_s1 + $0x146] ss:$8 sm:$0xf] %vm67_vm1, %v826_v39  }
  0xfa   :  { %1130 = vst.msk [vmem:[%s2040_s1 + $0x1a6] ss:$8 sm:$0xf0] %vm67_vm1, %v826_v39  }
  0xfb   :  { %1140 = vst.msk [vmem:[%s2040_s1 + $0x87] ss:$8 sm:$0xf0] %vm67_vm1, %v890_v40  }
  0xfc   :  { %v839_v41 = vpop.permute.xlu1 %838   ;;  %1028 = vst.msk [vmem:[%s2040_s1 + $0xe7] sm:$0x2] %vm67_vm1, %v208_v61  }
  0xfd   :  { %1131 = vst.msk [vmem:[%s2040_s1 + $0x66] ss:$8 sm:$0xf] %vm67_vm1, %v839_v41  }
  0xfe   :  { %1132 = vst.msk [vmem:[%s2040_s1 + $0xc6] ss:$8 sm:$0xf0] %vm67_vm1, %v839_v41  }
  0xff   :  { %v929_v43 = vpop.permute.xlu2 %928   ;;  %1029 = vst.msk [vmem:[%s2040_s1 + $0x166] sm:$0x4] %vm67_vm1, %v208_v61  }
 0x100   :  { %v864_v42 = vpop.permute.xlu0 %863   ;;  %1145 = vst.msk [vmem:[%s2040_s1 + $0x147] ss:$8 sm:$0xf] %vm67_vm1, %v929_v43  }
 0x101   :  { %1135 = vst.msk [vmem:[%s2040_s1 + $0x7] ss:$8 sm:$0xf] %vm67_vm1, %v864_v42  }
 0x102   :  { %1136 = vst.msk [vmem:[%s2040_s1 + $0x67] ss:$8 sm:$0xf0] %vm67_vm1, %v864_v42  }
 0x103   :  { %1146 = vst.msk [vmem:[%s2040_s1 + $0x1a7] ss:$8 sm:$0xf0] %vm67_vm1, %v929_v43  }
 0x104   :  { %v877_v44 = vpop.permute.xlu1 %876   ;;  %1030 = vst.msk [vmem:[%s2040_s1 + $0x1e5] sm:$0x8] %vm67_vm1, %v208_v61  }
 0x105   :  { %1137 = vst.msk [vmem:[%s2040_s1 + $0x107] ss:$8 sm:$0xf] %vm67_vm1, %v877_v44  }
 0x106   :  { %1138 = vst.msk [vmem:[%s2040_s1 + $0x167] ss:$8 sm:$0xf0] %vm67_vm1, %v877_v44  }
 0x107   :  { %1031 = vst.msk [vmem:[%s2040_s1 + $0x70] sm:$0x1] %vm67_vm1, %v219_v62  }
 0x108   :  { %v903_v46 = vpop.permute.xlu0 %902   ;;  %1032 = vst.msk [vmem:[%s2040_s1 + $0xef] sm:$0x2] %vm67_vm1, %v219_v62  }
 0x109   :  { %1141 = vst.msk [vmem:[%s2040_s1 + $0x127] ss:$8 sm:$0xf] %vm67_vm1, %v903_v46  }
 0x10a   :  { %1142 = vst.msk [vmem:[%s2040_s1 + $0x187] ss:$8 sm:$0xf0] %vm67_vm1, %v903_v46  }
 0x10b   :  { %1033 = vst.msk [vmem:[%s2040_s1 + $0x16e] sm:$0x4] %vm67_vm1, %v219_v62  }
 0x10c   :  { %v916_v47 = vpop.permute.xlu1 %915   ;;  %1034 = vst.msk [vmem:[%s2040_s1 + $0x1ed] sm:$0x8] %vm67_vm1, %v219_v62  }
 0x10d   :  { %1143 = vst.msk [vmem:[%s2040_s1 + $0x47] ss:$8 sm:$0xf] %vm67_vm1, %v916_v47  }
 0x10e   :  { %1144 = vst.msk [vmem:[%s2040_s1 + $0xa7] ss:$8 sm:$0xf0] %vm67_vm1, %v916_v47  }
 0x10f   :  { %1035 = vst.msk [vmem:[%s2040_s1 + $0x78] sm:$0x1] %vm67_vm1, %v230_v63  }
 0x110   :  { %v942_v49 = vpop.permute.xlu0 %941   ;;  %1036 = vst.msk [vmem:[%s2040_s1 + $0xf7] sm:$0x2] %vm67_vm1, %v230_v63  }
 0x111   :  { %1147 = vst.msk [vmem:[%s2040_s1 + $0x67] ss:$8 sm:$0xf] %vm67_vm1, %v942_v49  }
 0x112   :  { %1148 = vst.msk [vmem:[%s2040_s1 + $0xc7] ss:$8 sm:$0xf0] %vm67_vm1, %v942_v49  }
 0x113   :  { %1037 = vst.msk [vmem:[%s2040_s1 + $0x176] sm:$0x4] %vm67_vm1, %v230_v63  }
 0x114   :  { %v955_v50 = vpop.permute.xlu1 %954   ;;  %1038 = vst.msk [vmem:[%s2040_s1 + $0x1f5] sm:$0x8] %vm67_vm1, %v230_v63  }
 0x115   :  { %1149 = vst.msk [vmem:[%s2040_s1 + $0x167] ss:$8 sm:$0xf] %vm67_vm1, %v955_v50  }
 0x116   :  { %1150 = vst.msk [vmem:[%s2040_s1 + $0x1c7] ss:$8 sm:$0xf0] %vm67_vm1, %v955_v50  }

// kernel: hdlut_forward.1
= control target key start
LH: loop header
LB: loop body
LE: loop exit
PB: predicated region body
PF: predicated region fallthrough
CT: control target
= control target key end

     0   :  { %s6990_s9 = smov 0   ;;  %s6992_s10 = smov 0   ;;  %s10527_s0 = inlined_call_operand.vmem [shape: s32[2,1,8192], index: 0, kind: input, shape index: {}]   ;;  %s10528_s1 = inlined_call_operand.vmem [shape: f32[2,4,256], index: 1, kind: input, shape index: {}]   ;;  %s10529_s2 = inlined_call_operand.vmem [shape: f32[2,4,8192], index: 2, kind: output, shape index: {}]  }
   0x1   :  { %s6994_s11 = smov 0   ;;  %s6996_s12 = smov 0  }
   0x2   :  { %s6998_s13 = smov 0  }
   0x3 LB: > { %s21_s14 = sadd.s32 1, %s6964_s11  ;;  %s24_s15 = sadd.s32 1, %s6968_s12  ;;  %s6972_s13 = sphi %s6998_s13, %s12_s13   ;;  %s6968_s12 = sphi %s6996_s12, %s10533_s12   ;;  %s6964_s11 = sphi %s6994_s11, %s10532_s11   ;;  %s6960_s10 = sphi %s6992_s10, %s10531_s10   ;;  %s6956_s9 = sphi %s6990_s9, %s10530_s9  }
   0x4   : > { %p22_p0 = scmp.ge.s32.totalorder %s21_s14, 2  ;;  %p4828_p1 = scmp.ge.s32.totalorder %s6972_s13, 1 }
   0x5   : > { %p142_p2 = scmp.lt.s32.totalorder %s6972_s13, 5 }
   0x6   : > { %s10535_s14 = smov (%p22_p0, %s21_s14), 0  ;;  %s10537_s15 = smov (!%p22_p0, %s24_s15), %s6968_s12 }
   0x7   : > { %p143_p3 = pnand %p4828_p1, %p142_p2  ;;  %p26_p4 = scmp.ge.s32.totalorder %s10537_s15, 2 }
   0x8   : > { %s4829_s16 = sshll.u32 (!%p143_p3), %s6956_s9, 5  ;;  %p177_p5 = scmp.lt.s32.totalorder (!%p143_p3), %s6960_s10, 1 }
   0x9   : > { %s10539_s15 = smov (%p26_p4, %s10537_s15), 0  ;;  %146 = sbr.rel (%p143_p3) target bundleno = 699 (0x2bb), region = 28 }
   0xa   : > { %p179_p6 = scmp.lt.s32.totalorder (!%p143_p3), %s4829_s16, 63 }
   0xe   : > { %v205_v0 = vlaneseq  ;;  %s10541_s10 = smov (!%p177_p5, %s6960_s10), 1  ;;  %s10543_s16 = smov (!%p179_p6, %s4829_s16), 63  ;;  %v6974_v13 = vmov 1.0  }
   0xf   : > { %s4830_s17 = sshll.u32 %s10541_s10, 6  ;;  %s6886_s22 = sshll.u32 %s10541_s10, 3 }
  0x10   : > { %v7022_v1 = vshrl.u32 %v205_v0, 7  ;;  %s7025_s18 = sadd.s32 %s4830_s17, %s10543_s16  ;;  %s189_s25 = scalar_lea.vmem %s10528_s1, %s6886_s22 }
  0x11   : > { %s7031_s21 = scalar_lea.vmem %s10527_s0, %s7025_s18  ;;  %v204_v36 = vld [vmem:[%s189_s25] sm:$0xff]  ;;  %s4835_s26 = sshll.u32 %s7025_s18, 2 }
  0x12   : > { %v7034_v2 = vadd.s32 120, %v7022_v1  ;;  %v7037_v3 = vadd.s32 248, %v7022_v1  ;;  %v7040_v4 = vadd.s32 112, %v7022_v1  ;;  %v7043_v5 = vadd.s32 240, %v7022_v1  ;;  %v7046_v6 = vld [vmem:[%s7031_s21] sm:$0xff]  ;;  %v7944_v46 = vld [vmem:[%s7031_s21 + $0x8] sm:$0xff]  ;;  %s8401_s29 = scalar_lea.vmem %s10529_s2, %s4835_s26 }
  0x13   : > { %v7049_v7 = vperm.slane %v7046_v6, 1  ;;  %v7052_v8 = vadd.s32 104, %v7022_v1  ;;  %v7055_v9 = vadd.s32 232, %v7022_v1  ;;  %v7058_v10 = vperm.slane %v7046_v6, 0  ;;  %3343 = vst [vmem:[#allocation1] ss:$2 sm:$0xff] %v204_v36 }
  0x14   : > { %v7061_v11 = vadd.s32 96, %v7022_v1  ;;  %v7064_v12 = vadd.s32 224, %v7022_v1  ;;  %v7077_v14 = vadd.s32 88, %v7022_v1  ;;  %v7080_v15 = vadd.s32 216, %v7022_v1 }
  0x15   : > { %vm751_vm0 = vcmp.eq.s32.totalorder %v7034_v2, %v7049_v7  ;;  %vm1263_vm1 = vcmp.eq.s32.totalorder %v7037_v3, %v7049_v7  ;;  %vm719_vm2 = vcmp.eq.s32.totalorder %v7040_v4, %v7049_v7  ;;  %vm1231_vm3 = vcmp.eq.s32.totalorder %v7043_v5, %v7049_v7 }
  0x16   : > { %5892 = vmatpush.msk.msra.mxu2 %vm751_vm0, %v6974_v13  ;;  %5908 = vmatpush.msk.msra.mxu3 %vm1263_vm1, %v6974_v13  ;;  %vm687_vm4 = vcmp.eq.s32.totalorder %v7052_v8, %v7049_v7  ;;  %vm1199_vm5 = vcmp.eq.s32.totalorder %v7055_v9, %v7049_v7  ;;  %vm750_vm6 = vcmp.eq.s32.totalorder %v7034_v2, %v7058_v10  ;;  %v7103_v16 = vadd.s32 80, %v7022_v1 }
  0x17   : > { %vm1262_vm7 = vcmp.eq.s32.totalorder %v7037_v3, %v7058_v10  ;;  %vm718_vm8 = vcmp.eq.s32.totalorder %v7040_v4, %v7058_v10  ;;  %vm1230_vm9 = vcmp.eq.s32.totalorder %v7043_v5, %v7058_v10  ;;  %vm655_vm10 = vcmp.eq.s32.totalorder %v7061_v11, %v7049_v7  ;;  %5860 = vmatpush.msk.msra.mxu0 %vm750_vm6, %v6974_v13 }
  0x18   : > { %5893 = vmatpush.msk.msra.mxu2 %vm719_vm2, %v6974_v13  ;;  %5909 = vmatpush.msk.msra.mxu3 %vm1231_vm3, %v6974_v13  ;;  %vm1167_vm11 = vcmp.eq.s32.totalorder %v7064_v12, %v7049_v7  ;;  %v7106_v17 = vadd.s32 208, %v7022_v1  ;;  %vm686_vm12 = vcmp.eq.s32.totalorder %v7052_v8, %v7058_v10  ;;  %vm1198_vm13 = vcmp.eq.s32.totalorder %v7055_v9, %v7058_v10 }
  0x19   : > { %5876 = vmatpush.msk.msra.mxu1 %vm1262_vm7, %v6974_v13  ;;  %vm623_vm14 = vcmp.eq.s32.totalorder %v7077_v14, %v7049_v7  ;;  %vm1135_vm15 = vcmp.eq.s32.totalorder %v7080_v15, %v7049_v7  ;;  %5861 = vmatpush.msk.msra.mxu0 %vm718_vm8, %v6974_v13  ;;  %v7121_v18 = vadd.s32 72, %v7022_v1  ;;  %v7124_v19 = vadd.s32 200, %v7022_v1 }
  0x1a   : > { %5894 = vmatpush.msk.msra.mxu2 %vm687_vm4, %v6974_v13  ;;  %5910 = vmatpush.msk.msra.mxu3 %vm1199_vm5, %v6974_v13  ;;  %vm654_vm0 = vcmp.eq.s32.totalorder %v7061_v11, %v7058_v10  ;;  %vm1166_vm1 = vcmp.eq.s32.totalorder %v7064_v12, %v7058_v10  ;;  %vm591_vm2 = vcmp.eq.s32.totalorder %v7103_v16, %v7049_v7  ;;  %v7145_v20 = vadd.s32 64, %v7022_v1  ;;  %v7564_v41 = vld.sshfl [vmem:[#allocation1] sm:$0xff pattern:$0x75316420] }
  0x1b   : > { %5877 = vmatpush.msk.msra.mxu1 %vm1230_vm9, %v6974_v13  ;;  %vm1103_vm3 = vcmp.eq.s32.totalorder %v7106_v17, %v7049_v7  ;;  %5862 = vmatpush.msk.msra.mxu0 %vm686_vm12, %v6974_v13  ;;  %v7148_v21 = vadd.s32 192, %v7022_v1  ;;  %vm622_vm4 = vcmp.eq.s32.totalorder %v7077_v14, %v7058_v10  ;;  %vm1134_vm5 = vcmp.eq.s32.totalorder %v7080_v15, %v7058_v10  ;;  %v7566_v42 = vld.sshfl [vmem:[#allocation1 + $0x8] sm:$0xff pattern:$0x75316420] }
  0x1c   : > { %5895 = vmatpush.msk.msra.mxu2 %vm655_vm10, %v6974_v13  ;;  %5911 = vmatpush.msk.msra.mxu3 %vm1167_vm11, %v6974_v13  ;;  %vm559_vm6 = vcmp.eq.s32.totalorder %v7121_v18, %v7049_v7  ;;  %vm1071_vm7 = vcmp.eq.s32.totalorder %v7124_v19, %v7049_v7  ;;  %v7169_v22 = vadd.s32 56, %v7022_v1  ;;  %v7172_v23 = vadd.s32 184, %v7022_v1  ;;  %v8403_v59 = vld.sshfl [vmem:[#allocation1] sm:$0xff pattern:$0x75316420] }
  0x1d   : > { %5878 = vmatpush.msk.msra.mxu1 %vm1198_vm13, %v6974_v13  ;;  %5863 = vmatpush.msk.msra.mxu0 %vm654_vm0, %v6974_v13  ;;  %vm590_vm8 = vcmp.eq.s32.totalorder %v7103_v16, %v7058_v10  ;;  %vm1102_vm9 = vcmp.eq.s32.totalorder %v7106_v17, %v7058_v10  ;;  %vm527_vm10 = vcmp.eq.s32.totalorder %v7145_v20, %v7049_v7  ;;  %v7193_v24 = vadd.s32 48, %v7022_v1  ;;  %v8406_v60 = vld.sshfl [vmem:[#allocation1 + $0x8] sm:$0xff pattern:$0x75316420] }
  0x1e   : > { %5896 = vmatpush.msk.msra.mxu2 %vm623_vm14, %v6974_v13  ;;  %5912 = vmatpush.msk.msra.mxu3 %vm1135_vm15, %v6974_v13  ;;  %vm1039_vm11 = vcmp.eq.s32.totalorder %v7148_v21, %v7049_v7  ;;  %v7196_v25 = vadd.s32 176, %v7022_v1  ;;  %vm558_vm12 = vcmp.eq.s32.totalorder %v7121_v18, %v7058_v10  ;;  %vm1070_vm13 = vcmp.eq.s32.totalorder %v7124_v19, %v7058_v10 }
  0x1f   : > { %5879 = vmatpush.msk.msra.mxu1 %vm1166_vm1, %v6974_v13  ;;  %5864 = vmatpush.msk.msra.mxu0 %vm622_vm4, %v6974_v13  ;;  %vm495_vm14 = vcmp.eq.s32.totalorder %v7169_v22, %v7049_v7  ;;  %vm1007_vm15 = vcmp.eq.s32.totalorder %v7172_v23, %v7049_v7  ;;  %v7217_v26 = vadd.s32 40, %v7022_v1  ;;  %v7220_v27 = vadd.s32 168, %v7022_v1 }
  0x20   : > { %5897 = vmatpush.msk.msra.mxu2 %vm591_vm2, %v6974_v13  ;;  %5913 = vmatpush.msk.msra.mxu3 %vm1103_vm3, %v6974_v13  ;;  %vm526_vm0 = vcmp.eq.s32.totalorder %v7145_v20, %v7058_v10  ;;  %vm1038_vm1 = vcmp.eq.s32.totalorder %v7148_v21, %v7058_v10  ;;  %vm463_vm2 = vcmp.eq.s32.totalorder %v7193_v24, %v7049_v7  ;;  %v7241_v28 = vadd.s32 32, %v7022_v1 }
  0x21   : > { %5880 = vmatpush.msk.msra.mxu1 %vm1134_vm5, %v6974_v13  ;;  %5865 = vmatpush.msk.msra.mxu0 %vm590_vm8, %v6974_v13  ;;  %vm975_vm3 = vcmp.eq.s32.totalorder %v7196_v25, %v7049_v7  ;;  %v7244_v29 = vadd.s32 160, %v7022_v1  ;;  %vm494_vm4 = vcmp.eq.s32.totalorder %v7169_v22, %v7058_v10  ;;  %vm1006_vm5 = vcmp.eq.s32.totalorder %v7172_v23, %v7058_v10 }
  0x22   : > { %5898 = vmatpush.msk.msra.mxu2 %vm559_vm6, %v6974_v13  ;;  %5914 = vmatpush.msk.msra.mxu3 %vm1071_vm7, %v6974_v13  ;;  %vm431_vm6 = vcmp.eq.s32.totalorder %v7217_v26, %v7049_v7  ;;  %vm943_vm7 = vcmp.eq.s32.totalorder %v7220_v27, %v7049_v7  ;;  %v7266_v30 = vadd.s32 24, %v7022_v1  ;;  %v7269_v31 = vadd.s32 152, %v7022_v1 }
  0x23   : > { %5881 = vmatpush.msk.msra.mxu1 %vm1102_vm9, %v6974_v13  ;;  %5866 = vmatpush.msk.msra.mxu0 %vm558_vm12, %v6974_v13  ;;  %vm462_vm8 = vcmp.eq.s32.totalorder %v7193_v24, %v7058_v10  ;;  %vm974_vm9 = vcmp.eq.s32.totalorder %v7196_v25, %v7058_v10  ;;  %v7293_v32 = vadd.s32 16, %v7022_v1  ;;  %v7296_v33 = vadd.s32 144, %v7022_v1 }
  0x24   : > { %5899 = vmatpush.msk.msra.mxu2 %vm527_vm10, %v6974_v13  ;;  %5915 = vmatpush.msk.msra.mxu3 %vm1039_vm11, %v6974_v13  ;;  %vm399_vm10 = vcmp.eq.s32.totalorder %v7241_v28, %v7049_v7  ;;  %vm911_vm11 = vcmp.eq.s32.totalorder %v7244_v29, %v7049_v7  ;;  %vm430_vm12 = vcmp.eq.s32.totalorder %v7217_v26, %v7058_v10  ;;  %v7317_v34 = vadd.s32 8, %v7022_v1 }
  0x25   : > { %5882 = vmatpush.msk.msra.mxu1 %vm1070_vm13, %v6974_v13  ;;  %5867 = vmatpush.msk.msra.mxu0 %vm526_vm0, %v6974_v13  ;;  %vm942_vm13 = vcmp.eq.s32.totalorder %v7220_v27, %v7058_v10  ;;  %v7320_v35 = vadd.s32 136, %v7022_v1  ;;  %vm398_vm0 = vcmp.eq.s32.totalorder %v7241_v28, %v7058_v10  ;;  %v7347_v37 = vadd.s32 128, %v7022_v1 }
  0x26   : > { %5900 = vmatpush.msk.msra.mxu2 %vm495_vm14, %v6974_v13  ;;  %5916 = vmatpush.msk.msra.mxu3 %vm1007_vm15, %v6974_v13  ;;  %vm367_vm14 = vcmp.eq.s32.totalorder %v7266_v30, %v7049_v7  ;;  %vm879_vm15 = vcmp.eq.s32.totalorder %v7269_v31, %v7049_v7  ;;  %v7358_v38 = vperm.slane %v7046_v6, 3  ;;  %v7395_v39 = vperm.slane %v7046_v6, 2 }
  0x27   : > { %5883 = vmatpush.msk.msra.mxu1 %vm1038_vm1, %v6974_v13  ;;  %5868 = vmatpush.msk.msra.mxu0 %vm494_vm4, %v6974_v13  ;;  %vm910_vm1 = vcmp.eq.s32.totalorder %v7244_v29, %v7058_v10  ;;  %vm366_vm4 = vcmp.eq.s32.totalorder %v7266_v30, %v7058_v10  ;;  %v7554_v40 = vperm.slane %v7046_v6, 5  ;;  %v7611_v43 = vperm.slane %v7046_v6, 4 }
  0x28   : > { %5901 = vmatpush.msk.msra.mxu2 %vm463_vm2, %v6974_v13  ;;  %5917 = vmatpush.msk.msra.mxu3 %vm975_vm3, %v6974_v13  ;;  %vm335_vm2 = vcmp.eq.s32.totalorder %v7293_v32, %v7049_v7  ;;  %vm847_vm3 = vcmp.eq.s32.totalorder %v7296_v33, %v7049_v7  ;;  %v7760_v44 = vperm.slane %v7046_v6, 7  ;;  %v7813_v45 = vperm.slane %v7046_v6, 6 }
  0x29   : > { %5884 = vmatpush.msk.msra.mxu1 %vm1006_vm5, %v6974_v13  ;;  %5869 = vmatpush.msk.msra.mxu0 %vm462_vm8, %v6974_v13  ;;  %vm878_vm5 = vcmp.eq.s32.totalorder %v7269_v31, %v7058_v10  ;;  %vm334_vm8 = vcmp.eq.s32.totalorder %v7293_v32, %v7058_v10  ;;  %v7965_v47 = vperm.slane %v7944_v46, 1  ;;  %v8018_v48 = vperm.slane %v7944_v46, 0 }
  0x2a   : > { %5902 = vmatpush.msk.msra.mxu2 %vm431_vm6, %v6974_v13  ;;  %5918 = vmatpush.msk.msra.mxu3 %vm943_vm7, %v6974_v13  ;;  %vm303_vm6 = vcmp.eq.s32.totalorder %v7317_v34, %v7049_v7  ;;  %vm815_vm7 = vcmp.eq.s32.totalorder %v7320_v35, %v7049_v7  ;;  %v8167_v49 = vperm.slane %v7944_v46, 3  ;;  %v8220_v50 = vperm.slane %v7944_v46, 2 }
  0x2b   : > { %5885 = vmatpush.msk.msra.mxu1 %vm974_vm9, %v6974_v13  ;;  %5870 = vmatpush.msk.msra.mxu0 %vm430_vm12, %v6974_v13  ;;  %vm846_vm9 = vcmp.eq.s32.totalorder %v7296_v33, %v7058_v10  ;;  %vm753_vm12 = vcmp.eq.s32.totalorder %v7034_v2, %v7358_v38  ;;  %v8369_v51 = vperm.slane %v7944_v46, 5  ;;  %v8440_v62 = vperm.slane %v7944_v46, 4 }
  0x2c   : > { %5903 = vmatpush.msk.msra.mxu2 %vm399_vm10, %v6974_v13  ;;  %5919 = vmatpush.msk.msra.mxu3 %vm911_vm11, %v6974_v13  ;;  %vm271_vm10 = vcmp.eq.s32.totalorder %v7022_v1, %v7049_v7  ;;  %vm783_vm11 = vcmp.eq.s32.totalorder %v7347_v37, %v7049_v7  ;;  %v8589_v63 = vperm.slane %v7944_v46, 7 }
  0x2d   : > { %5886 = vmatpush.msk.msra.mxu1 %vm942_vm13, %v6974_v13  ;;  %5871 = vmatpush.msk.msra.mxu0 %vm398_vm0, %v6974_v13  ;;  %vm1265_vm13 = vcmp.eq.s32.totalorder %v7037_v3, %v7358_v38  ;;  %vm721_vm0 = vcmp.eq.s32.totalorder %v7040_v4, %v7358_v38 }
  0x2e   : > { %5904 = vmatpush.msk.msra.mxu2 %vm367_vm14, %v6974_v13  ;;  %5920 = vmatpush.msk.msra.mxu3 %vm879_vm15, %v6974_v13  ;;  %vm302_vm14 = vcmp.eq.s32.totalorder %v7317_v34, %v7058_v10  ;;  %vm814_vm15 = vcmp.eq.s32.totalorder %v7320_v35, %v7058_v10 }
  0x2f   : > { %5887 = vmatpush.msk.msra.mxu1 %vm910_vm1, %v6974_v13  ;;  %5872 = vmatpush.msk.msra.mxu0 %vm366_vm4, %v6974_v13  ;;  %vm1233_vm1 = vcmp.eq.s32.totalorder %v7043_v5, %v7358_v38  ;;  %vm689_vm4 = vcmp.eq.s32.totalorder %v7052_v8, %v7358_v38 }
  0x30   : > { %5905 = vmatpush.msk.msra.mxu2 %vm335_vm2, %v6974_v13  ;;  %5921 = vmatpush.msk.msra.mxu3 %vm847_vm3, %v6974_v13  ;;  %vm270_vm2 = vcmp.eq.s32.totalorder %v7022_v1, %v7058_v10  ;;  %vm782_vm3 = vcmp.eq.s32.totalorder %v7347_v37, %v7058_v10 }
  0x31   : > { %5888 = vmatpush.msk.msra.mxu1 %vm878_vm5, %v6974_v13  ;;  %5873 = vmatpush.msk.msra.mxu0 %vm334_vm8, %v6974_v13  ;;  %vm1201_vm5 = vcmp.eq.s32.totalorder %v7055_v9, %v7358_v38  ;;  %vm657_vm8 = vcmp.eq.s32.totalorder %v7061_v11, %v7358_v38 }
  0x32   : > { %5906 = vmatpush.msk.msra.mxu2 %vm303_vm6, %v6974_v13  ;;  %5922 = vmatpush.msk.msra.mxu3 %vm815_vm7, %v6974_v13  ;;  %vm752_vm6 = vcmp.eq.s32.totalorder %v7034_v2, %v7395_v39  ;;  %vm1264_vm7 = vcmp.eq.s32.totalorder %v7037_v3, %v7395_v39 }
  0x33   : > { %5889 = vmatpush.msk.msra.mxu1 %vm846_vm9, %v6974_v13  ;;  %5874 = vmatpush.msk.msra.mxu0 %vm302_vm14, %v6974_v13  ;;  %vm1169_vm9 = vcmp.eq.s32.totalorder %v7064_v12, %v7358_v38  ;;  %vm688_vm14 = vcmp.eq.s32.totalorder %v7052_v8, %v7395_v39 }
  0x34   : > { %5907 = vmatpush.msk.msra.mxu2 %vm271_vm10, %v6974_v13  ;;  %5923 = vmatpush.msk.msra.mxu3 %vm783_vm11, %v6974_v13  ;;  %vm720_vm10 = vcmp.eq.s32.totalorder %v7040_v4, %v7395_v39  ;;  %vm1232_vm11 = vcmp.eq.s32.totalorder %v7043_v5, %v7395_v39 }
  0x35   : > { %5890 = vmatpush.msk.msra.mxu1 %vm814_vm15, %v6974_v13  ;;  %5875 = vmatpush.msk.msra.mxu0 %vm270_vm2, %v6974_v13  ;;  %vm1200_vm15 = vcmp.eq.s32.totalorder %v7055_v9, %v7395_v39  ;;  %vm656_vm2 = vcmp.eq.s32.totalorder %v7061_v11, %v7395_v39 }
  0x36   : > { %5956 = vmatpush.msk.msrb.mxu2 %vm753_vm12, %v6974_v13  ;;  %5972 = vmatpush.msk.msrb.mxu3 %vm1265_vm13, %v6974_v13  ;;  %vm625_vm12 = vcmp.eq.s32.totalorder %v7077_v14, %v7358_v38  ;;  %vm1137_vm13 = vcmp.eq.s32.totalorder %v7080_v15, %v7358_v38 }
  0x37   : > { %5891 = vmatpush.msk.msra.mxu1 %vm782_vm3, %v6974_v13  ;;  %5924 = vmatpush.msk.msrb.mxu0 %vm752_vm6, %v6974_v13  ;;  %vm1168_vm3 = vcmp.eq.s32.totalorder %v7064_v12, %v7395_v39  ;;  %vm624_vm6 = vcmp.eq.s32.totalorder %v7077_v14, %v7395_v39 }
  0x38   : > { %5957 = vmatpush.msk.msrb.mxu2 %vm721_vm0, %v6974_v13  ;;  %5973 = vmatpush.msk.msrb.mxu3 %vm1233_vm1, %v6974_v13  ;;  %vm593_vm0 = vcmp.eq.s32.totalorder %v7103_v16, %v7358_v38  ;;  %vm1105_vm1 = vcmp.eq.s32.totalorder %v7106_v17, %v7358_v38 }
  0x39   : > { %5940 = vmatpush.msk.msrb.mxu1 %vm1264_vm7, %v6974_v13  ;;  %5925 = vmatpush.msk.msrb.mxu0 %vm720_vm10, %v6974_v13  ;;  %vm1136_vm7 = vcmp.eq.s32.totalorder %v7080_v15, %v7395_v39  ;;  %vm592_vm10 = vcmp.eq.s32.totalorder %v7103_v16, %v7395_v39 }
  0x3a   : > { %5958 = vmatpush.msk.msrb.mxu2 %vm689_vm4, %v6974_v13  ;;  %5974 = vmatpush.msk.msrb.mxu3 %vm1201_vm5, %v6974_v13  ;;  %vm561_vm4 = vcmp.eq.s32.totalorder %v7121_v18, %v7358_v38  ;;  %vm1073_vm5 = vcmp.eq.s32.totalorder %v7124_v19, %v7358_v38 }
  0x3b   : > { %5941 = vmatpush.msk.msrb.mxu1 %vm1232_vm11, %v6974_v13  ;;  %5926 = vmatpush.msk.msrb.mxu0 %vm688_vm14, %v6974_v13  ;;  %vm1104_vm11 = vcmp.eq.s32.totalorder %v7106_v17, %v7395_v39  ;;  %vm560_vm14 = vcmp.eq.s32.totalorder %v7121_v18, %v7395_v39 }
  0x3c   : > { %5959 = vmatpush.msk.msrb.mxu2 %vm657_vm8, %v6974_v13  ;;  %5975 = vmatpush.msk.msrb.mxu3 %vm1169_vm9, %v6974_v13  ;;  %vm529_vm8 = vcmp.eq.s32.totalorder %v7145_v20, %v7358_v38  ;;  %vm1041_vm9 = vcmp.eq.s32.totalorder %v7148_v21, %v7358_v38 }
  0x3d   : > { %5942 = vmatpush.msk.msrb.mxu1 %vm1200_vm15, %v6974_v13  ;;  %5927 = vmatpush.msk.msrb.mxu0 %vm656_vm2, %v6974_v13  ;;  %vm1072_vm15 = vcmp.eq.s32.totalorder %v7124_v19, %v7395_v39  ;;  %vm528_vm2 = vcmp.eq.s32.totalorder %v7145_v20, %v7395_v39 }
  0x3e   : > { %5960 = vmatpush.msk.msrb.mxu2 %vm625_vm12, %v6974_v13  ;;  %5976 = vmatpush.msk.msrb.mxu3 %vm1137_vm13, %v6974_v13  ;;  %vm497_vm12 = vcmp.eq.s32.totalorder %v7169_v22, %v7358_v38  ;;  %vm1009_vm13 = vcmp.eq.s32.totalorder %v7172_v23, %v7358_v38 }
  0x3f   : > { %5943 = vmatpush.msk.msrb.mxu1 %vm1168_vm3, %v6974_v13  ;;  %5928 = vmatpush.msk.msrb.mxu0 %vm624_vm6, %v6974_v13  ;;  %vm1040_vm3 = vcmp.eq.s32.totalorder %v7148_v21, %v7395_v39  ;;  %vm496_vm6 = vcmp.eq.s32.totalorder %v7169_v22, %v7395_v39 }
  0x40   : > { %5961 = vmatpush.msk.msrb.mxu2 %vm593_vm0, %v6974_v13  ;;  %5977 = vmatpush.msk.msrb.mxu3 %vm1105_vm1, %v6974_v13  ;;  %vm465_vm0 = vcmp.eq.s32.totalorder %v7193_v24, %v7358_v38  ;;  %vm977_vm1 = vcmp.eq.s32.totalorder %v7196_v25, %v7358_v38 }
  0x41   : > { %5944 = vmatpush.msk.msrb.mxu1 %vm1136_vm7, %v6974_v13  ;;  %5929 = vmatpush.msk.msrb.mxu0 %vm592_vm10, %v6974_v13  ;;  %vm1008_vm7 = vcmp.eq.s32.totalorder %v7172_v23, %v7395_v39  ;;  %vm464_vm10 = vcmp.eq.s32.totalorder %v7193_v24, %v7395_v39 }
  0x42   : > { %5962 = vmatpush.msk.msrb.mxu2 %vm561_vm4, %v6974_v13  ;;  %5978 = vmatpush.msk.msrb.mxu3 %vm1073_vm5, %v6974_v13  ;;  %vm433_vm4 = vcmp.eq.s32.totalorder %v7217_v26, %v7358_v38  ;;  %vm945_vm5 = vcmp.eq.s32.totalorder %v7220_v27, %v7358_v38 }
  0x43   : > { %5945 = vmatpush.msk.msrb.mxu1 %vm1104_vm11, %v6974_v13  ;;  %5930 = vmatpush.msk.msrb.mxu0 %vm560_vm14, %v6974_v13  ;;  %vm976_vm11 = vcmp.eq.s32.totalorder %v7196_v25, %v7395_v39  ;;  %vm432_vm14 = vcmp.eq.s32.totalorder %v7217_v26, %v7395_v39 }
  0x44   : > { %5963 = vmatpush.msk.msrb.mxu2 %vm529_vm8, %v6974_v13  ;;  %5979 = vmatpush.msk.msrb.mxu3 %vm1041_vm9, %v6974_v13  ;;  %vm401_vm8 = vcmp.eq.s32.totalorder %v7241_v28, %v7358_v38  ;;  %vm913_vm9 = vcmp.eq.s32.totalorder %v7244_v29, %v7358_v38 }
  0x45   : > { %5946 = vmatpush.msk.msrb.mxu1 %vm1072_vm15, %v6974_v13  ;;  %5931 = vmatpush.msk.msrb.mxu0 %vm528_vm2, %v6974_v13  ;;  %vm944_vm15 = vcmp.eq.s32.totalorder %v7220_v27, %v7395_v39  ;;  %vm400_vm2 = vcmp.eq.s32.totalorder %v7241_v28, %v7395_v39 }
  0x46   : > { %5964 = vmatpush.msk.msrb.mxu2 %vm497_vm12, %v6974_v13  ;;  %5980 = vmatpush.msk.msrb.mxu3 %vm1009_vm13, %v6974_v13  ;;  %vm369_vm12 = vcmp.eq.s32.totalorder %v7266_v30, %v7358_v38  ;;  %vm881_vm13 = vcmp.eq.s32.totalorder %v7269_v31, %v7358_v38 }
  0x47   : > { %5947 = vmatpush.msk.msrb.mxu1 %vm1040_vm3, %v6974_v13  ;;  %5932 = vmatpush.msk.msrb.mxu0 %vm496_vm6, %v6974_v13  ;;  %vm912_vm3 = vcmp.eq.s32.totalorder %v7244_v29, %v7395_v39  ;;  %vm273_vm6 = vcmp.eq.s32.totalorder %v7022_v1, %v7358_v38 }
  0x48   : > { %5965 = vmatpush.msk.msrb.mxu2 %vm465_vm0, %v6974_v13  ;;  %5981 = vmatpush.msk.msrb.mxu3 %vm977_vm1, %v6974_v13  ;;  %vm337_vm0 = vcmp.eq.s32.totalorder %v7293_v32, %v7358_v38  ;;  %vm849_vm1 = vcmp.eq.s32.totalorder %v7296_v33, %v7358_v38 }
  0x49   : > { %5948 = vmatpush.msk.msrb.mxu1 %vm1008_vm7, %v6974_v13  ;;  %5933 = vmatpush.msk.msrb.mxu0 %vm464_vm10, %v6974_v13  ;;  %vm785_vm7 = vcmp.eq.s32.totalorder %v7347_v37, %v7358_v38  ;;  %vm368_vm10 = vcmp.eq.s32.totalorder %v7266_v30, %v7395_v39 }
  0x4a   : > { %5966 = vmatpush.msk.msrb.mxu2 %vm433_vm4, %v6974_v13  ;;  %5982 = vmatpush.msk.msrb.mxu3 %vm945_vm5, %v6974_v13  ;;  %vm305_vm4 = vcmp.eq.s32.totalorder %v7317_v34, %v7358_v38  ;;  %vm817_vm5 = vcmp.eq.s32.totalorder %v7320_v35, %v7358_v38 }
  0x4b   : > { %5949 = vmatpush.msk.msrb.mxu1 %vm976_vm11, %v6974_v13  ;;  %5934 = vmatpush.msk.msrb.mxu0 %vm432_vm14, %v6974_v13  ;;  %vm880_vm11 = vcmp.eq.s32.totalorder %v7269_v31, %v7395_v39  ;;  %vm336_vm14 = vcmp.eq.s32.totalorder %v7293_v32, %v7395_v39 }
  0x4c   : > { %5967 = vmatpush.msk.msrb.mxu2 %vm401_vm8, %v6974_v13  ;;  %5983 = vmatpush.msk.msrb.mxu3 %vm913_vm9, %v6974_v13  ;;  %vm755_vm8 = vcmp.eq.s32.totalorder %v7034_v2, %v7554_v40  ;;  %vm1267_vm9 = vcmp.eq.s32.totalorder %v7037_v3, %v7554_v40 }
  0x4d   : > { %5950 = vmatpush.msk.msrb.mxu1 %vm944_vm15, %v6974_v13  ;;  %5935 = vmatpush.msk.msrb.mxu0 %vm400_vm2, %v6974_v13  ;;  %vm848_vm15 = vcmp.eq.s32.totalorder %v7296_v33, %v7395_v39  ;;  %vm304_vm2 = vcmp.eq.s32.totalorder %v7317_v34, %v7395_v39 }
  0x4e   : > { %5968 = vmatpush.msk.msrb.mxu2 %vm369_vm12, %v6974_v13  ;;  %5984 = vmatpush.msk.msrb.mxu3 %vm881_vm13, %v6974_v13  ;;  %vm723_vm12 = vcmp.eq.s32.totalorder %v7040_v4, %v7554_v40  ;;  %vm1235_vm13 = vcmp.eq.s32.totalorder %v7043_v5, %v7554_v40 }
  0x4f   : > { %5951 = vmatpush.msk.msrb.mxu1 %vm912_vm3, %v6974_v13  ;;  %3404 = vmatmul.f32.vlgmr.msra.gmra.mxu2 %v7564_v41  ;;  %vm816_vm3 = vcmp.eq.s32.totalorder %v7320_v35, %v7395_v39 }
  0x50   : > { %5969 = vmatpush.msk.msrb.mxu2 %vm337_vm0, %v6974_v13  ;;  %5985 = vmatpush.msk.msrb.mxu3 %vm849_vm1, %v6974_v13  ;;  %vm691_vm0 = vcmp.eq.s32.totalorder %v7052_v8, %v7554_v40  ;;  %vm1203_vm1 = vcmp.eq.s32.totalorder %v7055_v9, %v7554_v40 }
  0x51   : > { %3424 = vmatmul.f32.vlgmr.msra.gmra.mxu3 %v7566_v42  ;;  %5936 = vmatpush.msk.msrb.mxu0 %vm368_vm10, %v6974_v13  ;;  %vm627_vm10 = vcmp.eq.s32.totalorder %v7077_v14, %v7554_v40 }
  0x52   : > { %5970 = vmatpush.msk.msrb.mxu2 %vm305_vm4, %v6974_v13  ;;  %5986 = vmatpush.msk.msrb.mxu3 %vm817_vm5, %v6974_v13  ;;  %vm659_vm4 = vcmp.eq.s32.totalorder %v7061_v11, %v7554_v40  ;;  %vm1171_vm5 = vcmp.eq.s32.totalorder %v7064_v12, %v7554_v40 }
  0x53   : > { %5952 = vmatpush.msk.msrb.mxu1 %vm880_vm11, %v6974_v13  ;;  %5937 = vmatpush.msk.msrb.mxu0 %vm336_vm14, %v6974_v13  ;;  %vm1139_vm11 = vcmp.eq.s32.totalorder %v7080_v15, %v7554_v40  ;;  %vm595_vm14 = vcmp.eq.s32.totalorder %v7103_v16, %v7554_v40 }
  0x54   : > { %5971 = vmatpush.msk.msrb.mxu2 %vm273_vm6, %v6974_v13  ;;  %5987 = vmatpush.msk.msrb.mxu3 %vm785_vm7, %v6974_v13  ;;  %vm272_vm6 = vcmp.eq.s32.totalorder %v7022_v1, %v7395_v39  ;;  %vm784_vm7 = vcmp.eq.s32.totalorder %v7347_v37, %v7395_v39 }
  0x55   : > { %5953 = vmatpush.msk.msrb.mxu1 %vm848_vm15, %v6974_v13  ;;  %5938 = vmatpush.msk.msrb.mxu0 %vm304_vm2, %v6974_v13  ;;  %vm1107_vm15 = vcmp.eq.s32.totalorder %v7106_v17, %v7554_v40  ;;  %vm563_vm2 = vcmp.eq.s32.totalorder %v7121_v18, %v7554_v40 }
  0x56   : > { %6020 = vmatpush.msk.msra.mxu2 %vm755_vm8, %v6974_v13  ;;  %6036 = vmatpush.msk.msra.mxu3 %vm1267_vm9, %v6974_v13  ;;  %vm754_vm8 = vcmp.eq.s32.totalorder %v7034_v2, %v7611_v43  ;;  %vm1266_vm9 = vcmp.eq.s32.totalorder %v7037_v3, %v7611_v43 }
  0x57   : > { %5954 = vmatpush.msk.msrb.mxu1 %vm816_vm3, %v6974_v13  ;;  %5939 = vmatpush.msk.msrb.mxu0 %vm272_vm6, %v6974_v13  ;;  %vm1075_vm3 = vcmp.eq.s32.totalorder %v7124_v19, %v7554_v40  ;;  %vm531_vm6 = vcmp.eq.s32.totalorder %v7145_v20, %v7554_v40 }
  0x58   : > { %6021 = vmatpush.msk.msra.mxu2 %vm723_vm12, %v6974_v13  ;;  %6037 = vmatpush.msk.msra.mxu3 %vm1235_vm13, %v6974_v13  ;;  %vm722_vm12 = vcmp.eq.s32.totalorder %v7040_v4, %v7611_v43  ;;  %vm1234_vm13 = vcmp.eq.s32.totalorder %v7043_v5, %v7611_v43 }
  0x59   : > { %5955 = vmatpush.msk.msrb.mxu1 %vm784_vm7, %v6974_v13  ;;  %3364 = vmatmul.f32.vlgmr.msra.gmra.mxu0 %v7564_v41  ;;  %vm1043_vm7 = vcmp.eq.s32.totalorder %v7148_v21, %v7554_v40 }
  0x5a   : > { %6022 = vmatpush.msk.msra.mxu2 %vm691_vm0, %v6974_v13  ;;  %6038 = vmatpush.msk.msra.mxu3 %vm1203_vm1, %v6974_v13  ;;  %vm690_vm0 = vcmp.eq.s32.totalorder %v7052_v8, %v7611_v43  ;;  %vm1202_vm1 = vcmp.eq.s32.totalorder %v7055_v9, %v7611_v43 }
  0x5b   : > { %3384 = vmatmul.f32.vlgmr.msra.gmra.mxu1 %v7566_v42  ;;  %5988 = vmatpush.msk.msra.mxu0 %vm754_vm8, %v6974_v13  ;;  %vm626_vm8 = vcmp.eq.s32.totalorder %v7077_v14, %v7611_v43 }
  0x5c   : > { %6023 = vmatpush.msk.msra.mxu2 %vm659_vm4, %v6974_v13  ;;  %6039 = vmatpush.msk.msra.mxu3 %vm1171_vm5, %v6974_v13  ;;  %vm658_vm4 = vcmp.eq.s32.totalorder %v7061_v11, %v7611_v43  ;;  %vm1170_vm5 = vcmp.eq.s32.totalorder %v7064_v12, %v7611_v43 }
  0x5d   : > { %6004 = vmatpush.msk.msra.mxu1 %vm1266_vm9, %v6974_v13  ;;  %5989 = vmatpush.msk.msra.mxu0 %vm722_vm12, %v6974_v13  ;;  %vm1138_vm9 = vcmp.eq.s32.totalorder %v7080_v15, %v7611_v43  ;;  %vm594_vm12 = vcmp.eq.s32.totalorder %v7103_v16, %v7611_v43 }
  0x5e   : > { %6024 = vmatpush.msk.msra.mxu2 %vm627_vm10, %v6974_v13  ;;  %6040 = vmatpush.msk.msra.mxu3 %vm1139_vm11, %v6974_v13  ;;  %vm499_vm10 = vcmp.eq.s32.totalorder %v7169_v22, %v7554_v40  ;;  %vm1011_vm11 = vcmp.eq.s32.totalorder %v7172_v23, %v7554_v40 }
  0x5f   : > { %6005 = vmatpush.msk.msra.mxu1 %vm1234_vm13, %v6974_v13  ;;  %5990 = vmatpush.msk.msra.mxu0 %vm690_vm0, %v6974_v13  ;;  %vm1106_vm13 = vcmp.eq.s32.totalorder %v7106_v17, %v7611_v43  ;;  %vm562_vm0 = vcmp.eq.s32.totalorder %v7121_v18, %v7611_v43 }
  0x60   : > { %6025 = vmatpush.msk.msra.mxu2 %vm595_vm14, %v6974_v13  ;;  %6041 = vmatpush.msk.msra.mxu3 %vm1107_vm15, %v6974_v13  ;;  %vm467_vm14 = vcmp.eq.s32.totalorder %v7193_v24, %v7554_v40  ;;  %vm979_vm15 = vcmp.eq.s32.totalorder %v7196_v25, %v7554_v40 }
  0x61   : > { %6006 = vmatpush.msk.msra.mxu1 %vm1202_vm1, %v6974_v13  ;;  %5991 = vmatpush.msk.msra.mxu0 %vm658_vm4, %v6974_v13  ;;  %vm1074_vm1 = vcmp.eq.s32.totalorder %v7124_v19, %v7611_v43  ;;  %vm530_vm4 = vcmp.eq.s32.totalorder %v7145_v20, %v7611_v43 }
  0x62   : > { %6026 = vmatpush.msk.msra.mxu2 %vm563_vm2, %v6974_v13  ;;  %6042 = vmatpush.msk.msra.mxu3 %vm1075_vm3, %v6974_v13  ;;  %vm435_vm2 = vcmp.eq.s32.totalorder %v7217_v26, %v7554_v40  ;;  %vm947_vm3 = vcmp.eq.s32.totalorder %v7220_v27, %v7554_v40 }
  0x63   : > { %6007 = vmatpush.msk.msra.mxu1 %vm1170_vm5, %v6974_v13  ;;  %5992 = vmatpush.msk.msra.mxu0 %vm626_vm8, %v6974_v13  ;;  %vm1042_vm5 = vcmp.eq.s32.totalorder %v7148_v21, %v7611_v43  ;;  %vm498_vm8 = vcmp.eq.s32.totalorder %v7169_v22, %v7611_v43 }
  0x64   : > { %6027 = vmatpush.msk.msra.mxu2 %vm531_vm6, %v6974_v13  ;;  %6043 = vmatpush.msk.msra.mxu3 %vm1043_vm7, %v6974_v13  ;;  %vm403_vm6 = vcmp.eq.s32.totalorder %v7241_v28, %v7554_v40  ;;  %vm915_vm7 = vcmp.eq.s32.totalorder %v7244_v29, %v7554_v40 }
  0x65   : > { %6008 = vmatpush.msk.msra.mxu1 %vm1138_vm9, %v6974_v13  ;;  %5993 = vmatpush.msk.msra.mxu0 %vm594_vm12, %v6974_v13  ;;  %vm1010_vm9 = vcmp.eq.s32.totalorder %v7172_v23, %v7611_v43  ;;  %vm466_vm12 = vcmp.eq.s32.totalorder %v7193_v24, %v7611_v43 }
  0x66   : > { %6028 = vmatpush.msk.msra.mxu2 %vm499_vm10, %v6974_v13  ;;  %6044 = vmatpush.msk.msra.mxu3 %vm1011_vm11, %v6974_v13  ;;  %vm371_vm10 = vcmp.eq.s32.totalorder %v7266_v30, %v7554_v40  ;;  %vm883_vm11 = vcmp.eq.s32.totalorder %v7269_v31, %v7554_v40 }
  0x67   : > { %6009 = vmatpush.msk.msra.mxu1 %vm1106_vm13, %v6974_v13  ;;  %5994 = vmatpush.msk.msra.mxu0 %vm562_vm0, %v6974_v13  ;;  %vm978_vm13 = vcmp.eq.s32.totalorder %v7196_v25, %v7611_v43  ;;  %vm434_vm0 = vcmp.eq.s32.totalorder %v7217_v26, %v7611_v43 }
  0x68   : > { %6029 = vmatpush.msk.msra.mxu2 %vm467_vm14, %v6974_v13  ;;  %6045 = vmatpush.msk.msra.mxu3 %vm979_vm15, %v6974_v13  ;;  %vm339_vm14 = vcmp.eq.s32.totalorder %v7293_v32, %v7554_v40  ;;  %vm851_vm15 = vcmp.eq.s32.totalorder %v7296_v33, %v7554_v40 }
  0x69   : > { %6010 = vmatpush.msk.msra.mxu1 %vm1074_vm1, %v6974_v13  ;;  %5995 = vmatpush.msk.msra.mxu0 %vm530_vm4, %v6974_v13  ;;  %vm946_vm1 = vcmp.eq.s32.totalorder %v7220_v27, %v7611_v43  ;;  %vm402_vm4 = vcmp.eq.s32.totalorder %v7241_v28, %v7611_v43 }
  0x6a   : > { %6030 = vmatpush.msk.msra.mxu2 %vm435_vm2, %v6974_v13  ;;  %6046 = vmatpush.msk.msra.mxu3 %vm947_vm3, %v6974_v13  ;;  %vm307_vm2 = vcmp.eq.s32.totalorder %v7317_v34, %v7554_v40  ;;  %vm819_vm3 = vcmp.eq.s32.totalorder %v7320_v35, %v7554_v40 }
  0x6b   : > { %6011 = vmatpush.msk.msra.mxu1 %vm1042_vm5, %v6974_v13  ;;  %5996 = vmatpush.msk.msra.mxu0 %vm498_vm8, %v6974_v13  ;;  %vm914_vm5 = vcmp.eq.s32.totalorder %v7244_v29, %v7611_v43  ;;  %vm757_vm8 = vcmp.eq.s32.totalorder %v7034_v2, %v7760_v44 }
  0x6c   : > { %6031 = vmatpush.msk.msra.mxu2 %vm403_vm6, %v6974_v13  ;;  %6047 = vmatpush.msk.msra.mxu3 %vm915_vm7, %v6974_v13  ;;  %vm275_vm6 = vcmp.eq.s32.totalorder %v7022_v1, %v7554_v40  ;;  %vm787_vm7 = vcmp.eq.s32.totalorder %v7347_v37, %v7554_v40 }
  0x6d   : > { %6012 = vmatpush.msk.msra.mxu1 %vm1010_vm9, %v6974_v13  ;;  %5997 = vmatpush.msk.msra.mxu0 %vm466_vm12, %v6974_v13  ;;  %vm1269_vm9 = vcmp.eq.s32.totalorder %v7037_v3, %v7760_v44  ;;  %vm725_vm12 = vcmp.eq.s32.totalorder %v7040_v4, %v7760_v44 }
  0x6e   : > { %6032 = vmatpush.msk.msra.mxu2 %vm371_vm10, %v6974_v13  ;;  %6048 = vmatpush.msk.msra.mxu3 %vm883_vm11, %v6974_v13  ;;  %vm370_vm10 = vcmp.eq.s32.totalorder %v7266_v30, %v7611_v43  ;;  %vm882_vm11 = vcmp.eq.s32.totalorder %v7269_v31, %v7611_v43 }
  0x6f   : > { %6013 = vmatpush.msk.msra.mxu1 %vm978_vm13, %v6974_v13  ;;  %5998 = vmatpush.msk.msra.mxu0 %vm434_vm0, %v6974_v13  ;;  %vm1237_vm13 = vcmp.eq.s32.totalorder %v7043_v5, %v7760_v44  ;;  %vm693_vm0 = vcmp.eq.s32.totalorder %v7052_v8, %v7760_v44 }
  0x70   : > { %6033 = vmatpush.msk.msra.mxu2 %vm339_vm14, %v6974_v13  ;;  %6049 = vmatpush.msk.msra.mxu3 %vm851_vm15, %v6974_v13  ;;  %vm338_vm14 = vcmp.eq.s32.totalorder %v7293_v32, %v7611_v43  ;;  %vm850_vm15 = vcmp.eq.s32.totalorder %v7296_v33, %v7611_v43 }
  0x71   : > { %6014 = vmatpush.msk.msra.mxu1 %vm946_vm1, %v6974_v13  ;;  %5999 = vmatpush.msk.msra.mxu0 %vm402_vm4, %v6974_v13  ;;  %vm1205_vm1 = vcmp.eq.s32.totalorder %v7055_v9, %v7760_v44  ;;  %vm661_vm4 = vcmp.eq.s32.totalorder %v7061_v11, %v7760_v44 }
  0x72   : > { %6034 = vmatpush.msk.msra.mxu2 %vm307_vm2, %v6974_v13  ;;  %6050 = vmatpush.msk.msra.mxu3 %vm819_vm3, %v6974_v13  ;;  %vm306_vm2 = vcmp.eq.s32.totalorder %v7317_v34, %v7611_v43  ;;  %vm818_vm3 = vcmp.eq.s32.totalorder %v7320_v35, %v7611_v43 }
  0x73   : > { %6015 = vmatpush.msk.msra.mxu1 %vm914_vm5, %v6974_v13  ;;  %3484 = vmatmul.f32.vlgmr.msrb.gmra.mxu2 %v7564_v41  ;;  %vm1173_vm5 = vcmp.eq.s32.totalorder %v7064_v12, %v7760_v44 }
  0x74   : > { %6035 = vmatpush.msk.msra.mxu2 %vm275_vm6, %v6974_v13  ;;  %6051 = vmatpush.msk.msra.mxu3 %vm787_vm7, %v6974_v13  ;;  %vm274_vm6 = vcmp.eq.s32.totalorder %v7022_v1, %v7611_v43  ;;  %vm786_vm7 = vcmp.eq.s32.totalorder %v7347_v37, %v7611_v43 }
  0x75   : > { %3504 = vmatmul.f32.vlgmr.msrb.gmra.mxu3 %v7566_v42  ;;  %6000 = vmatpush.msk.msra.mxu0 %vm370_vm10, %v6974_v13  ;;  %vm629_vm10 = vcmp.eq.s32.totalorder %v7077_v14, %v7760_v44 }
  0x76   : > { %6084 = vmatpush.msk.msrb.mxu2 %vm757_vm8, %v6974_v13  ;;  %6100 = vmatpush.msk.msrb.mxu3 %vm1269_vm9, %v6974_v13  ;;  %vm756_vm8 = vcmp.eq.s32.totalorder %v7034_v2, %v7813_v45  ;;  %vm1268_vm9 = vcmp.eq.s32.totalorder %v7037_v3, %v7813_v45 }
  0x77   : > { %6016 = vmatpush.msk.msra.mxu1 %vm882_vm11, %v6974_v13  ;;  %6001 = vmatpush.msk.msra.mxu0 %vm338_vm14, %v6974_v13  ;;  %vm1141_vm11 = vcmp.eq.s32.totalorder %v7080_v15, %v7760_v44  ;;  %vm597_vm14 = vcmp.eq.s32.totalorder %v7103_v16, %v7760_v44 }
  0x78   : > { %6085 = vmatpush.msk.msrb.mxu2 %vm725_vm12, %v6974_v13  ;;  %6101 = vmatpush.msk.msrb.mxu3 %vm1237_vm13, %v6974_v13  ;;  %vm724_vm12 = vcmp.eq.s32.totalorder %v7040_v4, %v7813_v45  ;;  %vm1236_vm13 = vcmp.eq.s32.totalorder %v7043_v5, %v7813_v45 }
  0x79   : > { %6017 = vmatpush.msk.msra.mxu1 %vm850_vm15, %v6974_v13  ;;  %6002 = vmatpush.msk.msra.mxu0 %vm306_vm2, %v6974_v13  ;;  %vm1109_vm15 = vcmp.eq.s32.totalorder %v7106_v17, %v7760_v44  ;;  %vm565_vm2 = vcmp.eq.s32.totalorder %v7121_v18, %v7760_v44 }
  0x7a   : > { %6086 = vmatpush.msk.msrb.mxu2 %vm693_vm0, %v6974_v13  ;;  %6102 = vmatpush.msk.msrb.mxu3 %vm1205_vm1, %v6974_v13  ;;  %vm692_vm0 = vcmp.eq.s32.totalorder %v7052_v8, %v7813_v45  ;;  %vm1204_vm1 = vcmp.eq.s32.totalorder %v7055_v9, %v7813_v45 }
  0x7b   : > { %6018 = vmatpush.msk.msra.mxu1 %vm818_vm3, %v6974_v13  ;;  %6003 = vmatpush.msk.msra.mxu0 %vm274_vm6, %v6974_v13  ;;  %vm1077_vm3 = vcmp.eq.s32.totalorder %v7124_v19, %v7760_v44  ;;  %vm533_vm6 = vcmp.eq.s32.totalorder %v7145_v20, %v7760_v44 }
  0x7c   : > { %6087 = vmatpush.msk.msrb.mxu2 %vm661_vm4, %v6974_v13  ;;  %6103 = vmatpush.msk.msrb.mxu3 %vm1173_vm5, %v6974_v13  ;;  %vm660_vm4 = vcmp.eq.s32.totalorder %v7061_v11, %v7813_v45  ;;  %vm1172_vm5 = vcmp.eq.s32.totalorder %v7064_v12, %v7813_v45 }
  0x7d   : > { %6019 = vmatpush.msk.msra.mxu1 %vm786_vm7, %v6974_v13  ;;  %3444 = vmatmul.f32.vlgmr.msrb.gmra.mxu0 %v7564_v41  ;;  %vm1045_vm7 = vcmp.eq.s32.totalorder %v7148_v21, %v7760_v44 }
  0x7e   : > { %3464 = vmatmul.f32.vlgmr.msrb.gmra.mxu1 %v7566_v42  ;;  %6052 = vmatpush.msk.msrb.mxu0 %vm756_vm8, %v6974_v13  ;;  %vm628_vm8 = vcmp.eq.s32.totalorder %v7077_v14, %v7813_v45 }
  0x7f   : > { %6068 = vmatpush.msk.msrb.mxu1 %vm1268_vm9, %v6974_v13  ;;  %6088 = vmatpush.msk.msrb.mxu2 %vm629_vm10, %v6974_v13  ;;  %vm1140_vm9 = vcmp.eq.s32.totalorder %v7080_v15, %v7813_v45  ;;  %vm501_vm10 = vcmp.eq.s32.totalorder %v7169_v22, %v7760_v44 }
  0x80   : > { %6104 = vmatpush.msk.msrb.mxu3 %vm1141_vm11, %v6974_v13  ;;  %6053 = vmatpush.msk.msrb.mxu0 %vm724_vm12, %v6974_v13  ;;  %vm1013_vm11 = vcmp.eq.s32.totalorder %v7172_v23, %v7760_v44  ;;  %vm596_vm12 = vcmp.eq.s32.totalorder %v7103_v16, %v7813_v45 }
  0x81   : > { %6069 = vmatpush.msk.msrb.mxu1 %vm1236_vm13, %v6974_v13  ;;  %6089 = vmatpush.msk.msrb.mxu2 %vm597_vm14, %v6974_v13  ;;  %vm1108_vm13 = vcmp.eq.s32.totalorder %v7106_v17, %v7813_v45  ;;  %vm469_vm14 = vcmp.eq.s32.totalorder %v7193_v24, %v7760_v44 }
  0x82   : > { %6105 = vmatpush.msk.msrb.mxu3 %vm1109_vm15, %v6974_v13  ;;  %6054 = vmatpush.msk.msrb.mxu0 %vm692_vm0, %v6974_v13  ;;  %vm981_vm15 = vcmp.eq.s32.totalorder %v7196_v25, %v7760_v44  ;;  %vm564_vm0 = vcmp.eq.s32.totalorder %v7121_v18, %v7813_v45 }
  0x83   : > { %6070 = vmatpush.msk.msrb.mxu1 %vm1204_vm1, %v6974_v13  ;;  %6090 = vmatpush.msk.msrb.mxu2 %vm565_vm2, %v6974_v13  ;;  %vm1076_vm1 = vcmp.eq.s32.totalorder %v7124_v19, %v7813_v45  ;;  %vm437_vm2 = vcmp.eq.s32.totalorder %v7217_v26, %v7760_v44 }
  0x84   : > { %6106 = vmatpush.msk.msrb.mxu3 %vm1077_vm3, %v6974_v13  ;;  %6055 = vmatpush.msk.msrb.mxu0 %vm660_vm4, %v6974_v13  ;;  %vm949_vm3 = vcmp.eq.s32.totalorder %v7220_v27, %v7760_v44  ;;  %vm532_vm4 = vcmp.eq.s32.totalorder %v7145_v20, %v7813_v45 }
  0x85   : > { %6071 = vmatpush.msk.msrb.mxu1 %vm1172_vm5, %v6974_v13  ;;  %6091 = vmatpush.msk.msrb.mxu2 %vm533_vm6, %v6974_v13  ;;  %vm1044_vm5 = vcmp.eq.s32.totalorder %v7148_v21, %v7813_v45  ;;  %vm405_vm6 = vcmp.eq.s32.totalorder %v7241_v28, %v7760_v44 }
  0x86   : > { %6107 = vmatpush.msk.msrb.mxu3 %vm1045_vm7, %v6974_v13  ;;  %6056 = vmatpush.msk.msrb.mxu0 %vm628_vm8, %v6974_v13  ;;  %vm917_vm7 = vcmp.eq.s32.totalorder %v7244_v29, %v7760_v44  ;;  %vm500_vm8 = vcmp.eq.s32.totalorder %v7169_v22, %v7813_v45 }
  0x87   : > { %6072 = vmatpush.msk.msrb.mxu1 %vm1140_vm9, %v6974_v13  ;;  %6092 = vmatpush.msk.msrb.mxu2 %vm501_vm10, %v6974_v13  ;;  %vm1012_vm9 = vcmp.eq.s32.totalorder %v7172_v23, %v7813_v45  ;;  %vm373_vm10 = vcmp.eq.s32.totalorder %v7266_v30, %v7760_v44 }
  0x88   : > { %6108 = vmatpush.msk.msrb.mxu3 %vm1013_vm11, %v6974_v13  ;;  %6057 = vmatpush.msk.msrb.mxu0 %vm596_vm12, %v6974_v13  ;;  %vm885_vm11 = vcmp.eq.s32.totalorder %v7269_v31, %v7760_v44  ;;  %vm468_vm12 = vcmp.eq.s32.totalorder %v7193_v24, %v7813_v45 }
  0x89   : > { %6073 = vmatpush.msk.msrb.mxu1 %vm1108_vm13, %v6974_v13  ;;  %6093 = vmatpush.msk.msrb.mxu2 %vm469_vm14, %v6974_v13  ;;  %vm980_vm13 = vcmp.eq.s32.totalorder %v7196_v25, %v7813_v45  ;;  %vm341_vm14 = vcmp.eq.s32.totalorder %v7293_v32, %v7760_v44 }
  0x8a   : > { %6109 = vmatpush.msk.msrb.mxu3 %vm981_vm15, %v6974_v13  ;;  %6058 = vmatpush.msk.msrb.mxu0 %vm564_vm0, %v6974_v13  ;;  %vm853_vm15 = vcmp.eq.s32.totalorder %v7296_v33, %v7760_v44  ;;  %vm436_vm0 = vcmp.eq.s32.totalorder %v7217_v26, %v7813_v45 }
  0x8b   : > { %6074 = vmatpush.msk.msrb.mxu1 %vm1076_vm1, %v6974_v13  ;;  %6094 = vmatpush.msk.msrb.mxu2 %vm437_vm2, %v6974_v13  ;;  %vm948_vm1 = vcmp.eq.s32.totalorder %v7220_v27, %v7813_v45  ;;  %vm309_vm2 = vcmp.eq.s32.totalorder %v7317_v34, %v7760_v44 }
  0x8c   : > { %6110 = vmatpush.msk.msrb.mxu3 %vm949_vm3, %v6974_v13  ;;  %6059 = vmatpush.msk.msrb.mxu0 %vm532_vm4, %v6974_v13  ;;  %vm821_vm3 = vcmp.eq.s32.totalorder %v7320_v35, %v7760_v44  ;;  %vm404_vm4 = vcmp.eq.s32.totalorder %v7241_v28, %v7813_v45 }
  0x8d   : > { %6075 = vmatpush.msk.msrb.mxu1 %vm1044_vm5, %v6974_v13  ;;  %6095 = vmatpush.msk.msrb.mxu2 %vm405_vm6, %v6974_v13  ;;  %vm916_vm5 = vcmp.eq.s32.totalorder %v7244_v29, %v7813_v45  ;;  %vm277_vm6 = vcmp.eq.s32.totalorder %v7022_v1, %v7760_v44 }
  0x8e   : > { %6111 = vmatpush.msk.msrb.mxu3 %vm917_vm7, %v6974_v13  ;;  %6060 = vmatpush.msk.msrb.mxu0 %vm500_vm8, %v6974_v13  ;;  %vm789_vm7 = vcmp.eq.s32.totalorder %v7347_v37, %v7760_v44  ;;  %vm759_vm8 = vcmp.eq.s32.totalorder %v7034_v2, %v7965_v47 }
  0x8f   : > { %6076 = vmatpush.msk.msrb.mxu1 %vm1012_vm9, %v6974_v13  ;;  %6096 = vmatpush.msk.msrb.mxu2 %vm373_vm10, %v6974_v13  ;;  %vm1271_vm9 = vcmp.eq.s32.totalorder %v7037_v3, %v7965_v47  ;;  %vm372_vm10 = vcmp.eq.s32.totalorder %v7266_v30, %v7813_v45 }
  0x90   : > { %6112 = vmatpush.msk.msrb.mxu3 %vm885_vm11, %v6974_v13  ;;  %6061 = vmatpush.msk.msrb.mxu0 %vm468_vm12, %v6974_v13  ;;  %vm884_vm11 = vcmp.eq.s32.totalorder %v7269_v31, %v7813_v45  ;;  %vm727_vm12 = vcmp.eq.s32.totalorder %v7040_v4, %v7965_v47 }
  0x91   : > { %6077 = vmatpush.msk.msrb.mxu1 %vm980_vm13, %v6974_v13  ;;  %6097 = vmatpush.msk.msrb.mxu2 %vm341_vm14, %v6974_v13  ;;  %vm1239_vm13 = vcmp.eq.s32.totalorder %v7043_v5, %v7965_v47  ;;  %vm340_vm14 = vcmp.eq.s32.totalorder %v7293_v32, %v7813_v45 }
  0x92   : > { %6113 = vmatpush.msk.msrb.mxu3 %vm853_vm15, %v6974_v13  ;;  %6062 = vmatpush.msk.msrb.mxu0 %vm436_vm0, %v6974_v13  ;;  %vm852_vm15 = vcmp.eq.s32.totalorder %v7296_v33, %v7813_v45  ;;  %vm695_vm0 = vcmp.eq.s32.totalorder %v7052_v8, %v7965_v47 }
  0x93   : > { %6078 = vmatpush.msk.msrb.mxu1 %vm948_vm1, %v6974_v13  ;;  %6098 = vmatpush.msk.msrb.mxu2 %vm309_vm2, %v6974_v13  ;;  %vm1207_vm1 = vcmp.eq.s32.totalorder %v7055_v9, %v7965_v47  ;;  %vm308_vm2 = vcmp.eq.s32.totalorder %v7317_v34, %v7813_v45 }
  0x94   : > { %6114 = vmatpush.msk.msrb.mxu3 %vm821_vm3, %v6974_v13  ;;  %6063 = vmatpush.msk.msrb.mxu0 %vm404_vm4, %v6974_v13  ;;  %vm820_vm3 = vcmp.eq.s32.totalorder %v7320_v35, %v7813_v45  ;;  %vm663_vm4 = vcmp.eq.s32.totalorder %v7061_v11, %v7965_v47 }
  0x95   : > { %6079 = vmatpush.msk.msrb.mxu1 %vm916_vm5, %v6974_v13  ;;  %6099 = vmatpush.msk.msrb.mxu2 %vm277_vm6, %v6974_v13  ;;  %vm1175_vm5 = vcmp.eq.s32.totalorder %v7064_v12, %v7965_v47  ;;  %vm276_vm6 = vcmp.eq.s32.totalorder %v7022_v1, %v7813_v45 }
  0x96   : > { %6115 = vmatpush.msk.msrb.mxu3 %vm789_vm7, %v6974_v13  ;;  %3564 = vmatmul.f32.vlgmr.msra.gmra.mxu2 %v7564_v41  ;;  %vm788_vm7 = vcmp.eq.s32.totalorder %v7347_v37, %v7813_v45 }
  0x97   : > { %3584 = vmatmul.f32.vlgmr.msra.gmra.mxu3 %v7566_v42  ;;  %6148 = vmatpush.msk.msra.mxu2 %vm759_vm8, %v6974_v13  ;;  %vm758_vm8 = vcmp.eq.s32.totalorder %v7034_v2, %v8018_v48 }
  0x98   : > { %6164 = vmatpush.msk.msra.mxu3 %vm1271_vm9, %v6974_v13  ;;  %6064 = vmatpush.msk.msrb.mxu0 %vm372_vm10, %v6974_v13  ;;  %vm1270_vm9 = vcmp.eq.s32.totalorder %v7037_v3, %v8018_v48  ;;  %vm631_vm10 = vcmp.eq.s32.totalorder %v7077_v14, %v7965_v47 }
  0x99   : > { %6080 = vmatpush.msk.msrb.mxu1 %vm884_vm11, %v6974_v13  ;;  %6149 = vmatpush.msk.msra.mxu2 %vm727_vm12, %v6974_v13  ;;  %vm1143_vm11 = vcmp.eq.s32.totalorder %v7080_v15, %v7965_v47  ;;  %vm726_vm12 = vcmp.eq.s32.totalorder %v7040_v4, %v8018_v48 }
  0x9a   : > { %6165 = vmatpush.msk.msra.mxu3 %vm1239_vm13, %v6974_v13  ;;  %6065 = vmatpush.msk.msrb.mxu0 %vm340_vm14, %v6974_v13  ;;  %vm1238_vm13 = vcmp.eq.s32.totalorder %v7043_v5, %v8018_v48  ;;  %vm599_vm14 = vcmp.eq.s32.totalorder %v7103_v16, %v7965_v47 }
  0x9b   : > { %6081 = vmatpush.msk.msrb.mxu1 %vm852_vm15, %v6974_v13  ;;  %6150 = vmatpush.msk.msra.mxu2 %vm695_vm0, %v6974_v13  ;;  %vm1111_vm15 = vcmp.eq.s32.totalorder %v7106_v17, %v7965_v47  ;;  %vm694_vm0 = vcmp.eq.s32.totalorder %v7052_v8, %v8018_v48 }
  0x9c   : > { %6166 = vmatpush.msk.msra.mxu3 %vm1207_vm1, %v6974_v13  ;;  %6066 = vmatpush.msk.msrb.mxu0 %vm308_vm2, %v6974_v13  ;;  %vm1206_vm1 = vcmp.eq.s32.totalorder %v7055_v9, %v8018_v48  ;;  %vm567_vm2 = vcmp.eq.s32.totalorder %v7121_v18, %v7965_v47 }
  0x9d   : > { %6082 = vmatpush.msk.msrb.mxu1 %vm820_vm3, %v6974_v13  ;;  %6151 = vmatpush.msk.msra.mxu2 %vm663_vm4, %v6974_v13  ;;  %vm1079_vm3 = vcmp.eq.s32.totalorder %v7124_v19, %v7965_v47  ;;  %vm662_vm4 = vcmp.eq.s32.totalorder %v7061_v11, %v8018_v48 }
  0x9e   : > { %6167 = vmatpush.msk.msra.mxu3 %vm1175_vm5, %v6974_v13  ;;  %6067 = vmatpush.msk.msrb.mxu0 %vm276_vm6, %v6974_v13  ;;  %vm1174_vm5 = vcmp.eq.s32.totalorder %v7064_v12, %v8018_v48  ;;  %vm535_vm6 = vcmp.eq.s32.totalorder %v7145_v20, %v7965_v47 }
  0x9f   : > { %6083 = vmatpush.msk.msrb.mxu1 %vm788_vm7, %v6974_v13  ;;  %3524 = vmatmul.f32.vlgmr.msra.gmra.mxu0 %v7564_v41  ;;  %vm1047_vm7 = vcmp.eq.s32.totalorder %v7148_v21, %v7965_v47 }
  0xa0   : > { %3544 = vmatmul.f32.vlgmr.msra.gmra.mxu1 %v7566_v42  ;;  %6116 = vmatpush.msk.msra.mxu0 %vm758_vm8, %v6974_v13  ;;  %vm630_vm8 = vcmp.eq.s32.totalorder %v7077_v14, %v8018_v48 }
  0xa1   : > { %6132 = vmatpush.msk.msra.mxu1 %vm1270_vm9, %v6974_v13  ;;  %6152 = vmatpush.msk.msra.mxu2 %vm631_vm10, %v6974_v13  ;;  %vm1142_vm9 = vcmp.eq.s32.totalorder %v7080_v15, %v8018_v48  ;;  %vm503_vm10 = vcmp.eq.s32.totalorder %v7169_v22, %v7965_v47 }
  0xa2   : > { %6168 = vmatpush.msk.msra.mxu3 %vm1143_vm11, %v6974_v13  ;;  %6117 = vmatpush.msk.msra.mxu0 %vm726_vm12, %v6974_v13  ;;  %vm1015_vm11 = vcmp.eq.s32.totalorder %v7172_v23, %v7965_v47  ;;  %vm598_vm12 = vcmp.eq.s32.totalorder %v7103_v16, %v8018_v48 }
  0xa3   : > { %6133 = vmatpush.msk.msra.mxu1 %vm1238_vm13, %v6974_v13  ;;  %6153 = vmatpush.msk.msra.mxu2 %vm599_vm14, %v6974_v13  ;;  %vm1110_vm13 = vcmp.eq.s32.totalorder %v7106_v17, %v8018_v48  ;;  %vm471_vm14 = vcmp.eq.s32.totalorder %v7193_v24, %v7965_v47 }
  0xa4   : > { %6169 = vmatpush.msk.msra.mxu3 %vm1111_vm15, %v6974_v13  ;;  %6118 = vmatpush.msk.msra.mxu0 %vm694_vm0, %v6974_v13  ;;  %vm983_vm15 = vcmp.eq.s32.totalorder %v7196_v25, %v7965_v47  ;;  %vm566_vm0 = vcmp.eq.s32.totalorder %v7121_v18, %v8018_v48 }
  0xa5   : > { %6134 = vmatpush.msk.msra.mxu1 %vm1206_vm1, %v6974_v13  ;;  %6154 = vmatpush.msk.msra.mxu2 %vm567_vm2, %v6974_v13  ;;  %vm1078_vm1 = vcmp.eq.s32.totalorder %v7124_v19, %v8018_v48  ;;  %vm439_vm2 = vcmp.eq.s32.totalorder %v7217_v26, %v7965_v47 }
  0xa6   : > { %6170 = vmatpush.msk.msra.mxu3 %vm1079_vm3, %v6974_v13  ;;  %6119 = vmatpush.msk.msra.mxu0 %vm662_vm4, %v6974_v13  ;;  %vm951_vm3 = vcmp.eq.s32.totalorder %v7220_v27, %v7965_v47  ;;  %vm534_vm4 = vcmp.eq.s32.totalorder %v7145_v20, %v8018_v48 }
  0xa7   : > { %6135 = vmatpush.msk.msra.mxu1 %vm1174_vm5, %v6974_v13  ;;  %6155 = vmatpush.msk.msra.mxu2 %vm535_vm6, %v6974_v13  ;;  %vm1046_vm5 = vcmp.eq.s32.totalorder %v7148_v21, %v8018_v48  ;;  %vm407_vm6 = vcmp.eq.s32.totalorder %v7241_v28, %v7965_v47 }
  0xa8   : > { %6171 = vmatpush.msk.msra.mxu3 %vm1047_vm7, %v6974_v13  ;;  %6120 = vmatpush.msk.msra.mxu0 %vm630_vm8, %v6974_v13  ;;  %vm919_vm7 = vcmp.eq.s32.totalorder %v7244_v29, %v7965_v47  ;;  %vm502_vm8 = vcmp.eq.s32.totalorder %v7169_v22, %v8018_v48 }
  0xa9   : > { %6136 = vmatpush.msk.msra.mxu1 %vm1142_vm9, %v6974_v13  ;;  %6156 = vmatpush.msk.msra.mxu2 %vm503_vm10, %v6974_v13  ;;  %vm1014_vm9 = vcmp.eq.s32.totalorder %v7172_v23, %v8018_v48  ;;  %vm375_vm10 = vcmp.eq.s32.totalorder %v7266_v30, %v7965_v47 }
  0xaa   : > { %6172 = vmatpush.msk.msra.mxu3 %vm1015_vm11, %v6974_v13  ;;  %6121 = vmatpush.msk.msra.mxu0 %vm598_vm12, %v6974_v13  ;;  %vm887_vm11 = vcmp.eq.s32.totalorder %v7269_v31, %v7965_v47  ;;  %vm470_vm12 = vcmp.eq.s32.totalorder %v7193_v24, %v8018_v48 }
  0xab   : > { %6137 = vmatpush.msk.msra.mxu1 %vm1110_vm13, %v6974_v13  ;;  %6157 = vmatpush.msk.msra.mxu2 %vm471_vm14, %v6974_v13  ;;  %vm982_vm13 = vcmp.eq.s32.totalorder %v7196_v25, %v8018_v48  ;;  %vm343_vm14 = vcmp.eq.s32.totalorder %v7293_v32, %v7965_v47 }
  0xac   : > { %6173 = vmatpush.msk.msra.mxu3 %vm983_vm15, %v6974_v13  ;;  %6122 = vmatpush.msk.msra.mxu0 %vm566_vm0, %v6974_v13  ;;  %vm855_vm15 = vcmp.eq.s32.totalorder %v7296_v33, %v7965_v47  ;;  %vm438_vm0 = vcmp.eq.s32.totalorder %v7217_v26, %v8018_v48 }
  0xad   : > { %6138 = vmatpush.msk.msra.mxu1 %vm1078_vm1, %v6974_v13  ;;  %6158 = vmatpush.msk.msra.mxu2 %vm439_vm2, %v6974_v13  ;;  %vm950_vm1 = vcmp.eq.s32.totalorder %v7220_v27, %v8018_v48  ;;  %vm311_vm2 = vcmp.eq.s32.totalorder %v7317_v34, %v7965_v47 }
  0xae   : > { %6174 = vmatpush.msk.msra.mxu3 %vm951_vm3, %v6974_v13  ;;  %6123 = vmatpush.msk.msra.mxu0 %vm534_vm4, %v6974_v13  ;;  %vm823_vm3 = vcmp.eq.s32.totalorder %v7320_v35, %v7965_v47  ;;  %vm406_vm4 = vcmp.eq.s32.totalorder %v7241_v28, %v8018_v48 }
  0xaf   : > { %6139 = vmatpush.msk.msra.mxu1 %vm1046_vm5, %v6974_v13  ;;  %6159 = vmatpush.msk.msra.mxu2 %vm407_vm6, %v6974_v13  ;;  %vm918_vm5 = vcmp.eq.s32.totalorder %v7244_v29, %v8018_v48  ;;  %vm279_vm6 = vcmp.eq.s32.totalorder %v7022_v1, %v7965_v47 }
  0xb0   : > { %6175 = vmatpush.msk.msra.mxu3 %vm919_vm7, %v6974_v13  ;;  %6124 = vmatpush.msk.msra.mxu0 %vm502_vm8, %v6974_v13  ;;  %vm791_vm7 = vcmp.eq.s32.totalorder %v7347_v37, %v7965_v47  ;;  %vm761_vm8 = vcmp.eq.s32.totalorder %v7034_v2, %v8167_v49 }
  0xb1   : > { %6140 = vmatpush.msk.msra.mxu1 %vm1014_vm9, %v6974_v13  ;;  %6160 = vmatpush.msk.msra.mxu2 %vm375_vm10, %v6974_v13  ;;  %vm1273_vm9 = vcmp.eq.s32.totalorder %v7037_v3, %v8167_v49  ;;  %vm374_vm10 = vcmp.eq.s32.totalorder %v7266_v30, %v8018_v48 }
  0xb2   : > { %6176 = vmatpush.msk.msra.mxu3 %vm887_vm11, %v6974_v13  ;;  %6125 = vmatpush.msk.msra.mxu0 %vm470_vm12, %v6974_v13  ;;  %vm886_vm11 = vcmp.eq.s32.totalorder %v7269_v31, %v8018_v48  ;;  %vm729_vm12 = vcmp.eq.s32.totalorder %v7040_v4, %v8167_v49 }
  0xb3   : > { %6141 = vmatpush.msk.msra.mxu1 %vm982_vm13, %v6974_v13  ;;  %6161 = vmatpush.msk.msra.mxu2 %vm343_vm14, %v6974_v13  ;;  %vm1241_vm13 = vcmp.eq.s32.totalorder %v7043_v5, %v8167_v49  ;;  %vm342_vm14 = vcmp.eq.s32.totalorder %v7293_v32, %v8018_v48 }
  0xb4   : > { %6177 = vmatpush.msk.msra.mxu3 %vm855_vm15, %v6974_v13  ;;  %6126 = vmatpush.msk.msra.mxu0 %vm438_vm0, %v6974_v13  ;;  %vm854_vm15 = vcmp.eq.s32.totalorder %v7296_v33, %v8018_v48  ;;  %vm697_vm0 = vcmp.eq.s32.totalorder %v7052_v8, %v8167_v49 }
  0xb5   : > { %6142 = vmatpush.msk.msra.mxu1 %vm950_vm1, %v6974_v13  ;;  %6162 = vmatpush.msk.msra.mxu2 %vm311_vm2, %v6974_v13  ;;  %vm1209_vm1 = vcmp.eq.s32.totalorder %v7055_v9, %v8167_v49  ;;  %vm310_vm2 = vcmp.eq.s32.totalorder %v7317_v34, %v8018_v48 }
  0xb6   : > { %6178 = vmatpush.msk.msra.mxu3 %vm823_vm3, %v6974_v13  ;;  %6127 = vmatpush.msk.msra.mxu0 %vm406_vm4, %v6974_v13  ;;  %vm822_vm3 = vcmp.eq.s32.totalorder %v7320_v35, %v8018_v48  ;;  %vm665_vm4 = vcmp.eq.s32.totalorder %v7061_v11, %v8167_v49 }
  0xb7   : > { %6143 = vmatpush.msk.msra.mxu1 %vm918_vm5, %v6974_v13  ;;  %6163 = vmatpush.msk.msra.mxu2 %vm279_vm6, %v6974_v13  ;;  %vm1177_vm5 = vcmp.eq.s32.totalorder %v7064_v12, %v8167_v49  ;;  %vm278_vm6 = vcmp.eq.s32.totalorder %v7022_v1, %v8018_v48 }
  0xb8   : > { %6179 = vmatpush.msk.msra.mxu3 %vm791_vm7, %v6974_v13  ;;  %3644 = vmatmul.f32.vlgmr.msrb.gmra.mxu2 %v7564_v41  ;;  %vm790_vm7 = vcmp.eq.s32.totalorder %v7347_v37, %v8018_v48 }
  0xb9   : > { %3664 = vmatmul.f32.vlgmr.msrb.gmra.mxu3 %v7566_v42  ;;  %6212 = vmatpush.msk.msrb.mxu2 %vm761_vm8, %v6974_v13  ;;  %vm760_vm8 = vcmp.eq.s32.totalorder %v7034_v2, %v8220_v50 }
  0xba   : > { %6228 = vmatpush.msk.msrb.mxu3 %vm1273_vm9, %v6974_v13  ;;  %6128 = vmatpush.msk.msra.mxu0 %vm374_vm10, %v6974_v13  ;;  %vm1272_vm9 = vcmp.eq.s32.totalorder %v7037_v3, %v8220_v50  ;;  %vm633_vm10 = vcmp.eq.s32.totalorder %v7077_v14, %v8167_v49 }
  0xbb   : > { %6144 = vmatpush.msk.msra.mxu1 %vm886_vm11, %v6974_v13  ;;  %6213 = vmatpush.msk.msrb.mxu2 %vm729_vm12, %v6974_v13  ;;  %vm1145_vm11 = vcmp.eq.s32.totalorder %v7080_v15, %v8167_v49  ;;  %vm728_vm12 = vcmp.eq.s32.totalorder %v7040_v4, %v8220_v50 }
  0xbc   : > { %6229 = vmatpush.msk.msrb.mxu3 %vm1241_vm13, %v6974_v13  ;;  %6129 = vmatpush.msk.msra.mxu0 %vm342_vm14, %v6974_v13  ;;  %vm1240_vm13 = vcmp.eq.s32.totalorder %v7043_v5, %v8220_v50  ;;  %vm601_vm14 = vcmp.eq.s32.totalorder %v7103_v16, %v8167_v49 }
  0xbd   : > { %6145 = vmatpush.msk.msra.mxu1 %vm854_vm15, %v6974_v13  ;;  %6214 = vmatpush.msk.msrb.mxu2 %vm697_vm0, %v6974_v13  ;;  %vm1113_vm15 = vcmp.eq.s32.totalorder %v7106_v17, %v8167_v49  ;;  %vm696_vm0 = vcmp.eq.s32.totalorder %v7052_v8, %v8220_v50 }
  0xbe   : > { %6230 = vmatpush.msk.msrb.mxu3 %vm1209_vm1, %v6974_v13  ;;  %6130 = vmatpush.msk.msra.mxu0 %vm310_vm2, %v6974_v13  ;;  %vm1208_vm1 = vcmp.eq.s32.totalorder %v7055_v9, %v8220_v50  ;;  %vm569_vm2 = vcmp.eq.s32.totalorder %v7121_v18, %v8167_v49 }
  0xbf   : > { %6146 = vmatpush.msk.msra.mxu1 %vm822_vm3, %v6974_v13  ;;  %6215 = vmatpush.msk.msrb.mxu2 %vm665_vm4, %v6974_v13  ;;  %vm1081_vm3 = vcmp.eq.s32.totalorder %v7124_v19, %v8167_v49  ;;  %vm664_vm4 = vcmp.eq.s32.totalorder %v7061_v11, %v8220_v50 }
  0xc0   : > { %6231 = vmatpush.msk.msrb.mxu3 %vm1177_vm5, %v6974_v13  ;;  %6131 = vmatpush.msk.msra.mxu0 %vm278_vm6, %v6974_v13  ;;  %vm1176_vm5 = vcmp.eq.s32.totalorder %v7064_v12, %v8220_v50  ;;  %vm537_vm6 = vcmp.eq.s32.totalorder %v7145_v20, %v8167_v49 }
  0xc1   : > { %6147 = vmatpush.msk.msra.mxu1 %vm790_vm7, %v6974_v13  ;;  %3604 = vmatmul.f32.vlgmr.msrb.gmra.mxu0 %v7564_v41  ;;  %vm1049_vm7 = vcmp.eq.s32.totalorder %v7148_v21, %v8167_v49  ;;  %v8644_v41 = vperm.slane %v7944_v46, 6 }
  0xc2   : > { %3624 = vmatmul.f32.vlgmr.msrb.gmra.mxu1 %v7566_v42  ;;  %6180 = vmatpush.msk.msrb.mxu0 %vm760_vm8, %v6974_v13  ;;  %vm632_vm8 = vcmp.eq.s32.totalorder %v7077_v14, %v8220_v50  ;;  %v8775_v42 = vld [vmem:[%s7031_s21 + $0x10] sm:$0xff] }
  0xc3   : > { %6196 = vmatpush.msk.msrb.mxu1 %vm1272_vm9, %v6974_v13  ;;  %6216 = vmatpush.msk.msrb.mxu2 %vm633_vm10, %v6974_v13  ;;  %vm1144_vm9 = vcmp.eq.s32.totalorder %v7080_v15, %v8220_v50  ;;  %vm505_vm10 = vcmp.eq.s32.totalorder %v7169_v22, %v8167_v49  ;;  %v8796_v43 = vperm.slane %v8775_v42, 1 }
  0xc4   : > { %6232 = vmatpush.msk.msrb.mxu3 %vm1145_vm11, %v6974_v13  ;;  %6181 = vmatpush.msk.msrb.mxu0 %vm728_vm12, %v6974_v13  ;;  %vm1017_vm11 = vcmp.eq.s32.totalorder %v7172_v23, %v8167_v49  ;;  %vm600_vm12 = vcmp.eq.s32.totalorder %v7103_v16, %v8220_v50 }
  0xc5   : > { %6197 = vmatpush.msk.msrb.mxu1 %vm1240_vm13, %v6974_v13  ;;  %6217 = vmatpush.msk.msrb.mxu2 %vm601_vm14, %v6974_v13  ;;  %vm1112_vm13 = vcmp.eq.s32.totalorder %v7106_v17, %v8220_v50  ;;  %vm473_vm14 = vcmp.eq.s32.totalorder %v7193_v24, %v8167_v49 }
  0xc6   : > { %6233 = vmatpush.msk.msrb.mxu3 %vm1113_vm15, %v6974_v13  ;;  %6182 = vmatpush.msk.msrb.mxu0 %vm696_vm0, %v6974_v13  ;;  %vm985_vm15 = vcmp.eq.s32.totalorder %v7196_v25, %v8167_v49  ;;  %vm568_vm0 = vcmp.eq.s32.totalorder %v7121_v18, %v8220_v50 }
  0xc7   : > { %6198 = vmatpush.msk.msrb.mxu1 %vm1208_vm1, %v6974_v13  ;;  %6218 = vmatpush.msk.msrb.mxu2 %vm569_vm2, %v6974_v13  ;;  %vm1080_vm1 = vcmp.eq.s32.totalorder %v7124_v19, %v8220_v50  ;;  %vm441_vm2 = vcmp.eq.s32.totalorder %v7217_v26, %v8167_v49 }
  0xc8   : > { %6234 = vmatpush.msk.msrb.mxu3 %vm1081_vm3, %v6974_v13  ;;  %6183 = vmatpush.msk.msrb.mxu0 %vm664_vm4, %v6974_v13  ;;  %vm953_vm3 = vcmp.eq.s32.totalorder %v7220_v27, %v8167_v49  ;;  %vm536_vm4 = vcmp.eq.s32.totalorder %v7145_v20, %v8220_v50 }
  0xc9   : > { %6199 = vmatpush.msk.msrb.mxu1 %vm1176_vm5, %v6974_v13  ;;  %6219 = vmatpush.msk.msrb.mxu2 %vm537_vm6, %v6974_v13  ;;  %vm1048_vm5 = vcmp.eq.s32.totalorder %v7148_v21, %v8220_v50  ;;  %vm409_vm6 = vcmp.eq.s32.totalorder %v7241_v28, %v8167_v49 }
  0xca   : > { %6235 = vmatpush.msk.msrb.mxu3 %vm1049_vm7, %v6974_v13  ;;  %6184 = vmatpush.msk.msrb.mxu0 %vm632_vm8, %v6974_v13  ;;  %vm921_vm7 = vcmp.eq.s32.totalorder %v7244_v29, %v8167_v49  ;;  %vm504_vm8 = vcmp.eq.s32.totalorder %v7169_v22, %v8220_v50 }
  0xcb   : > { %6200 = vmatpush.msk.msrb.mxu1 %vm1144_vm9, %v6974_v13  ;;  %6220 = vmatpush.msk.msrb.mxu2 %vm505_vm10, %v6974_v13  ;;  %vm1016_vm9 = vcmp.eq.s32.totalorder %v7172_v23, %v8220_v50  ;;  %vm377_vm10 = vcmp.eq.s32.totalorder %v7266_v30, %v8167_v49 }
  0xcc   : > { %6236 = vmatpush.msk.msrb.mxu3 %vm1017_vm11, %v6974_v13  ;;  %6185 = vmatpush.msk.msrb.mxu0 %vm600_vm12, %v6974_v13  ;;  %vm889_vm11 = vcmp.eq.s32.totalorder %v7269_v31, %v8167_v49  ;;  %vm472_vm12 = vcmp.eq.s32.totalorder %v7193_v24, %v8220_v50 }
  0xcd   : > { %6201 = vmatpush.msk.msrb.mxu1 %vm1112_vm13, %v6974_v13  ;;  %6221 = vmatpush.msk.msrb.mxu2 %vm473_vm14, %v6974_v13  ;;  %vm984_vm13 = vcmp.eq.s32.totalorder %v7196_v25, %v8220_v50  ;;  %vm345_vm14 = vcmp.eq.s32.totalorder %v7293_v32, %v8167_v49 }
  0xce   : > { %6237 = vmatpush.msk.msrb.mxu3 %vm985_vm15, %v6974_v13  ;;  %6186 = vmatpush.msk.msrb.mxu0 %vm568_vm0, %v6974_v13  ;;  %vm857_vm15 = vcmp.eq.s32.totalorder %v7296_v33, %v8167_v49  ;;  %vm440_vm0 = vcmp.eq.s32.totalorder %v7217_v26, %v8220_v50 }
  0xcf   : > { %6202 = vmatpush.msk.msrb.mxu1 %vm1080_vm1, %v6974_v13  ;;  %6222 = vmatpush.msk.msrb.mxu2 %vm441_vm2, %v6974_v13  ;;  %vm952_vm1 = vcmp.eq.s32.totalorder %v7220_v27, %v8220_v50  ;;  %vm313_vm2 = vcmp.eq.s32.totalorder %v7317_v34, %v8167_v49 }
  0xd0   : > { %6238 = vmatpush.msk.msrb.mxu3 %vm953_vm3, %v6974_v13  ;;  %6187 = vmatpush.msk.msrb.mxu0 %vm536_vm4, %v6974_v13  ;;  %vm825_vm3 = vcmp.eq.s32.totalorder %v7320_v35, %v8167_v49  ;;  %vm408_vm4 = vcmp.eq.s32.totalorder %v7241_v28, %v8220_v50 }
  0xd1   : > { %6203 = vmatpush.msk.msrb.mxu1 %vm1048_vm5, %v6974_v13  ;;  %6223 = vmatpush.msk.msrb.mxu2 %vm409_vm6, %v6974_v13  ;;  %vm920_vm5 = vcmp.eq.s32.totalorder %v7244_v29, %v8220_v50  ;;  %vm281_vm6 = vcmp.eq.s32.totalorder %v7022_v1, %v8167_v49 }
  0xd2   : > { %6239 = vmatpush.msk.msrb.mxu3 %vm921_vm7, %v6974_v13  ;;  %6188 = vmatpush.msk.msrb.mxu0 %vm504_vm8, %v6974_v13  ;;  %v3405_v52 = vpop.f32.mrf.mxu2  ;;  %vm793_vm7 = vcmp.eq.s32.totalorder %v7347_v37, %v8167_v49  ;;  %vm763_vm8 = vcmp.eq.s32.totalorder %v7034_v2, %v8369_v51 }
  0xd3   : > { %6204 = vmatpush.msk.msrb.mxu1 %vm1016_vm9, %v6974_v13  ;;  %6224 = vmatpush.msk.msrb.mxu2 %vm377_vm10, %v6974_v13  ;;  %vm1275_vm9 = vcmp.eq.s32.totalorder %v7037_v3, %v8369_v51  ;;  %vm4676_vm10 = vcmask 1043456  }
  0xd4   : > { %6240 = vmatpush.msk.msrb.mxu3 %vm889_vm11, %v6974_v13  ;;  %6189 = vmatpush.msk.msrb.mxu0 %vm472_vm12, %v6974_v13  ;;  %v3425_v53 = vpop.f32.mrf.mxu3  ;;  %vm376_vm11 = vcmp.eq.s32.totalorder %v7266_v30, %v8220_v50  ;;  %vm888_vm12 = vcmp.eq.s32.totalorder %v7269_v31, %v8220_v50 }
  0xd5   : > { %6205 = vmatpush.msk.msrb.mxu1 %vm984_vm13, %v6974_v13  ;;  %6225 = vmatpush.msk.msrb.mxu2 %vm345_vm14, %v6974_v13  ;;  %v3426_v54 = vadd.f32 %v3425_v53, %v3405_v52  ;;  %vm731_vm13 = vcmp.eq.s32.totalorder %v7040_v4, %v8369_v51  ;;  %vm1243_vm14 = vcmp.eq.s32.totalorder %v7043_v5, %v8369_v51  ;;  %v8851_v52 = vperm.slane %v8775_v42, 0 }
  0xd6   : > { %6241 = vmatpush.msk.msrb.mxu3 %vm857_vm15, %v6974_v13  ;;  %6190 = vmatpush.msk.msrb.mxu0 %vm440_vm0, %v6974_v13  ;;  %v3365_v56 = vpop.f32.mrf.mxu0  ;;  %vm344_vm15 = vcmp.eq.s32.totalorder %v7293_v32, %v8220_v50  ;;  %vm856_vm0 = vcmp.eq.s32.totalorder %v7296_v33, %v8220_v50  ;;  %v9000_v53 = vperm.slane %v8775_v42, 3 }
  0xd7   : > { %6206 = vmatpush.msk.msrb.mxu1 %vm952_vm1, %v6974_v13  ;;  %6226 = vmatpush.msk.msrb.mxu2 %vm313_vm2, %v6974_v13  ;;  %v4660_v55 = vrot.slane %v3426_v54, 4  ;;  %vm699_vm1 = vcmp.eq.s32.totalorder %v7052_v8, %v8369_v51  ;;  %vm1211_vm2 = vcmp.eq.s32.totalorder %v7055_v9, %v8369_v51 }
  0xd8   : > { %6242 = vmatpush.msk.msrb.mxu3 %vm825_vm3, %v6974_v13  ;;  %6191 = vmatpush.msk.msrb.mxu0 %vm408_vm4, %v6974_v13  ;;  %v3385_v57 = vpop.f32.mrf.mxu1  ;;  %vm312_vm3 = vcmp.eq.s32.totalorder %v7317_v34, %v8220_v50  ;;  %vm824_vm4 = vcmp.eq.s32.totalorder %v7320_v35, %v8220_v50 }
  0xd9   : > { %6207 = vmatpush.msk.msrb.mxu1 %vm920_vm5, %v6974_v13  ;;  %6227 = vmatpush.msk.msrb.mxu2 %vm281_vm6, %v6974_v13  ;;  %v3386_v58 = vadd.f32 %v3385_v57, %v3365_v56  ;;  %vm667_vm5 = vcmp.eq.s32.totalorder %v7061_v11, %v8369_v51  ;;  %vm1179_vm6 = vcmp.eq.s32.totalorder %v7064_v12, %v8369_v51 }
  0xda   : > { %6243 = vmatpush.msk.msrb.mxu3 %vm793_vm7, %v6974_v13  ;;  %3724 = vmatmul.f32.vlgmr.msra.gmra.mxu2 %v8403_v59  ;;  %vm280_vm7 = vcmp.eq.s32.totalorder %v7022_v1, %v8220_v50 }
  0xdb   : > { %3744 = vmatmul.f32.vlgmr.msra.gmra.mxu3 %v8406_v60  ;;  %6276 = vmatpush.msk.msra.mxu2 %vm763_vm8, %v6974_v13  ;;  %v4677_v61 = vsel %vm4676_vm10, %v3386_v58, %v4660_v55  ;;  %vm792_vm8 = vcmp.eq.s32.totalorder %v7347_v37, %v8220_v50 }
  0xdc   : > { %6292 = vmatpush.msk.msra.mxu3 %vm1275_vm9, %v6974_v13  ;;  %6192 = vmatpush.msk.msrb.mxu0 %vm376_vm11, %v6974_v13  ;;  %4709 = vst [vmem:[%s8401_s29] sm:$0xff] %v4677_v61  ;;  %vm762_vm9 = vcmp.eq.s32.totalorder %v7034_v2, %v8440_v62  ;;  %vm1274_vm11 = vcmp.eq.s32.totalorder %v7037_v3, %v8440_v62 }
  0xdd   : > { %6208 = vmatpush.msk.msrb.mxu1 %vm888_vm12, %v6974_v13  ;;  %6277 = vmatpush.msk.msra.mxu2 %vm731_vm13, %v6974_v13  ;;  %vm635_vm12 = vcmp.eq.s32.totalorder %v7077_v14, %v8369_v51  ;;  %vm1147_vm13 = vcmp.eq.s32.totalorder %v7080_v15, %v8369_v51 }
  0xde   : > { %6293 = vmatpush.msk.msra.mxu3 %vm1243_vm14, %v6974_v13  ;;  %6193 = vmatpush.msk.msrb.mxu0 %vm344_vm15, %v6974_v13  ;;  %vm730_vm14 = vcmp.eq.s32.totalorder %v7040_v4, %v8440_v62  ;;  %vm1242_vm15 = vcmp.eq.s32.totalorder %v7043_v5, %v8440_v62 }
  0xdf   : > { %6209 = vmatpush.msk.msrb.mxu1 %vm856_vm0, %v6974_v13  ;;  %6278 = vmatpush.msk.msra.mxu2 %vm699_vm1, %v6974_v13  ;;  %vm603_vm0 = vcmp.eq.s32.totalorder %v7103_v16, %v8369_v51  ;;  %vm1115_vm1 = vcmp.eq.s32.totalorder %v7106_v17, %v8369_v51 }
  0xe0   : > { %6294 = vmatpush.msk.msra.mxu3 %vm1211_vm2, %v6974_v13  ;;  %6194 = vmatpush.msk.msrb.mxu0 %vm312_vm3, %v6974_v13  ;;  %vm698_vm2 = vcmp.eq.s32.totalorder %v7052_v8, %v8440_v62  ;;  %vm1210_vm3 = vcmp.eq.s32.totalorder %v7055_v9, %v8440_v62 }
  0xe1   : > { %6210 = vmatpush.msk.msrb.mxu1 %vm824_vm4, %v6974_v13  ;;  %6279 = vmatpush.msk.msra.mxu2 %vm667_vm5, %v6974_v13  ;;  %vm571_vm4 = vcmp.eq.s32.totalorder %v7121_v18, %v8369_v51  ;;  %vm1083_vm5 = vcmp.eq.s32.totalorder %v7124_v19, %v8369_v51 }
  0xe2   : > { %6295 = vmatpush.msk.msra.mxu3 %vm1179_vm6, %v6974_v13  ;;  %6195 = vmatpush.msk.msrb.mxu0 %vm280_vm7, %v6974_v13  ;;  %vm666_vm6 = vcmp.eq.s32.totalorder %v7061_v11, %v8440_v62  ;;  %vm1178_vm7 = vcmp.eq.s32.totalorder %v7064_v12, %v8440_v62 }
  0xe3   : > { %6211 = vmatpush.msk.msrb.mxu1 %vm792_vm8, %v6974_v13  ;;  %3684 = vmatmul.f32.vlgmr.msra.gmra.mxu0 %v8403_v59  ;;  %vm539_vm8 = vcmp.eq.s32.totalorder %v7145_v20, %v8369_v51 }
  0xe4   : > { %3704 = vmatmul.f32.vlgmr.msra.gmra.mxu1 %v8406_v60  ;;  %6244 = vmatpush.msk.msra.mxu0 %vm762_vm9, %v6974_v13  ;;  %vm1051_vm9 = vcmp.eq.s32.totalorder %v7148_v21, %v8369_v51 }
  0xe5   : > { %6260 = vmatpush.msk.msra.mxu1 %vm1274_vm11, %v6974_v13  ;;  %6280 = vmatpush.msk.msra.mxu2 %vm635_vm12, %v6974_v13  ;;  %vm634_vm11 = vcmp.eq.s32.totalorder %v7077_v14, %v8440_v62  ;;  %vm1146_vm12 = vcmp.eq.s32.totalorder %v7080_v15, %v8440_v62 }
  0xe6   : > { %6296 = vmatpush.msk.msra.mxu3 %vm1147_vm13, %v6974_v13  ;;  %6245 = vmatpush.msk.msra.mxu0 %vm730_vm14, %v6974_v13  ;;  %vm507_vm13 = vcmp.eq.s32.totalorder %v7169_v22, %v8369_v51  ;;  %vm1019_vm14 = vcmp.eq.s32.totalorder %v7172_v23, %v8369_v51 }
  0xe7   : > { %6261 = vmatpush.msk.msra.mxu1 %vm1242_vm15, %v6974_v13  ;;  %6281 = vmatpush.msk.msra.mxu2 %vm603_vm0, %v6974_v13  ;;  %vm602_vm15 = vcmp.eq.s32.totalorder %v7103_v16, %v8440_v62  ;;  %vm1114_vm0 = vcmp.eq.s32.totalorder %v7106_v17, %v8440_v62 }
  0xe8   : > { %6297 = vmatpush.msk.msra.mxu3 %vm1115_vm1, %v6974_v13  ;;  %6246 = vmatpush.msk.msra.mxu0 %vm698_vm2, %v6974_v13  ;;  %vm475_vm1 = vcmp.eq.s32.totalorder %v7193_v24, %v8369_v51  ;;  %vm987_vm2 = vcmp.eq.s32.totalorder %v7196_v25, %v8369_v51 }
  0xe9   : > { %6262 = vmatpush.msk.msra.mxu1 %vm1210_vm3, %v6974_v13  ;;  %6282 = vmatpush.msk.msra.mxu2 %vm571_vm4, %v6974_v13  ;;  %vm570_vm3 = vcmp.eq.s32.totalorder %v7121_v18, %v8440_v62  ;;  %vm1082_vm4 = vcmp.eq.s32.totalorder %v7124_v19, %v8440_v62 }
  0xea   : > { %6298 = vmatpush.msk.msra.mxu3 %vm1083_vm5, %v6974_v13  ;;  %6247 = vmatpush.msk.msra.mxu0 %vm666_vm6, %v6974_v13  ;;  %vm443_vm5 = vcmp.eq.s32.totalorder %v7217_v26, %v8369_v51  ;;  %vm955_vm6 = vcmp.eq.s32.totalorder %v7220_v27, %v8369_v51 }
  0xeb   : > { %6263 = vmatpush.msk.msra.mxu1 %vm1178_vm7, %v6974_v13  ;;  %6283 = vmatpush.msk.msra.mxu2 %vm539_vm8, %v6974_v13  ;;  %vm538_vm7 = vcmp.eq.s32.totalorder %v7145_v20, %v8440_v62  ;;  %vm1050_vm8 = vcmp.eq.s32.totalorder %v7148_v21, %v8440_v62 }
  0xec   : > { %6299 = vmatpush.msk.msra.mxu3 %vm1051_vm9, %v6974_v13  ;;  %6248 = vmatpush.msk.msra.mxu0 %vm634_vm11, %v6974_v13  ;;  %vm411_vm9 = vcmp.eq.s32.totalorder %v7241_v28, %v8369_v51  ;;  %vm923_vm11 = vcmp.eq.s32.totalorder %v7244_v29, %v8369_v51 }
  0xed   : > { %6264 = vmatpush.msk.msra.mxu1 %vm1146_vm12, %v6974_v13  ;;  %6284 = vmatpush.msk.msra.mxu2 %vm507_vm13, %v6974_v13  ;;  %vm506_vm12 = vcmp.eq.s32.totalorder %v7169_v22, %v8440_v62  ;;  %vm1018_vm13 = vcmp.eq.s32.totalorder %v7172_v23, %v8440_v62 }
  0xee   : > { %6300 = vmatpush.msk.msra.mxu3 %vm1019_vm14, %v6974_v13  ;;  %6249 = vmatpush.msk.msra.mxu0 %vm602_vm15, %v6974_v13  ;;  %vm379_vm14 = vcmp.eq.s32.totalorder %v7266_v30, %v8369_v51  ;;  %vm891_vm15 = vcmp.eq.s32.totalorder %v7269_v31, %v8369_v51 }
  0xef   : > { %6265 = vmatpush.msk.msra.mxu1 %vm1114_vm0, %v6974_v13  ;;  %6285 = vmatpush.msk.msra.mxu2 %vm475_vm1, %v6974_v13  ;;  %vm474_vm0 = vcmp.eq.s32.totalorder %v7193_v24, %v8440_v62  ;;  %vm986_vm1 = vcmp.eq.s32.totalorder %v7196_v25, %v8440_v62 }
  0xf0   : > { %6301 = vmatpush.msk.msra.mxu3 %vm987_vm2, %v6974_v13  ;;  %6250 = vmatpush.msk.msra.mxu0 %vm570_vm3, %v6974_v13  ;;  %vm347_vm2 = vcmp.eq.s32.totalorder %v7293_v32, %v8369_v51  ;;  %vm859_vm3 = vcmp.eq.s32.totalorder %v7296_v33, %v8369_v51 }
  0xf1   : > { %6266 = vmatpush.msk.msra.mxu1 %vm1082_vm4, %v6974_v13  ;;  %6286 = vmatpush.msk.msra.mxu2 %vm443_vm5, %v6974_v13  ;;  %vm442_vm4 = vcmp.eq.s32.totalorder %v7217_v26, %v8440_v62  ;;  %vm954_vm5 = vcmp.eq.s32.totalorder %v7220_v27, %v8440_v62 }
  0xf2   : > { %6302 = vmatpush.msk.msra.mxu3 %vm955_vm6, %v6974_v13  ;;  %6251 = vmatpush.msk.msra.mxu0 %vm538_vm7, %v6974_v13  ;;  %vm315_vm6 = vcmp.eq.s32.totalorder %v7317_v34, %v8369_v51  ;;  %vm827_vm7 = vcmp.eq.s32.totalorder %v7320_v35, %v8369_v51 }
  0xf3   : > { %6267 = vmatpush.msk.msra.mxu1 %vm1050_vm8, %v6974_v13  ;;  %6287 = vmatpush.msk.msra.mxu2 %vm411_vm9, %v6974_v13  ;;  %vm410_vm8 = vcmp.eq.s32.totalorder %v7241_v28, %v8440_v62  ;;  %vm922_vm9 = vcmp.eq.s32.totalorder %v7244_v29, %v8440_v62 }
  0xf4   : > { %6303 = vmatpush.msk.msra.mxu3 %vm923_vm11, %v6974_v13  ;;  %6252 = vmatpush.msk.msra.mxu0 %vm506_vm12, %v6974_v13  ;;  %vm283_vm11 = vcmp.eq.s32.totalorder %v7022_v1, %v8369_v51  ;;  %vm795_vm12 = vcmp.eq.s32.totalorder %v7347_v37, %v8369_v51 }
  0xf5   : > { %6268 = vmatpush.msk.msra.mxu1 %vm1018_vm13, %v6974_v13  ;;  %6288 = vmatpush.msk.msra.mxu2 %vm379_vm14, %v6974_v13  ;;  %vm765_vm13 = vcmp.eq.s32.totalorder %v7034_v2, %v8589_v63  ;;  %vm1277_vm14 = vcmp.eq.s32.totalorder %v7037_v3, %v8589_v63 }
  0xf6   : > { %6304 = vmatpush.msk.msra.mxu3 %vm891_vm15, %v6974_v13  ;;  %6253 = vmatpush.msk.msra.mxu0 %vm474_vm0, %v6974_v13  ;;  %v3485_v0 = vpop.f32.mrf.mxu2  ;;  %vm378_vm15 = vcmp.eq.s32.totalorder %v7266_v30, %v8440_v62  ;;  %vm890_vm0 = vcmp.eq.s32.totalorder %v7269_v31, %v8440_v62 }
  0xf7   : > { %6269 = vmatpush.msk.msra.mxu1 %vm986_vm1, %v6974_v13  ;;  %6289 = vmatpush.msk.msra.mxu2 %vm347_vm2, %v6974_v13  ;;  %vm733_vm1 = vcmp.eq.s32.totalorder %v7040_v4, %v8589_v63  ;;  %vm1245_vm2 = vcmp.eq.s32.totalorder %v7043_v5, %v8589_v63 }
  0xf8   : > { %6305 = vmatpush.msk.msra.mxu3 %vm859_vm3, %v6974_v13  ;;  %v3505_v6 = vpop.f32.mrf.mxu3  ;;  %6254 = vmatpush.msk.msra.mxu0 %vm442_vm4, %v6974_v13  ;;  %vm346_vm3 = vcmp.eq.s32.totalorder %v7293_v32, %v8440_v62  ;;  %vm858_vm4 = vcmp.eq.s32.totalorder %v7296_v33, %v8440_v62 }
  0xf9   : > { %6270 = vmatpush.msk.msra.mxu1 %vm954_vm5, %v6974_v13  ;;  %v3506_v7 = vadd.f32 %v3505_v6, %v3485_v0  ;;  %6290 = vmatpush.msk.msra.mxu2 %vm315_vm6, %v6974_v13  ;;  %vm701_vm5 = vcmp.eq.s32.totalorder %v7052_v8, %v8589_v63  ;;  %vm1213_vm6 = vcmp.eq.s32.totalorder %v7055_v9, %v8589_v63  ;;  %v9055_v0 = vperm.slane %v8775_v42, 2 }
  0xfa   : > { %6306 = vmatpush.msk.msra.mxu3 %vm827_vm7, %v6974_v13  ;;  %6255 = vmatpush.msk.msra.mxu0 %vm410_vm8, %v6974_v13  ;;  %v3445_v36 = vpop.f32.mrf.mxu0  ;;  %vm314_vm7 = vcmp.eq.s32.totalorder %v7317_v34, %v8440_v62  ;;  %vm826_vm8 = vcmp.eq.s32.totalorder %v7320_v35, %v8440_v62 }
  0xfb   : > { %6271 = vmatpush.msk.msra.mxu1 %vm922_vm9, %v6974_v13  ;;  %v4661_v10 = vrot.slane %v3506_v7, 4  ;;  %v3465_v38 = vpop.f32.mrf.mxu1  ;;  %6291 = vmatpush.msk.msra.mxu2 %vm283_vm11, %v6974_v13  ;;  %vm669_vm9 = vcmp.eq.s32.totalorder %v7061_v11, %v8589_v63  ;;  %vm1181_vm11 = vcmp.eq.s32.totalorder %v7064_v12, %v8589_v63 }
  0xfc   : > { %6307 = vmatpush.msk.msra.mxu3 %vm795_vm12, %v6974_v13  ;;  %v3466_v39 = vadd.f32 %v3465_v38, %v3445_v36  ;;  %3804 = vmatmul.f32.vlgmr.msrb.gmra.mxu2 %v8403_v59  ;;  %vm282_vm12 = vcmp.eq.s32.totalorder %v7022_v1, %v8440_v62 }
  0xfd   : > { %3824 = vmatmul.f32.vlgmr.msrb.gmra.mxu3 %v8406_v60  ;;  %6340 = vmatpush.msk.msrb.mxu2 %vm765_vm13, %v6974_v13  ;;  %vm794_vm13 = vcmp.eq.s32.totalorder %v7347_v37, %v8440_v62 }
  0xfe   : > { %6356 = vmatpush.msk.msrb.mxu3 %vm1277_vm14, %v6974_v13  ;;  %v4678_v40 = vsel %vm4676_vm10, %v3466_v39, %v4661_v10  ;;  %6256 = vmatpush.msk.msra.mxu0 %vm378_vm15, %v6974_v13  ;;  %vm764_vm14 = vcmp.eq.s32.totalorder %v7034_v2, %v8644_v41  ;;  %vm1276_vm15 = vcmp.eq.s32.totalorder %v7037_v3, %v8644_v41 }
  0xff   : > { %6272 = vmatpush.msk.msra.mxu1 %vm890_vm0, %v6974_v13  ;;  %4710 = vst [vmem:[%s8401_s29 + $0x8] sm:$0xff] %v4678_v40  ;;  %6341 = vmatpush.msk.msrb.mxu2 %vm733_vm1, %v6974_v13  ;;  %vm637_vm0 = vcmp.eq.s32.totalorder %v7077_v14, %v8589_v63  ;;  %vm1149_vm1 = vcmp.eq.s32.totalorder %v7080_v15, %v8589_v63  ;;  %v9232_v40 = vld.sshfl [vmem:[#allocation1] sm:$0xff pattern:$0x75316420] }
 0x100   : > { %6357 = vmatpush.msk.msrb.mxu3 %vm1245_vm2, %v6974_v13  ;;  %6257 = vmatpush.msk.msra.mxu0 %vm346_vm3, %v6974_v13  ;;  %vm732_vm2 = vcmp.eq.s32.totalorder %v7040_v4, %v8644_v41  ;;  %vm1244_vm3 = vcmp.eq.s32.totalorder %v7043_v5, %v8644_v41 }
 0x101   : > { %6273 = vmatpush.msk.msra.mxu1 %vm858_vm4, %v6974_v13  ;;  %6342 = vmatpush.msk.msrb.mxu2 %vm701_vm5, %v6974_v13  ;;  %vm605_vm4 = vcmp.eq.s32.totalorder %v7103_v16, %v8589_v63  ;;  %vm1117_vm5 = vcmp.eq.s32.totalorder %v7106_v17, %v8589_v63 }
 0x102   : > { %6358 = vmatpush.msk.msrb.mxu3 %vm1213_vm6, %v6974_v13  ;;  %6258 = vmatpush.msk.msra.mxu0 %vm314_vm7, %v6974_v13  ;;  %vm700_vm6 = vcmp.eq.s32.totalorder %v7052_v8, %v8644_v41  ;;  %vm1212_vm7 = vcmp.eq.s32.totalorder %v7055_v9, %v8644_v41 }
 0x103   : > { %6274 = vmatpush.msk.msra.mxu1 %vm826_vm8, %v6974_v13  ;;  %6343 = vmatpush.msk.msrb.mxu2 %vm669_vm9, %v6974_v13  ;;  %vm573_vm8 = vcmp.eq.s32.totalorder %v7121_v18, %v8589_v63  ;;  %vm1085_vm9 = vcmp.eq.s32.totalorder %v7124_v19, %v8589_v63 }
 0x104   : > { %6359 = vmatpush.msk.msrb.mxu3 %vm1181_vm11, %v6974_v13  ;;  %6259 = vmatpush.msk.msra.mxu0 %vm282_vm12, %v6974_v13  ;;  %vm668_vm11 = vcmp.eq.s32.totalorder %v7061_v11, %v8644_v41  ;;  %vm1180_vm12 = vcmp.eq.s32.totalorder %v7064_v12, %v8644_v41 }
 0x105   : > { %6275 = vmatpush.msk.msra.mxu1 %vm794_vm13, %v6974_v13  ;;  %3764 = vmatmul.f32.vlgmr.msrb.gmra.mxu0 %v8403_v59  ;;  %vm541_vm13 = vcmp.eq.s32.totalorder %v7145_v20, %v8589_v63 }
 0x106   : > { %3784 = vmatmul.f32.vlgmr.msrb.gmra.mxu1 %v8406_v60  ;;  %6308 = vmatpush.msk.msrb.mxu0 %vm764_vm14, %v6974_v13  ;;  %vm1053_vm14 = vcmp.eq.s32.totalorder %v7148_v21, %v8589_v63 }
 0x107   : > { %6324 = vmatpush.msk.msrb.mxu1 %vm1276_vm15, %v6974_v13  ;;  %6344 = vmatpush.msk.msrb.mxu2 %vm637_vm0, %v6974_v13  ;;  %vm636_vm15 = vcmp.eq.s32.totalorder %v7077_v14, %v8644_v41  ;;  %vm1148_vm0 = vcmp.eq.s32.totalorder %v7080_v15, %v8644_v41 }
 0x108   : > { %6360 = vmatpush.msk.msrb.mxu3 %vm1149_vm1, %v6974_v13  ;;  %6309 = vmatpush.msk.msrb.mxu0 %vm732_vm2, %v6974_v13  ;;  %vm509_vm1 = vcmp.eq.s32.totalorder %v7169_v22, %v8589_v63  ;;  %vm1021_vm2 = vcmp.eq.s32.totalorder %v7172_v23, %v8589_v63 }
 0x109   : > { %6325 = vmatpush.msk.msrb.mxu1 %vm1244_vm3, %v6974_v13  ;;  %6345 = vmatpush.msk.msrb.mxu2 %vm605_vm4, %v6974_v13  ;;  %vm604_vm3 = vcmp.eq.s32.totalorder %v7103_v16, %v8644_v41  ;;  %vm1116_vm4 = vcmp.eq.s32.totalorder %v7106_v17, %v8644_v41 }
 0x10a   : > { %6361 = vmatpush.msk.msrb.mxu3 %vm1117_vm5, %v6974_v13  ;;  %6310 = vmatpush.msk.msrb.mxu0 %vm700_vm6, %v6974_v13  ;;  %vm477_vm5 = vcmp.eq.s32.totalorder %v7193_v24, %v8589_v63  ;;  %vm989_vm6 = vcmp.eq.s32.totalorder %v7196_v25, %v8589_v63 }
 0x10b   : > { %6326 = vmatpush.msk.msrb.mxu1 %vm1212_vm7, %v6974_v13  ;;  %6346 = vmatpush.msk.msrb.mxu2 %vm573_vm8, %v6974_v13  ;;  %vm572_vm7 = vcmp.eq.s32.totalorder %v7121_v18, %v8644_v41  ;;  %vm1084_vm8 = vcmp.eq.s32.totalorder %v7124_v19, %v8644_v41 }
 0x10c   : > { %6362 = vmatpush.msk.msrb.mxu3 %vm1085_vm9, %v6974_v13  ;;  %6311 = vmatpush.msk.msrb.mxu0 %vm668_vm11, %v6974_v13  ;;  %vm445_vm9 = vcmp.eq.s32.totalorder %v7217_v26, %v8589_v63  ;;  %vm957_vm11 = vcmp.eq.s32.totalorder %v7220_v27, %v8589_v63 }
 0x10d   : > { %6327 = vmatpush.msk.msrb.mxu1 %vm1180_vm12, %v6974_v13  ;;  %6347 = vmatpush.msk.msrb.mxu2 %vm541_vm13, %v6974_v13  ;;  %vm540_vm12 = vcmp.eq.s32.totalorder %v7145_v20, %v8644_v41  ;;  %vm1052_vm13 = vcmp.eq.s32.totalorder %v7148_v21, %v8644_v41 }
 0x10e   : > { %6363 = vmatpush.msk.msrb.mxu3 %vm1053_vm14, %v6974_v13  ;;  %6312 = vmatpush.msk.msrb.mxu0 %vm636_vm15, %v6974_v13  ;;  %vm413_vm14 = vcmp.eq.s32.totalorder %v7241_v28, %v8589_v63  ;;  %vm925_vm15 = vcmp.eq.s32.totalorder %v7244_v29, %v8589_v63 }
 0x10f   : > { %6328 = vmatpush.msk.msrb.mxu1 %vm1148_vm0, %v6974_v13  ;;  %6348 = vmatpush.msk.msrb.mxu2 %vm509_vm1, %v6974_v13  ;;  %vm508_vm0 = vcmp.eq.s32.totalorder %v7169_v22, %v8644_v41  ;;  %vm1020_vm1 = vcmp.eq.s32.totalorder %v7172_v23, %v8644_v41 }
 0x110   : > { %6364 = vmatpush.msk.msrb.mxu3 %vm1021_vm2, %v6974_v13  ;;  %6313 = vmatpush.msk.msrb.mxu0 %vm604_vm3, %v6974_v13  ;;  %vm381_vm2 = vcmp.eq.s32.totalorder %v7266_v30, %v8589_v63  ;;  %vm893_vm3 = vcmp.eq.s32.totalorder %v7269_v31, %v8589_v63 }
 0x111   : > { %6329 = vmatpush.msk.msrb.mxu1 %vm1116_vm4, %v6974_v13  ;;  %6349 = vmatpush.msk.msrb.mxu2 %vm477_vm5, %v6974_v13  ;;  %vm476_vm4 = vcmp.eq.s32.totalorder %v7193_v24, %v8644_v41  ;;  %vm988_vm5 = vcmp.eq.s32.totalorder %v7196_v25, %v8644_v41 }
 0x112   : > { %6365 = vmatpush.msk.msrb.mxu3 %vm989_vm6, %v6974_v13  ;;  %6314 = vmatpush.msk.msrb.mxu0 %vm572_vm7, %v6974_v13  ;;  %vm349_vm6 = vcmp.eq.s32.totalorder %v7293_v32, %v8589_v63  ;;  %vm861_vm7 = vcmp.eq.s32.totalorder %v7296_v33, %v8589_v63 }
 0x113   : > { %6330 = vmatpush.msk.msrb.mxu1 %vm1084_vm8, %v6974_v13  ;;  %6350 = vmatpush.msk.msrb.mxu2 %vm445_vm9, %v6974_v13  ;;  %vm444_vm8 = vcmp.eq.s32.totalorder %v7217_v26, %v8644_v41  ;;  %vm956_vm9 = vcmp.eq.s32.totalorder %v7220_v27, %v8644_v41 }
 0x114   : > { %6366 = vmatpush.msk.msrb.mxu3 %vm957_vm11, %v6974_v13  ;;  %6315 = vmatpush.msk.msrb.mxu0 %vm540_vm12, %v6974_v13  ;;  %vm317_vm11 = vcmp.eq.s32.totalorder %v7317_v34, %v8589_v63  ;;  %vm829_vm12 = vcmp.eq.s32.totalorder %v7320_v35, %v8589_v63 }
 0x115   : > { %6331 = vmatpush.msk.msrb.mxu1 %vm1052_vm13, %v6974_v13  ;;  %6351 = vmatpush.msk.msrb.mxu2 %vm413_vm14, %v6974_v13  ;;  %vm412_vm13 = vcmp.eq.s32.totalorder %v7241_v28, %v8644_v41  ;;  %vm924_vm14 = vcmp.eq.s32.totalorder %v7244_v29, %v8644_v41 }
 0x116   : > { %6367 = vmatpush.msk.msrb.mxu3 %vm925_vm15, %v6974_v13  ;;  %6316 = vmatpush.msk.msrb.mxu0 %vm508_vm0, %v6974_v13  ;;  %vm285_vm15 = vcmp.eq.s32.totalorder %v7022_v1, %v8589_v63  ;;  %vm797_vm0 = vcmp.eq.s32.totalorder %v7347_v37, %v8589_v63 }
 0x117   : > { %6332 = vmatpush.msk.msrb.mxu1 %vm1020_vm1, %v6974_v13  ;;  %6352 = vmatpush.msk.msrb.mxu2 %vm381_vm2, %v6974_v13  ;;  %vm767_vm1 = vcmp.eq.s32.totalorder %v7034_v2, %v8796_v43  ;;  %vm1279_vm2 = vcmp.eq.s32.totalorder %v7037_v3, %v8796_v43 }
 0x118   : > { %6368 = vmatpush.msk.msrb.mxu3 %vm893_vm3, %v6974_v13  ;;  %6317 = vmatpush.msk.msrb.mxu0 %vm476_vm4, %v6974_v13  ;;  %vm380_vm3 = vcmp.eq.s32.totalorder %v7266_v30, %v8644_v41  ;;  %vm892_vm4 = vcmp.eq.s32.totalorder %v7269_v31, %v8644_v41 }
 0x119   : > { %6333 = vmatpush.msk.msrb.mxu1 %vm988_vm5, %v6974_v13  ;;  %6353 = vmatpush.msk.msrb.mxu2 %vm349_vm6, %v6974_v13  ;;  %v3565_v44 = vpop.f32.mrf.mxu2  ;;  %vm735_vm5 = vcmp.eq.s32.totalorder %v7040_v4, %v8796_v43  ;;  %vm1247_vm6 = vcmp.eq.s32.totalorder %v7043_v5, %v8796_v43 }
 0x11a   : > { %6369 = vmatpush.msk.msrb.mxu3 %vm861_vm7, %v6974_v13  ;;  %v3585_v45 = vpop.f32.mrf.mxu3  ;;  %6318 = vmatpush.msk.msrb.mxu0 %vm444_vm8, %v6974_v13  ;;  %vm348_vm7 = vcmp.eq.s32.totalorder %v7293_v32, %v8644_v41  ;;  %vm860_vm8 = vcmp.eq.s32.totalorder %v7296_v33, %v8644_v41 }
 0x11b   : > { %6334 = vmatpush.msk.msrb.mxu1 %vm956_vm9, %v6974_v13  ;;  %v3586_v46 = vadd.f32 %v3585_v45, %v3565_v44  ;;  %6354 = vmatpush.msk.msrb.mxu2 %vm317_vm11, %v6974_v13  ;;  %vm703_vm9 = vcmp.eq.s32.totalorder %v7052_v8, %v8796_v43  ;;  %vm1215_vm11 = vcmp.eq.s32.totalorder %v7055_v9, %v8796_v43  ;;  %v9269_v44 = vperm.slane %v8775_v42, 4 }
 0x11c   : > { %6370 = vmatpush.msk.msrb.mxu3 %vm829_vm12, %v6974_v13  ;;  %6319 = vmatpush.msk.msrb.mxu0 %vm412_vm13, %v6974_v13  ;;  %v3525_v48 = vpop.f32.mrf.mxu0  ;;  %vm316_vm12 = vcmp.eq.s32.totalorder %v7317_v34, %v8644_v41  ;;  %vm828_vm13 = vcmp.eq.s32.totalorder %v7320_v35, %v8644_v41  ;;  %v9418_v45 = vperm.slane %v8775_v42, 7 }
 0x11d   : > { %6335 = vmatpush.msk.msrb.mxu1 %vm924_vm14, %v6974_v13  ;;  %v4662_v47 = vrot.slane %v3586_v46, 4  ;;  %v3545_v49 = vpop.f32.mrf.mxu1  ;;  %6355 = vmatpush.msk.msrb.mxu2 %vm285_vm15, %v6974_v13  ;;  %vm671_vm14 = vcmp.eq.s32.totalorder %v7061_v11, %v8796_v43  ;;  %vm1183_vm15 = vcmp.eq.s32.totalorder %v7064_v12, %v8796_v43 }
 0x11e   : > { %6371 = vmatpush.msk.msrb.mxu3 %vm797_vm0, %v6974_v13  ;;  %v3546_v50 = vadd.f32 %v3545_v49, %v3525_v48  ;;  %3884 = vmatmul.f32.vlgmr.msra.gmra.mxu2 %v8403_v59  ;;  %vm284_vm0 = vcmp.eq.s32.totalorder %v7022_v1, %v8644_v41 }
 0x11f   : > { %3904 = vmatmul.f32.vlgmr.msra.gmra.mxu3 %v8406_v60  ;;  %6404 = vmatpush.msk.msra.mxu2 %vm767_vm1, %v6974_v13  ;;  %vm796_vm1 = vcmp.eq.s32.totalorder %v7347_v37, %v8644_v41  ;;  %v9235_v41 = vld.sshfl [vmem:[#allocation1 + $0x8] sm:$0xff pattern:$0x75316420] }
 0x120   : > { %6420 = vmatpush.msk.msra.mxu3 %vm1279_vm2, %v6974_v13  ;;  %v4679_v51 = vsel %vm4676_vm10, %v3546_v50, %v4662_v47  ;;  %6320 = vmatpush.msk.msrb.mxu0 %vm380_vm3, %v6974_v13  ;;  %vm766_vm2 = vcmp.eq.s32.totalorder %v7034_v2, %v8851_v52  ;;  %vm1278_vm3 = vcmp.eq.s32.totalorder %v7037_v3, %v8851_v52 }
 0x121   : > { %6336 = vmatpush.msk.msrb.mxu1 %vm892_vm4, %v6974_v13  ;;  %4711 = vst [vmem:[%s8401_s29 + $0x10] sm:$0xff] %v4679_v51  ;;  %6405 = vmatpush.msk.msra.mxu2 %vm735_vm5, %v6974_v13  ;;  %vm639_vm4 = vcmp.eq.s32.totalorder %v7077_v14, %v8796_v43  ;;  %vm1151_vm5 = vcmp.eq.s32.totalorder %v7080_v15, %v8796_v43 }
 0x122   : > { %6421 = vmatpush.msk.msra.mxu3 %vm1247_vm6, %v6974_v13  ;;  %6321 = vmatpush.msk.msrb.mxu0 %vm348_vm7, %v6974_v13  ;;  %vm734_vm6 = vcmp.eq.s32.totalorder %v7040_v4, %v8851_v52  ;;  %vm1246_vm7 = vcmp.eq.s32.totalorder %v7043_v5, %v8851_v52 }
 0x123   : > { %6337 = vmatpush.msk.msrb.mxu1 %vm860_vm8, %v6974_v13  ;;  %6406 = vmatpush.msk.msra.mxu2 %vm703_vm9, %v6974_v13  ;;  %vm607_vm8 = vcmp.eq.s32.totalorder %v7103_v16, %v8796_v43  ;;  %vm1119_vm9 = vcmp.eq.s32.totalorder %v7106_v17, %v8796_v43 }
 0x124   : > { %6422 = vmatpush.msk.msra.mxu3 %vm1215_vm11, %v6974_v13  ;;  %6322 = vmatpush.msk.msrb.mxu0 %vm316_vm12, %v6974_v13  ;;  %vm702_vm11 = vcmp.eq.s32.totalorder %v7052_v8, %v8851_v52  ;;  %vm1214_vm12 = vcmp.eq.s32.totalorder %v7055_v9, %v8851_v52 }
 0x125   : > { %6338 = vmatpush.msk.msrb.mxu1 %vm828_vm13, %v6974_v13  ;;  %6407 = vmatpush.msk.msra.mxu2 %vm671_vm14, %v6974_v13  ;;  %vm575_vm13 = vcmp.eq.s32.totalorder %v7121_v18, %v8796_v43  ;;  %vm1087_vm14 = vcmp.eq.s32.totalorder %v7124_v19, %v8796_v43 }
 0x126   : > { %6423 = vmatpush.msk.msra.mxu3 %vm1183_vm15, %v6974_v13  ;;  %6323 = vmatpush.msk.msrb.mxu0 %vm284_vm0, %v6974_v13  ;;  %vm670_vm15 = vcmp.eq.s32.totalorder %v7061_v11, %v8851_v52  ;;  %vm1182_vm0 = vcmp.eq.s32.totalorder %v7064_v12, %v8851_v52 }
 0x127   : > { %6339 = vmatpush.msk.msrb.mxu1 %vm796_vm1, %v6974_v13  ;;  %3844 = vmatmul.f32.vlgmr.msra.gmra.mxu0 %v8403_v59  ;;  %vm543_vm1 = vcmp.eq.s32.totalorder %v7145_v20, %v8796_v43 }
 0x128   : > { %3864 = vmatmul.f32.vlgmr.msra.gmra.mxu1 %v8406_v60  ;;  %6372 = vmatpush.msk.msra.mxu0 %vm766_vm2, %v6974_v13  ;;  %vm1055_vm2 = vcmp.eq.s32.totalorder %v7148_v21, %v8796_v43 }
 0x129   : > { %6388 = vmatpush.msk.msra.mxu1 %vm1278_vm3, %v6974_v13  ;;  %6408 = vmatpush.msk.msra.mxu2 %vm639_vm4, %v6974_v13  ;;  %vm638_vm3 = vcmp.eq.s32.totalorder %v7077_v14, %v8851_v52  ;;  %vm1150_vm4 = vcmp.eq.s32.totalorder %v7080_v15, %v8851_v52 }
 0x12a   : > { %6424 = vmatpush.msk.msra.mxu3 %vm1151_vm5, %v6974_v13  ;;  %6373 = vmatpush.msk.msra.mxu0 %vm734_vm6, %v6974_v13  ;;  %vm511_vm5 = vcmp.eq.s32.totalorder %v7169_v22, %v8796_v43  ;;  %vm1023_vm6 = vcmp.eq.s32.totalorder %v7172_v23, %v8796_v43 }
 0x12b   : > { %6389 = vmatpush.msk.msra.mxu1 %vm1246_vm7, %v6974_v13  ;;  %6409 = vmatpush.msk.msra.mxu2 %vm607_vm8, %v6974_v13  ;;  %vm606_vm7 = vcmp.eq.s32.totalorder %v7103_v16, %v8851_v52  ;;  %vm1118_vm8 = vcmp.eq.s32.totalorder %v7106_v17, %v8851_v52 }
 0x12c   : > { %6425 = vmatpush.msk.msra.mxu3 %vm1119_vm9, %v6974_v13  ;;  %6374 = vmatpush.msk.msra.mxu0 %vm702_vm11, %v6974_v13  ;;  %vm479_vm9 = vcmp.eq.s32.totalorder %v7193_v24, %v8796_v43  ;;  %vm991_vm11 = vcmp.eq.s32.totalorder %v7196_v25, %v8796_v43 }
 0x12d   : > { %6390 = vmatpush.msk.msra.mxu1 %vm1214_vm12, %v6974_v13  ;;  %6410 = vmatpush.msk.msra.mxu2 %vm575_vm13, %v6974_v13  ;;  %vm574_vm12 = vcmp.eq.s32.totalorder %v7121_v18, %v8851_v52  ;;  %vm1086_vm13 = vcmp.eq.s32.totalorder %v7124_v19, %v8851_v52 }
 0x12e   : > { %6426 = vmatpush.msk.msra.mxu3 %vm1087_vm14, %v6974_v13  ;;  %6375 = vmatpush.msk.msra.mxu0 %vm670_vm15, %v6974_v13  ;;  %vm447_vm14 = vcmp.eq.s32.totalorder %v7217_v26, %v8796_v43  ;;  %vm959_vm15 = vcmp.eq.s32.totalorder %v7220_v27, %v8796_v43 }
 0x12f   : > { %6391 = vmatpush.msk.msra.mxu1 %vm1182_vm0, %v6974_v13  ;;  %6411 = vmatpush.msk.msra.mxu2 %vm543_vm1, %v6974_v13  ;;  %vm542_vm0 = vcmp.eq.s32.totalorder %v7145_v20, %v8851_v52  ;;  %vm1054_vm1 = vcmp.eq.s32.totalorder %v7148_v21, %v8851_v52 }
 0x130   : > { %6427 = vmatpush.msk.msra.mxu3 %vm1055_vm2, %v6974_v13  ;;  %6376 = vmatpush.msk.msra.mxu0 %vm638_vm3, %v6974_v13  ;;  %vm415_vm2 = vcmp.eq.s32.totalorder %v7241_v28, %v8796_v43  ;;  %vm927_vm3 = vcmp.eq.s32.totalorder %v7244_v29, %v8796_v43 }
 0x131   : > { %6392 = vmatpush.msk.msra.mxu1 %vm1150_vm4, %v6974_v13  ;;  %6412 = vmatpush.msk.msra.mxu2 %vm511_vm5, %v6974_v13  ;;  %vm510_vm4 = vcmp.eq.s32.totalorder %v7169_v22, %v8851_v52  ;;  %vm1022_vm5 = vcmp.eq.s32.totalorder %v7172_v23, %v8851_v52 }
 0x132   : > { %6428 = vmatpush.msk.msra.mxu3 %vm1023_vm6, %v6974_v13  ;;  %6377 = vmatpush.msk.msra.mxu0 %vm606_vm7, %v6974_v13  ;;  %vm383_vm6 = vcmp.eq.s32.totalorder %v7266_v30, %v8796_v43  ;;  %vm895_vm7 = vcmp.eq.s32.totalorder %v7269_v31, %v8796_v43 }
 0x133   : > { %6393 = vmatpush.msk.msra.mxu1 %vm1118_vm8, %v6974_v13  ;;  %6413 = vmatpush.msk.msra.mxu2 %vm479_vm9, %v6974_v13  ;;  %vm478_vm8 = vcmp.eq.s32.totalorder %v7193_v24, %v8851_v52  ;;  %vm990_vm9 = vcmp.eq.s32.totalorder %v7196_v25, %v8851_v52 }
 0x134   : > { %6429 = vmatpush.msk.msra.mxu3 %vm991_vm11, %v6974_v13  ;;  %6378 = vmatpush.msk.msra.mxu0 %vm574_vm12, %v6974_v13  ;;  %vm351_vm11 = vcmp.eq.s32.totalorder %v7293_v32, %v8796_v43  ;;  %vm863_vm12 = vcmp.eq.s32.totalorder %v7296_v33, %v8796_v43 }
 0x135   : > { %6394 = vmatpush.msk.msra.mxu1 %vm1086_vm13, %v6974_v13  ;;  %6414 = vmatpush.msk.msra.mxu2 %vm447_vm14, %v6974_v13  ;;  %vm446_vm13 = vcmp.eq.s32.totalorder %v7217_v26, %v8851_v52  ;;  %vm958_vm14 = vcmp.eq.s32.totalorder %v7220_v27, %v8851_v52 }
 0x136   : > { %6430 = vmatpush.msk.msra.mxu3 %vm959_vm15, %v6974_v13  ;;  %6379 = vmatpush.msk.msra.mxu0 %vm542_vm0, %v6974_v13  ;;  %vm319_vm15 = vcmp.eq.s32.totalorder %v7317_v34, %v8796_v43  ;;  %vm831_vm0 = vcmp.eq.s32.totalorder %v7320_v35, %v8796_v43 }
 0x137   : > { %6395 = vmatpush.msk.msra.mxu1 %vm1054_vm1, %v6974_v13  ;;  %6415 = vmatpush.msk.msra.mxu2 %vm415_vm2, %v6974_v13  ;;  %vm414_vm1 = vcmp.eq.s32.totalorder %v7241_v28, %v8851_v52  ;;  %vm926_vm2 = vcmp.eq.s32.totalorder %v7244_v29, %v8851_v52 }
 0x138   : > { %6431 = vmatpush.msk.msra.mxu3 %vm927_vm3, %v6974_v13  ;;  %6380 = vmatpush.msk.msra.mxu0 %vm510_vm4, %v6974_v13  ;;  %vm287_vm3 = vcmp.eq.s32.totalorder %v7022_v1, %v8796_v43  ;;  %vm799_vm4 = vcmp.eq.s32.totalorder %v7347_v37, %v8796_v43 }
 0x139   : > { %6396 = vmatpush.msk.msra.mxu1 %vm1022_vm5, %v6974_v13  ;;  %6416 = vmatpush.msk.msra.mxu2 %vm383_vm6, %v6974_v13  ;;  %vm769_vm5 = vcmp.eq.s32.totalorder %v7034_v2, %v9000_v53  ;;  %vm1281_vm6 = vcmp.eq.s32.totalorder %v7037_v3, %v9000_v53 }
 0x13a   : > { %6432 = vmatpush.msk.msra.mxu3 %vm895_vm7, %v6974_v13  ;;  %6381 = vmatpush.msk.msra.mxu0 %vm478_vm8, %v6974_v13  ;;  %vm382_vm7 = vcmp.eq.s32.totalorder %v7266_v30, %v8851_v52  ;;  %vm894_vm8 = vcmp.eq.s32.totalorder %v7269_v31, %v8851_v52 }
 0x13b   : > { %6397 = vmatpush.msk.msra.mxu1 %vm990_vm9, %v6974_v13  ;;  %6417 = vmatpush.msk.msra.mxu2 %vm351_vm11, %v6974_v13  ;;  %v3645_v54 = vpop.f32.mrf.mxu2  ;;  %vm737_vm9 = vcmp.eq.s32.totalorder %v7040_v4, %v9000_v53  ;;  %vm1249_vm11 = vcmp.eq.s32.totalorder %v7043_v5, %v9000_v53 }
 0x13c   : > { %6433 = vmatpush.msk.msra.mxu3 %vm863_vm12, %v6974_v13  ;;  %v3665_v55 = vpop.f32.mrf.mxu3  ;;  %6382 = vmatpush.msk.msra.mxu0 %vm446_vm13, %v6974_v13  ;;  %vm350_vm12 = vcmp.eq.s32.totalorder %v7293_v32, %v8851_v52  ;;  %vm862_vm13 = vcmp.eq.s32.totalorder %v7296_v33, %v8851_v52 }
 0x13d   : > { %6398 = vmatpush.msk.msra.mxu1 %vm958_vm14, %v6974_v13  ;;  %v3666_v56 = vadd.f32 %v3665_v55, %v3645_v54  ;;  %6418 = vmatpush.msk.msra.mxu2 %vm319_vm15, %v6974_v13  ;;  %vm705_vm14 = vcmp.eq.s32.totalorder %v7052_v8, %v9000_v53  ;;  %vm1217_vm15 = vcmp.eq.s32.totalorder %v7055_v9, %v9000_v53  ;;  %v9473_v54 = vperm.slane %v8775_v42, 6 }
 0x13e   : > { %6434 = vmatpush.msk.msra.mxu3 %vm831_vm0, %v6974_v13  ;;  %6383 = vmatpush.msk.msra.mxu0 %vm414_vm1, %v6974_v13  ;;  %v3605_v58 = vpop.f32.mrf.mxu0  ;;  %vm318_vm0 = vcmp.eq.s32.totalorder %v7317_v34, %v8851_v52  ;;  %vm830_vm1 = vcmp.eq.s32.totalorder %v7320_v35, %v8851_v52 }
 0x13f   : > { %6399 = vmatpush.msk.msra.mxu1 %vm926_vm2, %v6974_v13  ;;  %v4663_v57 = vrot.slane %v3666_v56, 4  ;;  %v3625_v61 = vpop.f32.mrf.mxu1  ;;  %6419 = vmatpush.msk.msra.mxu2 %vm287_vm3, %v6974_v13  ;;  %vm673_vm2 = vcmp.eq.s32.totalorder %v7061_v11, %v9000_v53  ;;  %vm1185_vm3 = vcmp.eq.s32.totalorder %v7064_v12, %v9000_v53 }
 0x140   : > { %6435 = vmatpush.msk.msra.mxu3 %vm799_vm4, %v6974_v13  ;;  %v3626_v62 = vadd.f32 %v3625_v61, %v3605_v58  ;;  %3964 = vmatmul.f32.vlgmr.msrb.gmra.mxu2 %v8403_v59  ;;  %vm286_vm4 = vcmp.eq.s32.totalorder %v7022_v1, %v8851_v52 }
 0x141   : > { %3984 = vmatmul.f32.vlgmr.msrb.gmra.mxu3 %v8406_v60  ;;  %6468 = vmatpush.msk.msrb.mxu2 %vm769_vm5, %v6974_v13  ;;  %vm798_vm5 = vcmp.eq.s32.totalorder %v7347_v37, %v8851_v52 }
 0x142   : > { %6484 = vmatpush.msk.msrb.mxu3 %vm1281_vm6, %v6974_v13  ;;  %v4680_v63 = vsel %vm4676_vm10, %v3626_v62, %v4663_v57  ;;  %6384 = vmatpush.msk.msra.mxu0 %vm382_vm7, %v6974_v13  ;;  %vm768_vm6 = vcmp.eq.s32.totalorder %v7034_v2, %v9055_v0  ;;  %vm1280_vm7 = vcmp.eq.s32.totalorder %v7037_v3, %v9055_v0 }
 0x143   : > { %6400 = vmatpush.msk.msra.mxu1 %vm894_vm8, %v6974_v13  ;;  %4712 = vst [vmem:[%s8401_s29 + $0x18] sm:$0xff] %v4680_v63  ;;  %6469 = vmatpush.msk.msrb.mxu2 %vm737_vm9, %v6974_v13  ;;  %vm641_vm8 = vcmp.eq.s32.totalorder %v7077_v14, %v9000_v53  ;;  %vm1153_vm9 = vcmp.eq.s32.totalorder %v7080_v15, %v9000_v53 }
 0x144   : > { %6485 = vmatpush.msk.msrb.mxu3 %vm1249_vm11, %v6974_v13  ;;  %6385 = vmatpush.msk.msra.mxu0 %vm350_vm12, %v6974_v13  ;;  %vm736_vm11 = vcmp.eq.s32.totalorder %v7040_v4, %v9055_v0  ;;  %vm1248_vm12 = vcmp.eq.s32.totalorder %v7043_v5, %v9055_v0 }
 0x145   : > { %6401 = vmatpush.msk.msra.mxu1 %vm862_vm13, %v6974_v13  ;;  %6470 = vmatpush.msk.msrb.mxu2 %vm705_vm14, %v6974_v13  ;;  %vm609_vm13 = vcmp.eq.s32.totalorder %v7103_v16, %v9000_v53  ;;  %vm1121_vm14 = vcmp.eq.s32.totalorder %v7106_v17, %v9000_v53 }
 0x146   : > { %6486 = vmatpush.msk.msrb.mxu3 %vm1217_vm15, %v6974_v13  ;;  %6386 = vmatpush.msk.msra.mxu0 %vm318_vm0, %v6974_v13  ;;  %vm704_vm15 = vcmp.eq.s32.totalorder %v7052_v8, %v9055_v0  ;;  %vm1216_vm0 = vcmp.eq.s32.totalorder %v7055_v9, %v9055_v0 }
 0x147   : > { %6402 = vmatpush.msk.msra.mxu1 %vm830_vm1, %v6974_v13  ;;  %6471 = vmatpush.msk.msrb.mxu2 %vm673_vm2, %v6974_v13  ;;  %vm577_vm1 = vcmp.eq.s32.totalorder %v7121_v18, %v9000_v53  ;;  %vm1089_vm2 = vcmp.eq.s32.totalorder %v7124_v19, %v9000_v53 }
 0x148   : > { %6487 = vmatpush.msk.msrb.mxu3 %vm1185_vm3, %v6974_v13  ;;  %6387 = vmatpush.msk.msra.mxu0 %vm286_vm4, %v6974_v13  ;;  %vm672_vm3 = vcmp.eq.s32.totalorder %v7061_v11, %v9055_v0  ;;  %vm1184_vm4 = vcmp.eq.s32.totalorder %v7064_v12, %v9055_v0 }
 0x149   : > { %6403 = vmatpush.msk.msra.mxu1 %vm798_vm5, %v6974_v13  ;;  %3924 = vmatmul.f32.vlgmr.msrb.gmra.mxu0 %v8403_v59  ;;  %vm545_vm5 = vcmp.eq.s32.totalorder %v7145_v20, %v9000_v53  ;;  %v9204_v59 = vperm.slane %v8775_v42, 5  ;;  %v9604_v42 = vld [vmem:[%s7031_s21 + $0x18] sm:$0xff] }
 0x14a   : > { %3944 = vmatmul.f32.vlgmr.msrb.gmra.mxu1 %v8406_v60  ;;  %6436 = vmatpush.msk.msrb.mxu0 %vm768_vm6, %v6974_v13  ;;  %vm1057_vm6 = vcmp.eq.s32.totalorder %v7148_v21, %v9000_v53  ;;  %v9625_v55 = vperm.slane %v9604_v42, 1 }
 0x14b   : > { %6452 = vmatpush.msk.msrb.mxu1 %vm1280_vm7, %v6974_v13  ;;  %6472 = vmatpush.msk.msrb.mxu2 %vm641_vm8, %v6974_v13  ;;  %vm640_vm7 = vcmp.eq.s32.totalorder %v7077_v14, %v9055_v0  ;;  %vm1152_vm8 = vcmp.eq.s32.totalorder %v7080_v15, %v9055_v0 }
 0x14c   : > { %6488 = vmatpush.msk.msrb.mxu3 %vm1153_vm9, %v6974_v13  ;;  %6437 = vmatpush.msk.msrb.mxu0 %vm736_vm11, %v6974_v13  ;;  %vm513_vm9 = vcmp.eq.s32.totalorder %v7169_v22, %v9000_v53  ;;  %vm1025_vm11 = vcmp.eq.s32.totalorder %v7172_v23, %v9000_v53 }
 0x14d   : > { %6453 = vmatpush.msk.msrb.mxu1 %vm1248_vm12, %v6974_v13  ;;  %6473 = vmatpush.msk.msrb.mxu2 %vm609_vm13, %v6974_v13  ;;  %vm608_vm12 = vcmp.eq.s32.totalorder %v7103_v16, %v9055_v0  ;;  %vm1120_vm13 = vcmp.eq.s32.totalorder %v7106_v17, %v9055_v0 }
 0x14e   : > { %6489 = vmatpush.msk.msrb.mxu3 %vm1121_vm14, %v6974_v13  ;;  %6438 = vmatpush.msk.msrb.mxu0 %vm704_vm15, %v6974_v13  ;;  %vm481_vm14 = vcmp.eq.s32.totalorder %v7193_v24, %v9000_v53  ;;  %vm993_vm15 = vcmp.eq.s32.totalorder %v7196_v25, %v9000_v53 }
 0x14f   : > { %6454 = vmatpush.msk.msrb.mxu1 %vm1216_vm0, %v6974_v13  ;;  %6474 = vmatpush.msk.msrb.mxu2 %vm577_vm1, %v6974_v13  ;;  %vm576_vm0 = vcmp.eq.s32.totalorder %v7121_v18, %v9055_v0  ;;  %vm1088_vm1 = vcmp.eq.s32.totalorder %v7124_v19, %v9055_v0 }
 0x150   : > { %6490 = vmatpush.msk.msrb.mxu3 %vm1089_vm2, %v6974_v13  ;;  %6439 = vmatpush.msk.msrb.mxu0 %vm672_vm3, %v6974_v13  ;;  %vm449_vm2 = vcmp.eq.s32.totalorder %v7217_v26, %v9000_v53  ;;  %vm961_vm3 = vcmp.eq.s32.totalorder %v7220_v27, %v9000_v53 }
 0x151   : > { %6455 = vmatpush.msk.msrb.mxu1 %vm1184_vm4, %v6974_v13  ;;  %6475 = vmatpush.msk.msrb.mxu2 %vm545_vm5, %v6974_v13  ;;  %vm544_vm4 = vcmp.eq.s32.totalorder %v7145_v20, %v9055_v0  ;;  %vm1056_vm5 = vcmp.eq.s32.totalorder %v7148_v21, %v9055_v0 }
 0x152   : > { %6491 = vmatpush.msk.msrb.mxu3 %vm1057_vm6, %v6974_v13  ;;  %6440 = vmatpush.msk.msrb.mxu0 %vm640_vm7, %v6974_v13  ;;  %vm417_vm6 = vcmp.eq.s32.totalorder %v7241_v28, %v9000_v53  ;;  %vm929_vm7 = vcmp.eq.s32.totalorder %v7244_v29, %v9000_v53 }
 0x153   : > { %6456 = vmatpush.msk.msrb.mxu1 %vm1152_vm8, %v6974_v13  ;;  %6476 = vmatpush.msk.msrb.mxu2 %vm513_vm9, %v6974_v13  ;;  %vm512_vm8 = vcmp.eq.s32.totalorder %v7169_v22, %v9055_v0  ;;  %vm1024_vm9 = vcmp.eq.s32.totalorder %v7172_v23, %v9055_v0 }
 0x154   : > { %6492 = vmatpush.msk.msrb.mxu3 %vm1025_vm11, %v6974_v13  ;;  %6441 = vmatpush.msk.msrb.mxu0 %vm608_vm12, %v6974_v13  ;;  %vm385_vm11 = vcmp.eq.s32.totalorder %v7266_v30, %v9000_v53  ;;  %vm897_vm12 = vcmp.eq.s32.totalorder %v7269_v31, %v9000_v53 }
 0x155   : > { %6457 = vmatpush.msk.msrb.mxu1 %vm1120_vm13, %v6974_v13  ;;  %6477 = vmatpush.msk.msrb.mxu2 %vm481_vm14, %v6974_v13  ;;  %vm480_vm13 = vcmp.eq.s32.totalorder %v7193_v24, %v9055_v0  ;;  %vm992_vm14 = vcmp.eq.s32.totalorder %v7196_v25, %v9055_v0 }
 0x156   : > { %6493 = vmatpush.msk.msrb.mxu3 %vm993_vm15, %v6974_v13  ;;  %6442 = vmatpush.msk.msrb.mxu0 %vm576_vm0, %v6974_v13  ;;  %vm353_vm15 = vcmp.eq.s32.totalorder %v7293_v32, %v9000_v53  ;;  %vm865_vm0 = vcmp.eq.s32.totalorder %v7296_v33, %v9000_v53 }
 0x157   : > { %6458 = vmatpush.msk.msrb.mxu1 %vm1088_vm1, %v6974_v13  ;;  %6478 = vmatpush.msk.msrb.mxu2 %vm449_vm2, %v6974_v13  ;;  %vm448_vm1 = vcmp.eq.s32.totalorder %v7217_v26, %v9055_v0  ;;  %vm960_vm2 = vcmp.eq.s32.totalorder %v7220_v27, %v9055_v0 }
 0x158   : > { %6494 = vmatpush.msk.msrb.mxu3 %vm961_vm3, %v6974_v13  ;;  %6443 = vmatpush.msk.msrb.mxu0 %vm544_vm4, %v6974_v13  ;;  %vm321_vm3 = vcmp.eq.s32.totalorder %v7317_v34, %v9000_v53  ;;  %vm833_vm4 = vcmp.eq.s32.totalorder %v7320_v35, %v9000_v53 }
 0x159   : > { %6459 = vmatpush.msk.msrb.mxu1 %vm1056_vm5, %v6974_v13  ;;  %6479 = vmatpush.msk.msrb.mxu2 %vm417_vm6, %v6974_v13  ;;  %vm416_vm5 = vcmp.eq.s32.totalorder %v7241_v28, %v9055_v0  ;;  %vm928_vm6 = vcmp.eq.s32.totalorder %v7244_v29, %v9055_v0 }
 0x15a   : > { %6495 = vmatpush.msk.msrb.mxu3 %vm929_vm7, %v6974_v13  ;;  %6444 = vmatpush.msk.msrb.mxu0 %vm512_vm8, %v6974_v13  ;;  %vm289_vm7 = vcmp.eq.s32.totalorder %v7022_v1, %v9000_v53  ;;  %vm801_vm8 = vcmp.eq.s32.totalorder %v7347_v37, %v9000_v53 }
 0x15b   : > { %6460 = vmatpush.msk.msrb.mxu1 %vm1024_vm9, %v6974_v13  ;;  %6480 = vmatpush.msk.msrb.mxu2 %vm385_vm11, %v6974_v13  ;;  %vm771_vm9 = vcmp.eq.s32.totalorder %v7034_v2, %v9204_v59  ;;  %vm1283_vm11 = vcmp.eq.s32.totalorder %v7037_v3, %v9204_v59 }
 0x15c   : > { %6496 = vmatpush.msk.msrb.mxu3 %vm897_vm12, %v6974_v13  ;;  %6445 = vmatpush.msk.msrb.mxu0 %vm480_vm13, %v6974_v13  ;;  %vm384_vm12 = vcmp.eq.s32.totalorder %v7266_v30, %v9055_v0  ;;  %vm896_vm13 = vcmp.eq.s32.totalorder %v7269_v31, %v9055_v0 }
 0x15d   : > { %6461 = vmatpush.msk.msrb.mxu1 %vm992_vm14, %v6974_v13  ;;  %6481 = vmatpush.msk.msrb.mxu2 %vm353_vm15, %v6974_v13  ;;  %v3725_v60 = vpop.f32.mrf.mxu2  ;;  %vm739_vm14 = vcmp.eq.s32.totalorder %v7040_v4, %v9204_v59  ;;  %vm1251_vm15 = vcmp.eq.s32.totalorder %v7043_v5, %v9204_v59 }
 0x15e   : > { %6497 = vmatpush.msk.msrb.mxu3 %vm865_vm0, %v6974_v13  ;;  %v3745_v6 = vpop.f32.mrf.mxu3  ;;  %6446 = vmatpush.msk.msrb.mxu0 %vm448_vm1, %v6974_v13  ;;  %vm352_vm0 = vcmp.eq.s32.totalorder %v7293_v32, %v9055_v0  ;;  %vm864_vm1 = vcmp.eq.s32.totalorder %v7296_v33, %v9055_v0 }
 0x15f   : > { %6462 = vmatpush.msk.msrb.mxu1 %vm960_vm2, %v6974_v13  ;;  %v3746_v7 = vadd.f32 %v3745_v6, %v3725_v60  ;;  %6482 = vmatpush.msk.msrb.mxu2 %vm321_vm3, %v6974_v13  ;;  %vm707_vm2 = vcmp.eq.s32.totalorder %v7052_v8, %v9204_v59  ;;  %vm1219_vm3 = vcmp.eq.s32.totalorder %v7055_v9, %v9204_v59  ;;  %v9680_v60 = vperm.slane %v9604_v42, 0 }
 0x160   : > { %6498 = vmatpush.msk.msrb.mxu3 %vm833_vm4, %v6974_v13  ;;  %6447 = vmatpush.msk.msrb.mxu0 %vm416_vm5, %v6974_v13  ;;  %v3685_v36 = vpop.f32.mrf.mxu0  ;;  %vm320_vm4 = vcmp.eq.s32.totalorder %v7317_v34, %v9055_v0  ;;  %vm832_vm5 = vcmp.eq.s32.totalorder %v7320_v35, %v9055_v0  ;;  %v9829_v6 = vperm.slane %v9604_v42, 3 }
 0x161   : > { %6463 = vmatpush.msk.msrb.mxu1 %vm928_vm6, %v6974_v13  ;;  %v4664_v10 = vrot.slane %v3746_v7, 4  ;;  %v3705_v38 = vpop.f32.mrf.mxu1  ;;  %6483 = vmatpush.msk.msrb.mxu2 %vm289_vm7, %v6974_v13  ;;  %vm675_vm6 = vcmp.eq.s32.totalorder %v7061_v11, %v9204_v59  ;;  %vm1187_vm7 = vcmp.eq.s32.totalorder %v7064_v12, %v9204_v59 }
 0x162   : > { %6499 = vmatpush.msk.msrb.mxu3 %vm801_vm8, %v6974_v13  ;;  %v3706_v39 = vadd.f32 %v3705_v38, %v3685_v36  ;;  %4044 = vmatmul.f32.vlgmr.msra.gmra.mxu2 %v9232_v40  ;;  %vm288_vm8 = vcmp.eq.s32.totalorder %v7022_v1, %v9055_v0 }
 0x163   : > { %4064 = vmatmul.f32.vlgmr.msra.gmra.mxu3 %v9235_v41  ;;  %6532 = vmatpush.msk.msra.mxu2 %vm771_vm9, %v6974_v13  ;;  %vm800_vm9 = vcmp.eq.s32.totalorder %v7347_v37, %v9055_v0 }
 0x164   : > { %6548 = vmatpush.msk.msra.mxu3 %vm1283_vm11, %v6974_v13  ;;  %v4681_v43 = vsel %vm4676_vm10, %v3706_v39, %v4664_v10  ;;  %6448 = vmatpush.msk.msrb.mxu0 %vm384_vm12, %v6974_v13  ;;  %vm770_vm11 = vcmp.eq.s32.totalorder %v7034_v2, %v9269_v44  ;;  %vm1282_vm12 = vcmp.eq.s32.totalorder %v7037_v3, %v9269_v44 }
 0x165   : > { %6464 = vmatpush.msk.msrb.mxu1 %vm896_vm13, %v6974_v13  ;;  %4713 = vst [vmem:[%s8401_s29 + $0x20] sm:$0xff] %v4681_v43  ;;  %6533 = vmatpush.msk.msra.mxu2 %vm739_vm14, %v6974_v13  ;;  %vm643_vm13 = vcmp.eq.s32.totalorder %v7077_v14, %v9204_v59  ;;  %vm1155_vm14 = vcmp.eq.s32.totalorder %v7080_v15, %v9204_v59 }
 0x166   : > { %6549 = vmatpush.msk.msra.mxu3 %vm1251_vm15, %v6974_v13  ;;  %6449 = vmatpush.msk.msrb.mxu0 %vm352_vm0, %v6974_v13  ;;  %vm738_vm15 = vcmp.eq.s32.totalorder %v7040_v4, %v9269_v44  ;;  %vm1250_vm0 = vcmp.eq.s32.totalorder %v7043_v5, %v9269_v44 }
 0x167   : > { %6465 = vmatpush.msk.msrb.mxu1 %vm864_vm1, %v6974_v13  ;;  %6534 = vmatpush.msk.msra.mxu2 %vm707_vm2, %v6974_v13  ;;  %vm611_vm1 = vcmp.eq.s32.totalorder %v7103_v16, %v9204_v59  ;;  %vm1123_vm2 = vcmp.eq.s32.totalorder %v7106_v17, %v9204_v59 }
 0x168   : > { %6550 = vmatpush.msk.msra.mxu3 %vm1219_vm3, %v6974_v13  ;;  %6450 = vmatpush.msk.msrb.mxu0 %vm320_vm4, %v6974_v13  ;;  %vm706_vm3 = vcmp.eq.s32.totalorder %v7052_v8, %v9269_v44  ;;  %vm1218_vm4 = vcmp.eq.s32.totalorder %v7055_v9, %v9269_v44 }
 0x169   : > { %6466 = vmatpush.msk.msrb.mxu1 %vm832_vm5, %v6974_v13  ;;  %6535 = vmatpush.msk.msra.mxu2 %vm675_vm6, %v6974_v13  ;;  %vm579_vm5 = vcmp.eq.s32.totalorder %v7121_v18, %v9204_v59  ;;  %vm1091_vm6 = vcmp.eq.s32.totalorder %v7124_v19, %v9204_v59 }
 0x16a   : > { %6551 = vmatpush.msk.msra.mxu3 %vm1187_vm7, %v6974_v13  ;;  %6451 = vmatpush.msk.msrb.mxu0 %vm288_vm8, %v6974_v13  ;;  %vm674_vm7 = vcmp.eq.s32.totalorder %v7061_v11, %v9269_v44  ;;  %vm1186_vm8 = vcmp.eq.s32.totalorder %v7064_v12, %v9269_v44 }
 0x16b   : > { %6467 = vmatpush.msk.msrb.mxu1 %vm800_vm9, %v6974_v13  ;;  %4004 = vmatmul.f32.vlgmr.msra.gmra.mxu0 %v9232_v40  ;;  %vm547_vm9 = vcmp.eq.s32.totalorder %v7145_v20, %v9204_v59 }
 0x16c   : > { %4024 = vmatmul.f32.vlgmr.msra.gmra.mxu1 %v9235_v41  ;;  %6500 = vmatpush.msk.msra.mxu0 %vm770_vm11, %v6974_v13  ;;  %vm1059_vm11 = vcmp.eq.s32.totalorder %v7148_v21, %v9204_v59 }
 0x16d   : > { %6516 = vmatpush.msk.msra.mxu1 %vm1282_vm12, %v6974_v13  ;;  %6536 = vmatpush.msk.msra.mxu2 %vm643_vm13, %v6974_v13  ;;  %vm642_vm12 = vcmp.eq.s32.totalorder %v7077_v14, %v9269_v44  ;;  %vm1154_vm13 = vcmp.eq.s32.totalorder %v7080_v15, %v9269_v44 }
 0x16e   : > { %6552 = vmatpush.msk.msra.mxu3 %vm1155_vm14, %v6974_v13  ;;  %6501 = vmatpush.msk.msra.mxu0 %vm738_vm15, %v6974_v13  ;;  %vm515_vm14 = vcmp.eq.s32.totalorder %v7169_v22, %v9204_v59  ;;  %vm1027_vm15 = vcmp.eq.s32.totalorder %v7172_v23, %v9204_v59 }
 0x16f   : > { %6517 = vmatpush.msk.msra.mxu1 %vm1250_vm0, %v6974_v13  ;;  %6537 = vmatpush.msk.msra.mxu2 %vm611_vm1, %v6974_v13  ;;  %vm610_vm0 = vcmp.eq.s32.totalorder %v7103_v16, %v9269_v44  ;;  %vm1122_vm1 = vcmp.eq.s32.totalorder %v7106_v17, %v9269_v44 }
 0x170   : > { %6553 = vmatpush.msk.msra.mxu3 %vm1123_vm2, %v6974_v13  ;;  %6502 = vmatpush.msk.msra.mxu0 %vm706_vm3, %v6974_v13  ;;  %vm483_vm2 = vcmp.eq.s32.totalorder %v7193_v24, %v9204_v59  ;;  %vm995_vm3 = vcmp.eq.s32.totalorder %v7196_v25, %v9204_v59 }
 0x171   : > { %6518 = vmatpush.msk.msra.mxu1 %vm1218_vm4, %v6974_v13  ;;  %6538 = vmatpush.msk.msra.mxu2 %vm579_vm5, %v6974_v13  ;;  %vm578_vm4 = vcmp.eq.s32.totalorder %v7121_v18, %v9269_v44  ;;  %vm1090_vm5 = vcmp.eq.s32.totalorder %v7124_v19, %v9269_v44 }
 0x172   : > { %6554 = vmatpush.msk.msra.mxu3 %vm1091_vm6, %v6974_v13  ;;  %6503 = vmatpush.msk.msra.mxu0 %vm674_vm7, %v6974_v13  ;;  %vm451_vm6 = vcmp.eq.s32.totalorder %v7217_v26, %v9204_v59  ;;  %vm963_vm7 = vcmp.eq.s32.totalorder %v7220_v27, %v9204_v59 }
 0x173   : > { %6519 = vmatpush.msk.msra.mxu1 %vm1186_vm8, %v6974_v13  ;;  %6539 = vmatpush.msk.msra.mxu2 %vm547_vm9, %v6974_v13  ;;  %vm546_vm8 = vcmp.eq.s32.totalorder %v7145_v20, %v9269_v44  ;;  %vm1058_vm9 = vcmp.eq.s32.totalorder %v7148_v21, %v9269_v44 }
 0x174   : > { %6555 = vmatpush.msk.msra.mxu3 %vm1059_vm11, %v6974_v13  ;;  %6504 = vmatpush.msk.msra.mxu0 %vm642_vm12, %v6974_v13  ;;  %vm419_vm11 = vcmp.eq.s32.totalorder %v7241_v28, %v9204_v59  ;;  %vm931_vm12 = vcmp.eq.s32.totalorder %v7244_v29, %v9204_v59 }
 0x175   : > { %6520 = vmatpush.msk.msra.mxu1 %vm1154_vm13, %v6974_v13  ;;  %6540 = vmatpush.msk.msra.mxu2 %vm515_vm14, %v6974_v13  ;;  %vm514_vm13 = vcmp.eq.s32.totalorder %v7169_v22, %v9269_v44  ;;  %vm1026_vm14 = vcmp.eq.s32.totalorder %v7172_v23, %v9269_v44 }
 0x176   : > { %6556 = vmatpush.msk.msra.mxu3 %vm1027_vm15, %v6974_v13  ;;  %6505 = vmatpush.msk.msra.mxu0 %vm610_vm0, %v6974_v13  ;;  %vm387_vm15 = vcmp.eq.s32.totalorder %v7266_v30, %v9204_v59  ;;  %vm899_vm0 = vcmp.eq.s32.totalorder %v7269_v31, %v9204_v59 }
 0x177   : > { %6521 = vmatpush.msk.msra.mxu1 %vm1122_vm1, %v6974_v13  ;;  %6541 = vmatpush.msk.msra.mxu2 %vm483_vm2, %v6974_v13  ;;  %vm482_vm1 = vcmp.eq.s32.totalorder %v7193_v24, %v9269_v44  ;;  %vm994_vm2 = vcmp.eq.s32.totalorder %v7196_v25, %v9269_v44 }
 0x178   : > { %6557 = vmatpush.msk.msra.mxu3 %vm995_vm3, %v6974_v13  ;;  %6506 = vmatpush.msk.msra.mxu0 %vm578_vm4, %v6974_v13  ;;  %vm355_vm3 = vcmp.eq.s32.totalorder %v7293_v32, %v9204_v59  ;;  %vm867_vm4 = vcmp.eq.s32.totalorder %v7296_v33, %v9204_v59 }
 0x179   : > { %6522 = vmatpush.msk.msra.mxu1 %vm1090_vm5, %v6974_v13  ;;  %6542 = vmatpush.msk.msra.mxu2 %vm451_vm6, %v6974_v13  ;;  %vm450_vm5 = vcmp.eq.s32.totalorder %v7217_v26, %v9269_v44  ;;  %vm962_vm6 = vcmp.eq.s32.totalorder %v7220_v27, %v9269_v44 }
 0x17a   : > { %6558 = vmatpush.msk.msra.mxu3 %vm963_vm7, %v6974_v13  ;;  %6507 = vmatpush.msk.msra.mxu0 %vm546_vm8, %v6974_v13  ;;  %vm323_vm7 = vcmp.eq.s32.totalorder %v7317_v34, %v9204_v59  ;;  %vm835_vm8 = vcmp.eq.s32.totalorder %v7320_v35, %v9204_v59 }
 0x17b   : > { %6523 = vmatpush.msk.msra.mxu1 %vm1058_vm9, %v6974_v13  ;;  %6543 = vmatpush.msk.msra.mxu2 %vm419_vm11, %v6974_v13  ;;  %vm418_vm9 = vcmp.eq.s32.totalorder %v7241_v28, %v9269_v44  ;;  %vm930_vm11 = vcmp.eq.s32.totalorder %v7244_v29, %v9269_v44 }
 0x17c   : > { %6559 = vmatpush.msk.msra.mxu3 %vm931_vm12, %v6974_v13  ;;  %6508 = vmatpush.msk.msra.mxu0 %vm514_vm13, %v6974_v13  ;;  %vm291_vm12 = vcmp.eq.s32.totalorder %v7022_v1, %v9204_v59  ;;  %vm803_vm13 = vcmp.eq.s32.totalorder %v7347_v37, %v9204_v59 }
 0x17d   : > { %6524 = vmatpush.msk.msra.mxu1 %vm1026_vm14, %v6974_v13  ;;  %6544 = vmatpush.msk.msra.mxu2 %vm387_vm15, %v6974_v13  ;;  %vm773_vm14 = vcmp.eq.s32.totalorder %v7034_v2, %v9418_v45  ;;  %vm1285_vm15 = vcmp.eq.s32.totalorder %v7037_v3, %v9418_v45 }
 0x17e   : > { %6560 = vmatpush.msk.msra.mxu3 %vm899_vm0, %v6974_v13  ;;  %6509 = vmatpush.msk.msra.mxu0 %vm482_vm1, %v6974_v13  ;;  %vm386_vm0 = vcmp.eq.s32.totalorder %v7266_v30, %v9269_v44  ;;  %vm898_vm1 = vcmp.eq.s32.totalorder %v7269_v31, %v9269_v44 }
 0x17f   : > { %6525 = vmatpush.msk.msra.mxu1 %vm994_vm2, %v6974_v13  ;;  %6545 = vmatpush.msk.msra.mxu2 %vm355_vm3, %v6974_v13  ;;  %v3805_v46 = vpop.f32.mrf.mxu2  ;;  %vm741_vm2 = vcmp.eq.s32.totalorder %v7040_v4, %v9418_v45  ;;  %vm1253_vm3 = vcmp.eq.s32.totalorder %v7043_v5, %v9418_v45 }
 0x180   : > { %6561 = vmatpush.msk.msra.mxu3 %vm867_vm4, %v6974_v13  ;;  %v3825_v47 = vpop.f32.mrf.mxu3  ;;  %6510 = vmatpush.msk.msra.mxu0 %vm450_vm5, %v6974_v13  ;;  %vm354_vm4 = vcmp.eq.s32.totalorder %v7293_v32, %v9269_v44  ;;  %vm866_vm5 = vcmp.eq.s32.totalorder %v7296_v33, %v9269_v44 }
 0x181   : > { %6526 = vmatpush.msk.msra.mxu1 %vm962_vm6, %v6974_v13  ;;  %v3826_v48 = vadd.f32 %v3825_v47, %v3805_v46  ;;  %6546 = vmatpush.msk.msra.mxu2 %vm323_vm7, %v6974_v13  ;;  %vm709_vm6 = vcmp.eq.s32.totalorder %v7052_v8, %v9418_v45  ;;  %vm1221_vm7 = vcmp.eq.s32.totalorder %v7055_v9, %v9418_v45  ;;  %v9884_v46 = vperm.slane %v9604_v42, 2 }
 0x182   : > { %6562 = vmatpush.msk.msra.mxu3 %vm835_vm8, %v6974_v13  ;;  %6511 = vmatpush.msk.msra.mxu0 %vm418_vm9, %v6974_v13  ;;  %v3765_v50 = vpop.f32.mrf.mxu0  ;;  %vm322_vm8 = vcmp.eq.s32.totalorder %v7317_v34, %v9269_v44  ;;  %vm834_vm9 = vcmp.eq.s32.totalorder %v7320_v35, %v9269_v44 }
 0x183   : > { %6527 = vmatpush.msk.msra.mxu1 %vm930_vm11, %v6974_v13  ;;  %v4665_v49 = vrot.slane %v3826_v48, 4  ;;  %v3785_v51 = vpop.f32.mrf.mxu1  ;;  %6547 = vmatpush.msk.msra.mxu2 %vm291_vm12, %v6974_v13  ;;  %vm677_vm11 = vcmp.eq.s32.totalorder %v7061_v11, %v9418_v45  ;;  %vm1189_vm12 = vcmp.eq.s32.totalorder %v7064_v12, %v9418_v45 }
 0x184   : > { %6563 = vmatpush.msk.msra.mxu3 %vm803_vm13, %v6974_v13  ;;  %v3786_v52 = vadd.f32 %v3785_v51, %v3765_v50  ;;  %4124 = vmatmul.f32.vlgmr.msrb.gmra.mxu2 %v9232_v40  ;;  %vm290_vm13 = vcmp.eq.s32.totalorder %v7022_v1, %v9269_v44 }
 0x185   : > { %4144 = vmatmul.f32.vlgmr.msrb.gmra.mxu3 %v9235_v41  ;;  %6596 = vmatpush.msk.msrb.mxu2 %vm773_vm14, %v6974_v13  ;;  %vm802_vm14 = vcmp.eq.s32.totalorder %v7347_v37, %v9269_v44 }
 0x186   : > { %6612 = vmatpush.msk.msrb.mxu3 %vm1285_vm15, %v6974_v13  ;;  %v4682_v53 = vsel %vm4676_vm10, %v3786_v52, %v4665_v49  ;;  %6512 = vmatpush.msk.msra.mxu0 %vm386_vm0, %v6974_v13  ;;  %vm772_vm15 = vcmp.eq.s32.totalorder %v7034_v2, %v9473_v54  ;;  %vm1284_vm0 = vcmp.eq.s32.totalorder %v7037_v3, %v9473_v54 }
 0x187   : > { %6528 = vmatpush.msk.msra.mxu1 %vm898_vm1, %v6974_v13  ;;  %4714 = vst [vmem:[%s8401_s29 + $0x28] sm:$0xff] %v4682_v53  ;;  %6597 = vmatpush.msk.msrb.mxu2 %vm741_vm2, %v6974_v13  ;;  %vm645_vm1 = vcmp.eq.s32.totalorder %v7077_v14, %v9418_v45  ;;  %vm1157_vm2 = vcmp.eq.s32.totalorder %v7080_v15, %v9418_v45  ;;  %v10061_v53 = vld.sshfl [vmem:[#allocation1] sm:$0xff pattern:$0x75316420] }
 0x188   : > { %6613 = vmatpush.msk.msrb.mxu3 %vm1253_vm3, %v6974_v13  ;;  %6513 = vmatpush.msk.msra.mxu0 %vm354_vm4, %v6974_v13  ;;  %vm740_vm3 = vcmp.eq.s32.totalorder %v7040_v4, %v9473_v54  ;;  %vm1252_vm4 = vcmp.eq.s32.totalorder %v7043_v5, %v9473_v54 }
 0x189   : > { %6529 = vmatpush.msk.msra.mxu1 %vm866_vm5, %v6974_v13  ;;  %6598 = vmatpush.msk.msrb.mxu2 %vm709_vm6, %v6974_v13  ;;  %vm613_vm5 = vcmp.eq.s32.totalorder %v7103_v16, %v9418_v45  ;;  %vm1125_vm6 = vcmp.eq.s32.totalorder %v7106_v17, %v9418_v45 }
 0x18a   : > { %6614 = vmatpush.msk.msrb.mxu3 %vm1221_vm7, %v6974_v13  ;;  %6514 = vmatpush.msk.msra.mxu0 %vm322_vm8, %v6974_v13  ;;  %vm708_vm7 = vcmp.eq.s32.totalorder %v7052_v8, %v9473_v54  ;;  %vm1220_vm8 = vcmp.eq.s32.totalorder %v7055_v9, %v9473_v54 }
 0x18b   : > { %6530 = vmatpush.msk.msra.mxu1 %vm834_vm9, %v6974_v13  ;;  %6599 = vmatpush.msk.msrb.mxu2 %vm677_vm11, %v6974_v13  ;;  %vm581_vm9 = vcmp.eq.s32.totalorder %v7121_v18, %v9418_v45  ;;  %vm1093_vm11 = vcmp.eq.s32.totalorder %v7124_v19, %v9418_v45 }
 0x18c   : > { %6615 = vmatpush.msk.msrb.mxu3 %vm1189_vm12, %v6974_v13  ;;  %6515 = vmatpush.msk.msra.mxu0 %vm290_vm13, %v6974_v13  ;;  %vm676_vm12 = vcmp.eq.s32.totalorder %v7061_v11, %v9473_v54  ;;  %vm1188_vm13 = vcmp.eq.s32.totalorder %v7064_v12, %v9473_v54 }
 0x18d   : > { %6531 = vmatpush.msk.msra.mxu1 %vm802_vm14, %v6974_v13  ;;  %4084 = vmatmul.f32.vlgmr.msrb.gmra.mxu0 %v9232_v40  ;;  %vm549_vm14 = vcmp.eq.s32.totalorder %v7145_v20, %v9418_v45 }
 0x18e   : > { %4104 = vmatmul.f32.vlgmr.msrb.gmra.mxu1 %v9235_v41  ;;  %6564 = vmatpush.msk.msrb.mxu0 %vm772_vm15, %v6974_v13  ;;  %vm1061_vm15 = vcmp.eq.s32.totalorder %v7148_v21, %v9418_v45 }
 0x18f   : > { %6580 = vmatpush.msk.msrb.mxu1 %vm1284_vm0, %v6974_v13  ;;  %6600 = vmatpush.msk.msrb.mxu2 %vm645_vm1, %v6974_v13  ;;  %vm644_vm0 = vcmp.eq.s32.totalorder %v7077_v14, %v9473_v54  ;;  %vm1156_vm1 = vcmp.eq.s32.totalorder %v7080_v15, %v9473_v54 }
 0x190   : > { %6616 = vmatpush.msk.msrb.mxu3 %vm1157_vm2, %v6974_v13  ;;  %6565 = vmatpush.msk.msrb.mxu0 %vm740_vm3, %v6974_v13  ;;  %vm517_vm2 = vcmp.eq.s32.totalorder %v7169_v22, %v9418_v45  ;;  %vm1029_vm3 = vcmp.eq.s32.totalorder %v7172_v23, %v9418_v45 }
 0x191   : > { %6581 = vmatpush.msk.msrb.mxu1 %vm1252_vm4, %v6974_v13  ;;  %6601 = vmatpush.msk.msrb.mxu2 %vm613_vm5, %v6974_v13  ;;  %vm612_vm4 = vcmp.eq.s32.totalorder %v7103_v16, %v9473_v54  ;;  %vm1124_vm5 = vcmp.eq.s32.totalorder %v7106_v17, %v9473_v54 }
 0x192   : > { %6617 = vmatpush.msk.msrb.mxu3 %vm1125_vm6, %v6974_v13  ;;  %6566 = vmatpush.msk.msrb.mxu0 %vm708_vm7, %v6974_v13  ;;  %vm485_vm6 = vcmp.eq.s32.totalorder %v7193_v24, %v9418_v45  ;;  %vm997_vm7 = vcmp.eq.s32.totalorder %v7196_v25, %v9418_v45 }
 0x193   : > { %6582 = vmatpush.msk.msrb.mxu1 %vm1220_vm8, %v6974_v13  ;;  %6602 = vmatpush.msk.msrb.mxu2 %vm581_vm9, %v6974_v13  ;;  %vm580_vm8 = vcmp.eq.s32.totalorder %v7121_v18, %v9473_v54  ;;  %vm1092_vm9 = vcmp.eq.s32.totalorder %v7124_v19, %v9473_v54 }
 0x194   : > { %6618 = vmatpush.msk.msrb.mxu3 %vm1093_vm11, %v6974_v13  ;;  %6567 = vmatpush.msk.msrb.mxu0 %vm676_vm12, %v6974_v13  ;;  %vm453_vm11 = vcmp.eq.s32.totalorder %v7217_v26, %v9418_v45  ;;  %vm965_vm12 = vcmp.eq.s32.totalorder %v7220_v27, %v9418_v45 }
 0x195   : > { %6583 = vmatpush.msk.msrb.mxu1 %vm1188_vm13, %v6974_v13  ;;  %6603 = vmatpush.msk.msrb.mxu2 %vm549_vm14, %v6974_v13  ;;  %vm548_vm13 = vcmp.eq.s32.totalorder %v7145_v20, %v9473_v54  ;;  %vm1060_vm14 = vcmp.eq.s32.totalorder %v7148_v21, %v9473_v54 }
 0x196   : > { %6619 = vmatpush.msk.msrb.mxu3 %vm1061_vm15, %v6974_v13  ;;  %6568 = vmatpush.msk.msrb.mxu0 %vm644_vm0, %v6974_v13  ;;  %vm421_vm15 = vcmp.eq.s32.totalorder %v7241_v28, %v9418_v45  ;;  %vm933_vm0 = vcmp.eq.s32.totalorder %v7244_v29, %v9418_v45 }
 0x197   : > { %6584 = vmatpush.msk.msrb.mxu1 %vm1156_vm1, %v6974_v13  ;;  %6604 = vmatpush.msk.msrb.mxu2 %vm517_vm2, %v6974_v13  ;;  %vm516_vm1 = vcmp.eq.s32.totalorder %v7169_v22, %v9473_v54  ;;  %vm1028_vm2 = vcmp.eq.s32.totalorder %v7172_v23, %v9473_v54 }
 0x198   : > { %6620 = vmatpush.msk.msrb.mxu3 %vm1029_vm3, %v6974_v13  ;;  %6569 = vmatpush.msk.msrb.mxu0 %vm612_vm4, %v6974_v13  ;;  %vm389_vm3 = vcmp.eq.s32.totalorder %v7266_v30, %v9418_v45  ;;  %vm901_vm4 = vcmp.eq.s32.totalorder %v7269_v31, %v9418_v45 }
 0x199   : > { %6585 = vmatpush.msk.msrb.mxu1 %vm1124_vm5, %v6974_v13  ;;  %6605 = vmatpush.msk.msrb.mxu2 %vm485_vm6, %v6974_v13  ;;  %vm484_vm5 = vcmp.eq.s32.totalorder %v7193_v24, %v9473_v54  ;;  %vm996_vm6 = vcmp.eq.s32.totalorder %v7196_v25, %v9473_v54 }
 0x19a   : > { %6621 = vmatpush.msk.msrb.mxu3 %vm997_vm7, %v6974_v13  ;;  %6570 = vmatpush.msk.msrb.mxu0 %vm580_vm8, %v6974_v13  ;;  %vm357_vm7 = vcmp.eq.s32.totalorder %v7293_v32, %v9418_v45  ;;  %vm869_vm8 = vcmp.eq.s32.totalorder %v7296_v33, %v9418_v45 }
 0x19b   : > { %6586 = vmatpush.msk.msrb.mxu1 %vm1092_vm9, %v6974_v13  ;;  %6606 = vmatpush.msk.msrb.mxu2 %vm453_vm11, %v6974_v13  ;;  %vm452_vm9 = vcmp.eq.s32.totalorder %v7217_v26, %v9473_v54  ;;  %vm964_vm11 = vcmp.eq.s32.totalorder %v7220_v27, %v9473_v54 }
 0x19c   : > { %6622 = vmatpush.msk.msrb.mxu3 %vm965_vm12, %v6974_v13  ;;  %6571 = vmatpush.msk.msrb.mxu0 %vm548_vm13, %v6974_v13  ;;  %vm325_vm12 = vcmp.eq.s32.totalorder %v7317_v34, %v9418_v45  ;;  %vm837_vm13 = vcmp.eq.s32.totalorder %v7320_v35, %v9418_v45 }
 0x19d   : > { %6587 = vmatpush.msk.msrb.mxu1 %vm1060_vm14, %v6974_v13  ;;  %6607 = vmatpush.msk.msrb.mxu2 %vm421_vm15, %v6974_v13  ;;  %vm420_vm14 = vcmp.eq.s32.totalorder %v7241_v28, %v9473_v54  ;;  %vm932_vm15 = vcmp.eq.s32.totalorder %v7244_v29, %v9473_v54 }
 0x19e   : > { %6623 = vmatpush.msk.msrb.mxu3 %vm933_vm0, %v6974_v13  ;;  %6572 = vmatpush.msk.msrb.mxu0 %vm516_vm1, %v6974_v13  ;;  %vm293_vm0 = vcmp.eq.s32.totalorder %v7022_v1, %v9418_v45  ;;  %vm805_vm1 = vcmp.eq.s32.totalorder %v7347_v37, %v9418_v45 }
 0x19f   : > { %6588 = vmatpush.msk.msrb.mxu1 %vm1028_vm2, %v6974_v13  ;;  %6608 = vmatpush.msk.msrb.mxu2 %vm389_vm3, %v6974_v13  ;;  %vm775_vm2 = vcmp.eq.s32.totalorder %v7034_v2, %v9625_v55  ;;  %vm1287_vm3 = vcmp.eq.s32.totalorder %v7037_v3, %v9625_v55 }
 0x1a0   : > { %6624 = vmatpush.msk.msrb.mxu3 %vm901_vm4, %v6974_v13  ;;  %6573 = vmatpush.msk.msrb.mxu0 %vm484_vm5, %v6974_v13  ;;  %vm388_vm4 = vcmp.eq.s32.totalorder %v7266_v30, %v9473_v54  ;;  %vm900_vm5 = vcmp.eq.s32.totalorder %v7269_v31, %v9473_v54 }
 0x1a1   : > { %6589 = vmatpush.msk.msrb.mxu1 %vm996_vm6, %v6974_v13  ;;  %6609 = vmatpush.msk.msrb.mxu2 %vm357_vm7, %v6974_v13  ;;  %v3885_v56 = vpop.f32.mrf.mxu2  ;;  %vm743_vm6 = vcmp.eq.s32.totalorder %v7040_v4, %v9625_v55  ;;  %vm1255_vm7 = vcmp.eq.s32.totalorder %v7043_v5, %v9625_v55 }
 0x1a2   : > { %6625 = vmatpush.msk.msrb.mxu3 %vm869_vm8, %v6974_v13  ;;  %v3905_v57 = vpop.f32.mrf.mxu3  ;;  %6574 = vmatpush.msk.msrb.mxu0 %vm452_vm9, %v6974_v13  ;;  %vm356_vm8 = vcmp.eq.s32.totalorder %v7293_v32, %v9473_v54  ;;  %vm868_vm9 = vcmp.eq.s32.totalorder %v7296_v33, %v9473_v54 }
 0x1a3   : > { %6590 = vmatpush.msk.msrb.mxu1 %vm964_vm11, %v6974_v13  ;;  %v3906_v58 = vadd.f32 %v3905_v57, %v3885_v56  ;;  %6610 = vmatpush.msk.msrb.mxu2 %vm325_vm12, %v6974_v13  ;;  %vm711_vm11 = vcmp.eq.s32.totalorder %v7052_v8, %v9625_v55  ;;  %vm1223_vm12 = vcmp.eq.s32.totalorder %v7055_v9, %v9625_v55  ;;  %v10098_v56 = vperm.slane %v9604_v42, 4 }
 0x1a4   : > { %6626 = vmatpush.msk.msrb.mxu3 %vm837_vm13, %v6974_v13  ;;  %6575 = vmatpush.msk.msrb.mxu0 %vm420_vm14, %v6974_v13  ;;  %v3845_v62 = vpop.f32.mrf.mxu0  ;;  %vm324_vm13 = vcmp.eq.s32.totalorder %v7317_v34, %v9473_v54  ;;  %vm836_vm14 = vcmp.eq.s32.totalorder %v7320_v35, %v9473_v54  ;;  %v10247_v57 = vperm.slane %v9604_v42, 7 }
 0x1a5   : > { %6591 = vmatpush.msk.msrb.mxu1 %vm932_vm15, %v6974_v13  ;;  %v4666_v61 = vrot.slane %v3906_v58, 4  ;;  %v3865_v63 = vpop.f32.mrf.mxu1  ;;  %6611 = vmatpush.msk.msrb.mxu2 %vm293_vm0, %v6974_v13  ;;  %vm679_vm15 = vcmp.eq.s32.totalorder %v7061_v11, %v9625_v55  ;;  %vm1191_vm0 = vcmp.eq.s32.totalorder %v7064_v12, %v9625_v55 }
 0x1a6   : > { %6627 = vmatpush.msk.msrb.mxu3 %vm805_vm1, %v6974_v13  ;;  %v3866_v0 = vadd.f32 %v3865_v63, %v3845_v62  ;;  %4204 = vmatmul.f32.vlgmr.msra.gmra.mxu2 %v9232_v40  ;;  %vm292_vm1 = vcmp.eq.s32.totalorder %v7022_v1, %v9473_v54 }
 0x1a7   : > { %4224 = vmatmul.f32.vlgmr.msra.gmra.mxu3 %v9235_v41  ;;  %6660 = vmatpush.msk.msra.mxu2 %vm775_vm2, %v6974_v13  ;;  %vm804_vm2 = vcmp.eq.s32.totalorder %v7347_v37, %v9473_v54  ;;  %v10064_v54 = vld.sshfl [vmem:[#allocation1 + $0x8] sm:$0xff pattern:$0x75316420] }
 0x1a8   : > { %6676 = vmatpush.msk.msra.mxu3 %vm1287_vm3, %v6974_v13  ;;  %v4683_v59 = vsel %vm4676_vm10, %v3866_v0, %v4666_v61  ;;  %6576 = vmatpush.msk.msrb.mxu0 %vm388_vm4, %v6974_v13  ;;  %vm774_vm3 = vcmp.eq.s32.totalorder %v7034_v2, %v9680_v60  ;;  %vm1286_vm4 = vcmp.eq.s32.totalorder %v7037_v3, %v9680_v60 }
 0x1a9   : > { %6592 = vmatpush.msk.msrb.mxu1 %vm900_vm5, %v6974_v13  ;;  %4715 = vst [vmem:[%s8401_s29 + $0x30] sm:$0xff] %v4683_v59  ;;  %6661 = vmatpush.msk.msra.mxu2 %vm743_vm6, %v6974_v13  ;;  %vm647_vm5 = vcmp.eq.s32.totalorder %v7077_v14, %v9625_v55  ;;  %vm1159_vm6 = vcmp.eq.s32.totalorder %v7080_v15, %v9625_v55 }
 0x1aa   : > { %6677 = vmatpush.msk.msra.mxu3 %vm1255_vm7, %v6974_v13  ;;  %6577 = vmatpush.msk.msrb.mxu0 %vm356_vm8, %v6974_v13  ;;  %vm742_vm7 = vcmp.eq.s32.totalorder %v7040_v4, %v9680_v60  ;;  %vm1254_vm8 = vcmp.eq.s32.totalorder %v7043_v5, %v9680_v60 }
 0x1ab   : > { %6593 = vmatpush.msk.msrb.mxu1 %vm868_vm9, %v6974_v13  ;;  %6662 = vmatpush.msk.msra.mxu2 %vm711_vm11, %v6974_v13  ;;  %vm615_vm9 = vcmp.eq.s32.totalorder %v7103_v16, %v9625_v55  ;;  %vm1127_vm11 = vcmp.eq.s32.totalorder %v7106_v17, %v9625_v55 }
 0x1ac   : > { %6678 = vmatpush.msk.msra.mxu3 %vm1223_vm12, %v6974_v13  ;;  %6578 = vmatpush.msk.msrb.mxu0 %vm324_vm13, %v6974_v13  ;;  %vm710_vm12 = vcmp.eq.s32.totalorder %v7052_v8, %v9680_v60  ;;  %vm1222_vm13 = vcmp.eq.s32.totalorder %v7055_v9, %v9680_v60 }
 0x1ad   : > { %6594 = vmatpush.msk.msrb.mxu1 %vm836_vm14, %v6974_v13  ;;  %6663 = vmatpush.msk.msra.mxu2 %vm679_vm15, %v6974_v13  ;;  %vm583_vm14 = vcmp.eq.s32.totalorder %v7121_v18, %v9625_v55  ;;  %vm1095_vm15 = vcmp.eq.s32.totalorder %v7124_v19, %v9625_v55 }
 0x1ae   : > { %6679 = vmatpush.msk.msra.mxu3 %vm1191_vm0, %v6974_v13  ;;  %6579 = vmatpush.msk.msrb.mxu0 %vm292_vm1, %v6974_v13  ;;  %vm678_vm0 = vcmp.eq.s32.totalorder %v7061_v11, %v9680_v60  ;;  %vm1190_vm1 = vcmp.eq.s32.totalorder %v7064_v12, %v9680_v60 }
 0x1af   : > { %6595 = vmatpush.msk.msrb.mxu1 %vm804_vm2, %v6974_v13  ;;  %4164 = vmatmul.f32.vlgmr.msra.gmra.mxu0 %v9232_v40  ;;  %vm551_vm2 = vcmp.eq.s32.totalorder %v7145_v20, %v9625_v55 }
 0x1b0   : > { %4184 = vmatmul.f32.vlgmr.msra.gmra.mxu1 %v9235_v41  ;;  %6628 = vmatpush.msk.msra.mxu0 %vm774_vm3, %v6974_v13  ;;  %vm1063_vm3 = vcmp.eq.s32.totalorder %v7148_v21, %v9625_v55 }
 0x1b1   : > { %6644 = vmatpush.msk.msra.mxu1 %vm1286_vm4, %v6974_v13  ;;  %6664 = vmatpush.msk.msra.mxu2 %vm647_vm5, %v6974_v13  ;;  %vm646_vm4 = vcmp.eq.s32.totalorder %v7077_v14, %v9680_v60  ;;  %vm1158_vm5 = vcmp.eq.s32.totalorder %v7080_v15, %v9680_v60 }
 0x1b2   : > { %6680 = vmatpush.msk.msra.mxu3 %vm1159_vm6, %v6974_v13  ;;  %6629 = vmatpush.msk.msra.mxu0 %vm742_vm7, %v6974_v13  ;;  %vm519_vm6 = vcmp.eq.s32.totalorder %v7169_v22, %v9625_v55  ;;  %vm1031_vm7 = vcmp.eq.s32.totalorder %v7172_v23, %v9625_v55 }
 0x1b3   : > { %6645 = vmatpush.msk.msra.mxu1 %vm1254_vm8, %v6974_v13  ;;  %6665 = vmatpush.msk.msra.mxu2 %vm615_vm9, %v6974_v13  ;;  %vm614_vm8 = vcmp.eq.s32.totalorder %v7103_v16, %v9680_v60  ;;  %vm1126_vm9 = vcmp.eq.s32.totalorder %v7106_v17, %v9680_v60 }
 0x1b4   : > { %6681 = vmatpush.msk.msra.mxu3 %vm1127_vm11, %v6974_v13  ;;  %6630 = vmatpush.msk.msra.mxu0 %vm710_vm12, %v6974_v13  ;;  %vm487_vm11 = vcmp.eq.s32.totalorder %v7193_v24, %v9625_v55  ;;  %vm999_vm12 = vcmp.eq.s32.totalorder %v7196_v25, %v9625_v55 }
 0x1b5   : > { %6646 = vmatpush.msk.msra.mxu1 %vm1222_vm13, %v6974_v13  ;;  %6666 = vmatpush.msk.msra.mxu2 %vm583_vm14, %v6974_v13  ;;  %vm582_vm13 = vcmp.eq.s32.totalorder %v7121_v18, %v9680_v60  ;;  %vm1094_vm14 = vcmp.eq.s32.totalorder %v7124_v19, %v9680_v60 }
 0x1b6   : > { %6682 = vmatpush.msk.msra.mxu3 %vm1095_vm15, %v6974_v13  ;;  %6631 = vmatpush.msk.msra.mxu0 %vm678_vm0, %v6974_v13  ;;  %vm455_vm15 = vcmp.eq.s32.totalorder %v7217_v26, %v9625_v55  ;;  %vm967_vm0 = vcmp.eq.s32.totalorder %v7220_v27, %v9625_v55 }
 0x1b7   : > { %6647 = vmatpush.msk.msra.mxu1 %vm1190_vm1, %v6974_v13  ;;  %6667 = vmatpush.msk.msra.mxu2 %vm551_vm2, %v6974_v13  ;;  %vm550_vm1 = vcmp.eq.s32.totalorder %v7145_v20, %v9680_v60  ;;  %vm1062_vm2 = vcmp.eq.s32.totalorder %v7148_v21, %v9680_v60 }
 0x1b8   : > { %6683 = vmatpush.msk.msra.mxu3 %vm1063_vm3, %v6974_v13  ;;  %6632 = vmatpush.msk.msra.mxu0 %vm646_vm4, %v6974_v13  ;;  %vm423_vm3 = vcmp.eq.s32.totalorder %v7241_v28, %v9625_v55  ;;  %vm935_vm4 = vcmp.eq.s32.totalorder %v7244_v29, %v9625_v55 }
 0x1b9   : > { %6648 = vmatpush.msk.msra.mxu1 %vm1158_vm5, %v6974_v13  ;;  %6668 = vmatpush.msk.msra.mxu2 %vm519_vm6, %v6974_v13  ;;  %vm518_vm5 = vcmp.eq.s32.totalorder %v7169_v22, %v9680_v60  ;;  %vm1030_vm6 = vcmp.eq.s32.totalorder %v7172_v23, %v9680_v60 }
 0x1ba   : > { %6684 = vmatpush.msk.msra.mxu3 %vm1031_vm7, %v6974_v13  ;;  %6633 = vmatpush.msk.msra.mxu0 %vm614_vm8, %v6974_v13  ;;  %vm391_vm7 = vcmp.eq.s32.totalorder %v7266_v30, %v9625_v55  ;;  %vm903_vm8 = vcmp.eq.s32.totalorder %v7269_v31, %v9625_v55 }
 0x1bb   : > { %6649 = vmatpush.msk.msra.mxu1 %vm1126_vm9, %v6974_v13  ;;  %6669 = vmatpush.msk.msra.mxu2 %vm487_vm11, %v6974_v13  ;;  %vm486_vm9 = vcmp.eq.s32.totalorder %v7193_v24, %v9680_v60  ;;  %vm998_vm11 = vcmp.eq.s32.totalorder %v7196_v25, %v9680_v60 }
 0x1bc   : > { %6685 = vmatpush.msk.msra.mxu3 %vm999_vm12, %v6974_v13  ;;  %6634 = vmatpush.msk.msra.mxu0 %vm582_vm13, %v6974_v13  ;;  %vm359_vm12 = vcmp.eq.s32.totalorder %v7293_v32, %v9625_v55  ;;  %vm871_vm13 = vcmp.eq.s32.totalorder %v7296_v33, %v9625_v55 }
 0x1bd   : > { %6650 = vmatpush.msk.msra.mxu1 %vm1094_vm14, %v6974_v13  ;;  %6670 = vmatpush.msk.msra.mxu2 %vm455_vm15, %v6974_v13  ;;  %vm454_vm14 = vcmp.eq.s32.totalorder %v7217_v26, %v9680_v60  ;;  %vm966_vm15 = vcmp.eq.s32.totalorder %v7220_v27, %v9680_v60 }
 0x1be   : > { %6686 = vmatpush.msk.msra.mxu3 %vm967_vm0, %v6974_v13  ;;  %6635 = vmatpush.msk.msra.mxu0 %vm550_vm1, %v6974_v13  ;;  %vm327_vm0 = vcmp.eq.s32.totalorder %v7317_v34, %v9625_v55  ;;  %vm839_vm1 = vcmp.eq.s32.totalorder %v7320_v35, %v9625_v55 }
 0x1bf   : > { %6651 = vmatpush.msk.msra.mxu1 %vm1062_vm2, %v6974_v13  ;;  %6671 = vmatpush.msk.msra.mxu2 %vm423_vm3, %v6974_v13  ;;  %vm422_vm2 = vcmp.eq.s32.totalorder %v7241_v28, %v9680_v60  ;;  %vm934_vm3 = vcmp.eq.s32.totalorder %v7244_v29, %v9680_v60 }
 0x1c0   : > { %6687 = vmatpush.msk.msra.mxu3 %vm935_vm4, %v6974_v13  ;;  %6636 = vmatpush.msk.msra.mxu0 %vm518_vm5, %v6974_v13  ;;  %vm295_vm4 = vcmp.eq.s32.totalorder %v7022_v1, %v9625_v55  ;;  %vm807_vm5 = vcmp.eq.s32.totalorder %v7347_v37, %v9625_v55 }
 0x1c1   : > { %6652 = vmatpush.msk.msra.mxu1 %vm1030_vm6, %v6974_v13  ;;  %6672 = vmatpush.msk.msra.mxu2 %vm391_vm7, %v6974_v13  ;;  %vm777_vm6 = vcmp.eq.s32.totalorder %v7034_v2, %v9829_v6  ;;  %vm1289_vm7 = vcmp.eq.s32.totalorder %v7037_v3, %v9829_v6 }
 0x1c2   : > { %6688 = vmatpush.msk.msra.mxu3 %vm903_vm8, %v6974_v13  ;;  %6637 = vmatpush.msk.msra.mxu0 %vm486_vm9, %v6974_v13  ;;  %vm390_vm8 = vcmp.eq.s32.totalorder %v7266_v30, %v9680_v60  ;;  %vm902_vm9 = vcmp.eq.s32.totalorder %v7269_v31, %v9680_v60 }
 0x1c3   : > { %6653 = vmatpush.msk.msra.mxu1 %vm998_vm11, %v6974_v13  ;;  %6673 = vmatpush.msk.msra.mxu2 %vm359_vm12, %v6974_v13  ;;  %v3965_v7 = vpop.f32.mrf.mxu2  ;;  %vm745_vm11 = vcmp.eq.s32.totalorder %v7040_v4, %v9829_v6  ;;  %vm1257_vm12 = vcmp.eq.s32.totalorder %v7043_v5, %v9829_v6 }
 0x1c4   : > { %6689 = vmatpush.msk.msra.mxu3 %vm871_vm13, %v6974_v13  ;;  %v3985_v10 = vpop.f32.mrf.mxu3  ;;  %6638 = vmatpush.msk.msra.mxu0 %vm454_vm14, %v6974_v13  ;;  %vm358_vm13 = vcmp.eq.s32.totalorder %v7293_v32, %v9680_v60  ;;  %vm870_vm14 = vcmp.eq.s32.totalorder %v7296_v33, %v9680_v60 }
 0x1c5   : > { %6654 = vmatpush.msk.msra.mxu1 %vm966_vm15, %v6974_v13  ;;  %v3986_v36 = vadd.f32 %v3985_v10, %v3965_v7  ;;  %6674 = vmatpush.msk.msra.mxu2 %vm327_vm0, %v6974_v13  ;;  %vm713_vm15 = vcmp.eq.s32.totalorder %v7052_v8, %v9829_v6  ;;  %vm1225_vm0 = vcmp.eq.s32.totalorder %v7055_v9, %v9829_v6  ;;  %v10302_v7 = vperm.slane %v9604_v42, 6 }
 0x1c6   : > { %6690 = vmatpush.msk.msra.mxu3 %vm839_vm1, %v6974_v13  ;;  %6639 = vmatpush.msk.msra.mxu0 %vm422_vm2, %v6974_v13  ;;  %v3925_v39 = vpop.f32.mrf.mxu0  ;;  %vm326_vm1 = vcmp.eq.s32.totalorder %v7317_v34, %v9680_v60  ;;  %vm838_vm2 = vcmp.eq.s32.totalorder %v7320_v35, %v9680_v60 }
 0x1c7   : > { %6655 = vmatpush.msk.msra.mxu1 %vm934_vm3, %v6974_v13  ;;  %v4667_v38 = vrot.slane %v3986_v36, 4  ;;  %v3945_v43 = vpop.f32.mrf.mxu1  ;;  %6675 = vmatpush.msk.msra.mxu2 %vm295_vm4, %v6974_v13  ;;  %vm681_vm3 = vcmp.eq.s32.totalorder %v7061_v11, %v9829_v6  ;;  %vm1193_vm4 = vcmp.eq.s32.totalorder %v7064_v12, %v9829_v6 }
 0x1c8   : > { %6691 = vmatpush.msk.msra.mxu3 %vm807_vm5, %v6974_v13  ;;  %v3946_v44 = vadd.f32 %v3945_v43, %v3925_v39  ;;  %4284 = vmatmul.f32.vlgmr.msrb.gmra.mxu2 %v9232_v40  ;;  %vm294_vm5 = vcmp.eq.s32.totalorder %v7022_v1, %v9680_v60 }
 0x1c9   : > { %4304 = vmatmul.f32.vlgmr.msrb.gmra.mxu3 %v9235_v41  ;;  %6724 = vmatpush.msk.msrb.mxu2 %vm777_vm6, %v6974_v13  ;;  %vm806_vm6 = vcmp.eq.s32.totalorder %v7347_v37, %v9680_v60 }
 0x1ca   : > { %6740 = vmatpush.msk.msrb.mxu3 %vm1289_vm7, %v6974_v13  ;;  %v4684_v45 = vsel %vm4676_vm10, %v3946_v44, %v4667_v38  ;;  %6640 = vmatpush.msk.msra.mxu0 %vm390_vm8, %v6974_v13  ;;  %vm776_vm7 = vcmp.eq.s32.totalorder %v7034_v2, %v9884_v46  ;;  %vm1288_vm8 = vcmp.eq.s32.totalorder %v7037_v3, %v9884_v46 }
 0x1cb   : > { %6656 = vmatpush.msk.msra.mxu1 %vm902_vm9, %v6974_v13  ;;  %4716 = vst [vmem:[%s8401_s29 + $0x38] sm:$0xff] %v4684_v45  ;;  %6725 = vmatpush.msk.msrb.mxu2 %vm745_vm11, %v6974_v13  ;;  %vm649_vm9 = vcmp.eq.s32.totalorder %v7077_v14, %v9829_v6  ;;  %vm1161_vm11 = vcmp.eq.s32.totalorder %v7080_v15, %v9829_v6 }
 0x1cc   : > { %6741 = vmatpush.msk.msrb.mxu3 %vm1257_vm12, %v6974_v13  ;;  %6641 = vmatpush.msk.msra.mxu0 %vm358_vm13, %v6974_v13  ;;  %vm744_vm12 = vcmp.eq.s32.totalorder %v7040_v4, %v9884_v46  ;;  %vm1256_vm13 = vcmp.eq.s32.totalorder %v7043_v5, %v9884_v46 }
 0x1cd   : > { %6657 = vmatpush.msk.msra.mxu1 %vm870_vm14, %v6974_v13  ;;  %6726 = vmatpush.msk.msrb.mxu2 %vm713_vm15, %v6974_v13  ;;  %vm617_vm14 = vcmp.eq.s32.totalorder %v7103_v16, %v9829_v6  ;;  %vm1129_vm15 = vcmp.eq.s32.totalorder %v7106_v17, %v9829_v6 }
 0x1ce   : > { %6742 = vmatpush.msk.msrb.mxu3 %vm1225_vm0, %v6974_v13  ;;  %6642 = vmatpush.msk.msra.mxu0 %vm326_vm1, %v6974_v13  ;;  %vm712_vm0 = vcmp.eq.s32.totalorder %v7052_v8, %v9884_v46  ;;  %vm1224_vm1 = vcmp.eq.s32.totalorder %v7055_v9, %v9884_v46 }
 0x1cf   : > { %6658 = vmatpush.msk.msra.mxu1 %vm838_vm2, %v6974_v13  ;;  %6727 = vmatpush.msk.msrb.mxu2 %vm681_vm3, %v6974_v13  ;;  %vm585_vm2 = vcmp.eq.s32.totalorder %v7121_v18, %v9829_v6  ;;  %vm1097_vm3 = vcmp.eq.s32.totalorder %v7124_v19, %v9829_v6 }
 0x1d0   : > { %6743 = vmatpush.msk.msrb.mxu3 %vm1193_vm4, %v6974_v13  ;;  %6643 = vmatpush.msk.msra.mxu0 %vm294_vm5, %v6974_v13  ;;  %vm680_vm4 = vcmp.eq.s32.totalorder %v7061_v11, %v9884_v46  ;;  %vm1192_vm5 = vcmp.eq.s32.totalorder %v7064_v12, %v9884_v46 }
 0x1d1   : > { %6659 = vmatpush.msk.msra.mxu1 %vm806_vm6, %v6974_v13  ;;  %4244 = vmatmul.f32.vlgmr.msrb.gmra.mxu0 %v9232_v40  ;;  %vm553_vm6 = vcmp.eq.s32.totalorder %v7145_v20, %v9829_v6  ;;  %v10033_v40 = vperm.slane %v9604_v42, 5 }
 0x1d2   : > { %4264 = vmatmul.f32.vlgmr.msrb.gmra.mxu1 %v9235_v41  ;;  %6692 = vmatpush.msk.msrb.mxu0 %vm776_vm7, %v6974_v13  ;;  %vm1065_vm7 = vcmp.eq.s32.totalorder %v7148_v21, %v9829_v6 }
 0x1d3   : > { %6708 = vmatpush.msk.msrb.mxu1 %vm1288_vm8, %v6974_v13  ;;  %6728 = vmatpush.msk.msrb.mxu2 %vm649_vm9, %v6974_v13  ;;  %vm648_vm8 = vcmp.eq.s32.totalorder %v7077_v14, %v9884_v46  ;;  %vm1160_vm9 = vcmp.eq.s32.totalorder %v7080_v15, %v9884_v46 }
 0x1d4   : > { %6744 = vmatpush.msk.msrb.mxu3 %vm1161_vm11, %v6974_v13  ;;  %6693 = vmatpush.msk.msrb.mxu0 %vm744_vm12, %v6974_v13  ;;  %vm521_vm11 = vcmp.eq.s32.totalorder %v7169_v22, %v9829_v6  ;;  %vm1033_vm12 = vcmp.eq.s32.totalorder %v7172_v23, %v9829_v6 }
 0x1d5   : > { %6709 = vmatpush.msk.msrb.mxu1 %vm1256_vm13, %v6974_v13  ;;  %6729 = vmatpush.msk.msrb.mxu2 %vm617_vm14, %v6974_v13  ;;  %vm616_vm13 = vcmp.eq.s32.totalorder %v7103_v16, %v9884_v46  ;;  %vm1128_vm14 = vcmp.eq.s32.totalorder %v7106_v17, %v9884_v46 }
 0x1d6   : > { %6745 = vmatpush.msk.msrb.mxu3 %vm1129_vm15, %v6974_v13  ;;  %6694 = vmatpush.msk.msrb.mxu0 %vm712_vm0, %v6974_v13  ;;  %vm489_vm15 = vcmp.eq.s32.totalorder %v7193_v24, %v9829_v6  ;;  %vm1001_vm0 = vcmp.eq.s32.totalorder %v7196_v25, %v9829_v6 }
 0x1d7   : > { %6710 = vmatpush.msk.msrb.mxu1 %vm1224_vm1, %v6974_v13  ;;  %6730 = vmatpush.msk.msrb.mxu2 %vm585_vm2, %v6974_v13  ;;  %vm584_vm1 = vcmp.eq.s32.totalorder %v7121_v18, %v9884_v46  ;;  %vm1096_vm2 = vcmp.eq.s32.totalorder %v7124_v19, %v9884_v46 }
 0x1d8   : > { %6746 = vmatpush.msk.msrb.mxu3 %vm1097_vm3, %v6974_v13  ;;  %6695 = vmatpush.msk.msrb.mxu0 %vm680_vm4, %v6974_v13  ;;  %vm457_vm3 = vcmp.eq.s32.totalorder %v7217_v26, %v9829_v6  ;;  %vm969_vm4 = vcmp.eq.s32.totalorder %v7220_v27, %v9829_v6 }
 0x1d9   : > { %6711 = vmatpush.msk.msrb.mxu1 %vm1192_vm5, %v6974_v13  ;;  %6731 = vmatpush.msk.msrb.mxu2 %vm553_vm6, %v6974_v13  ;;  %vm552_vm5 = vcmp.eq.s32.totalorder %v7145_v20, %v9884_v46  ;;  %vm1064_vm6 = vcmp.eq.s32.totalorder %v7148_v21, %v9884_v46 }
 0x1da   : > { %6747 = vmatpush.msk.msrb.mxu3 %vm1065_vm7, %v6974_v13  ;;  %6696 = vmatpush.msk.msrb.mxu0 %vm648_vm8, %v6974_v13  ;;  %vm425_vm7 = vcmp.eq.s32.totalorder %v7241_v28, %v9829_v6  ;;  %vm937_vm8 = vcmp.eq.s32.totalorder %v7244_v29, %v9829_v6 }
 0x1db   : > { %6712 = vmatpush.msk.msrb.mxu1 %vm1160_vm9, %v6974_v13  ;;  %6732 = vmatpush.msk.msrb.mxu2 %vm521_vm11, %v6974_v13  ;;  %vm520_vm9 = vcmp.eq.s32.totalorder %v7169_v22, %v9884_v46  ;;  %vm1032_vm11 = vcmp.eq.s32.totalorder %v7172_v23, %v9884_v46 }
 0x1dc   : > { %6748 = vmatpush.msk.msrb.mxu3 %vm1033_vm12, %v6974_v13  ;;  %6697 = vmatpush.msk.msrb.mxu0 %vm616_vm13, %v6974_v13  ;;  %vm393_vm12 = vcmp.eq.s32.totalorder %v7266_v30, %v9829_v6  ;;  %vm905_vm13 = vcmp.eq.s32.totalorder %v7269_v31, %v9829_v6 }
 0x1dd   : > { %6713 = vmatpush.msk.msrb.mxu1 %vm1128_vm14, %v6974_v13  ;;  %6733 = vmatpush.msk.msrb.mxu2 %vm489_vm15, %v6974_v13  ;;  %vm488_vm14 = vcmp.eq.s32.totalorder %v7193_v24, %v9884_v46  ;;  %vm1000_vm15 = vcmp.eq.s32.totalorder %v7196_v25, %v9884_v46 }
 0x1de   : > { %6749 = vmatpush.msk.msrb.mxu3 %vm1001_vm0, %v6974_v13  ;;  %6698 = vmatpush.msk.msrb.mxu0 %vm584_vm1, %v6974_v13  ;;  %vm361_vm0 = vcmp.eq.s32.totalorder %v7293_v32, %v9829_v6  ;;  %vm873_vm1 = vcmp.eq.s32.totalorder %v7296_v33, %v9829_v6 }
 0x1df   : > { %6714 = vmatpush.msk.msrb.mxu1 %vm1096_vm2, %v6974_v13  ;;  %6734 = vmatpush.msk.msrb.mxu2 %vm457_vm3, %v6974_v13  ;;  %vm456_vm2 = vcmp.eq.s32.totalorder %v7217_v26, %v9884_v46  ;;  %vm968_vm3 = vcmp.eq.s32.totalorder %v7220_v27, %v9884_v46 }
 0x1e0   : > { %6750 = vmatpush.msk.msrb.mxu3 %vm969_vm4, %v6974_v13  ;;  %6699 = vmatpush.msk.msrb.mxu0 %vm552_vm5, %v6974_v13  ;;  %vm329_vm4 = vcmp.eq.s32.totalorder %v7317_v34, %v9829_v6  ;;  %vm841_vm5 = vcmp.eq.s32.totalorder %v7320_v35, %v9829_v6 }
 0x1e1   : > { %6715 = vmatpush.msk.msrb.mxu1 %vm1064_vm6, %v6974_v13  ;;  %6735 = vmatpush.msk.msrb.mxu2 %vm425_vm7, %v6974_v13  ;;  %vm424_vm6 = vcmp.eq.s32.totalorder %v7241_v28, %v9884_v46  ;;  %vm936_vm7 = vcmp.eq.s32.totalorder %v7244_v29, %v9884_v46 }
 0x1e2   : > { %6751 = vmatpush.msk.msrb.mxu3 %vm937_vm8, %v6974_v13  ;;  %6700 = vmatpush.msk.msrb.mxu0 %vm520_vm9, %v6974_v13  ;;  %vm297_vm8 = vcmp.eq.s32.totalorder %v7022_v1, %v9829_v6  ;;  %vm809_vm9 = vcmp.eq.s32.totalorder %v7347_v37, %v9829_v6 }
 0x1e3   : > { %6716 = vmatpush.msk.msrb.mxu1 %vm1032_vm11, %v6974_v13  ;;  %6736 = vmatpush.msk.msrb.mxu2 %vm393_vm12, %v6974_v13  ;;  %vm779_vm11 = vcmp.eq.s32.totalorder %v7034_v2, %v10033_v40  ;;  %vm1291_vm12 = vcmp.eq.s32.totalorder %v7037_v3, %v10033_v40 }
 0x1e4   : > { %6752 = vmatpush.msk.msrb.mxu3 %vm905_vm13, %v6974_v13  ;;  %6701 = vmatpush.msk.msrb.mxu0 %vm488_vm14, %v6974_v13  ;;  %vm392_vm13 = vcmp.eq.s32.totalorder %v7266_v30, %v9884_v46  ;;  %vm904_vm14 = vcmp.eq.s32.totalorder %v7269_v31, %v9884_v46 }
 0x1e5   : > { %6717 = vmatpush.msk.msrb.mxu1 %vm1000_vm15, %v6974_v13  ;;  %6737 = vmatpush.msk.msrb.mxu2 %vm361_vm0, %v6974_v13  ;;  %v4045_v41 = vpop.f32.mrf.mxu2  ;;  %vm747_vm15 = vcmp.eq.s32.totalorder %v7040_v4, %v10033_v40  ;;  %vm1259_vm0 = vcmp.eq.s32.totalorder %v7043_v5, %v10033_v40 }
 0x1e6   : > { %6753 = vmatpush.msk.msrb.mxu3 %vm873_vm1, %v6974_v13  ;;  %v4065_v47 = vpop.f32.mrf.mxu3  ;;  %6702 = vmatpush.msk.msrb.mxu0 %vm456_vm2, %v6974_v13  ;;  %vm360_vm1 = vcmp.eq.s32.totalorder %v7293_v32, %v9884_v46  ;;  %vm872_vm2 = vcmp.eq.s32.totalorder %v7296_v33, %v9884_v46 }
 0x1e7   : > { %6718 = vmatpush.msk.msrb.mxu1 %vm968_vm3, %v6974_v13  ;;  %v4066_v48 = vadd.f32 %v4065_v47, %v4045_v41  ;;  %6738 = vmatpush.msk.msrb.mxu2 %vm329_vm4, %v6974_v13  ;;  %vm715_vm3 = vcmp.eq.s32.totalorder %v7052_v8, %v10033_v40  ;;  %vm1227_vm4 = vcmp.eq.s32.totalorder %v7055_v9, %v10033_v40 }
 0x1e8   : > { %6754 = vmatpush.msk.msrb.mxu3 %vm841_vm5, %v6974_v13  ;;  %6703 = vmatpush.msk.msrb.mxu0 %vm424_vm6, %v6974_v13  ;;  %v4005_v50 = vpop.f32.mrf.mxu0  ;;  %vm328_vm5 = vcmp.eq.s32.totalorder %v7317_v34, %v9884_v46  ;;  %vm840_vm6 = vcmp.eq.s32.totalorder %v7320_v35, %v9884_v46 }
 0x1e9   : > { %6719 = vmatpush.msk.msrb.mxu1 %vm936_vm7, %v6974_v13  ;;  %v4668_v49 = vrot.slane %v4066_v48, 4  ;;  %v4025_v51 = vpop.f32.mrf.mxu1  ;;  %6739 = vmatpush.msk.msrb.mxu2 %vm297_vm8, %v6974_v13  ;;  %vm683_vm7 = vcmp.eq.s32.totalorder %v7061_v11, %v10033_v40  ;;  %vm1195_vm8 = vcmp.eq.s32.totalorder %v7064_v12, %v10033_v40 }
 0x1ea   : > { %6755 = vmatpush.msk.msrb.mxu3 %vm809_vm9, %v6974_v13  ;;  %v4026_v52 = vadd.f32 %v4025_v51, %v4005_v50  ;;  %4364 = vmatmul.f32.vlgmr.msra.gmra.mxu2 %v10061_v53  ;;  %vm296_vm9 = vcmp.eq.s32.totalorder %v7022_v1, %v9884_v46 }
 0x1eb   : > { %4384 = vmatmul.f32.vlgmr.msra.gmra.mxu3 %v10064_v54  ;;  %6788 = vmatpush.msk.msra.mxu2 %vm779_vm11, %v6974_v13  ;;  %vm808_vm11 = vcmp.eq.s32.totalorder %v7347_v37, %v9884_v46 }
 0x1ec   : > { %6804 = vmatpush.msk.msra.mxu3 %vm1291_vm12, %v6974_v13  ;;  %v4685_v55 = vsel %vm4676_vm10, %v4026_v52, %v4668_v49  ;;  %6704 = vmatpush.msk.msrb.mxu0 %vm392_vm13, %v6974_v13  ;;  %vm778_vm12 = vcmp.eq.s32.totalorder %v7034_v2, %v10098_v56  ;;  %vm1290_vm13 = vcmp.eq.s32.totalorder %v7037_v3, %v10098_v56 }
 0x1ed   : > { %6720 = vmatpush.msk.msrb.mxu1 %vm904_vm14, %v6974_v13  ;;  %4717 = vst [vmem:[%s8401_s29 + $0x40] sm:$0xff] %v4685_v55  ;;  %6789 = vmatpush.msk.msra.mxu2 %vm747_vm15, %v6974_v13  ;;  %vm651_vm14 = vcmp.eq.s32.totalorder %v7077_v14, %v10033_v40  ;;  %vm1163_vm15 = vcmp.eq.s32.totalorder %v7080_v15, %v10033_v40 }
 0x1ee   : > { %6805 = vmatpush.msk.msra.mxu3 %vm1259_vm0, %v6974_v13  ;;  %6705 = vmatpush.msk.msrb.mxu0 %vm360_vm1, %v6974_v13  ;;  %vm746_vm0 = vcmp.eq.s32.totalorder %v7040_v4, %v10098_v56  ;;  %vm1258_vm1 = vcmp.eq.s32.totalorder %v7043_v5, %v10098_v56 }
 0x1ef   : > { %6721 = vmatpush.msk.msrb.mxu1 %vm872_vm2, %v6974_v13  ;;  %6790 = vmatpush.msk.msra.mxu2 %vm715_vm3, %v6974_v13  ;;  %vm619_vm2 = vcmp.eq.s32.totalorder %v7103_v16, %v10033_v40  ;;  %vm1131_vm3 = vcmp.eq.s32.totalorder %v7106_v17, %v10033_v40 }
 0x1f0   : > { %6806 = vmatpush.msk.msra.mxu3 %vm1227_vm4, %v6974_v13  ;;  %6706 = vmatpush.msk.msrb.mxu0 %vm328_vm5, %v6974_v13  ;;  %vm714_vm4 = vcmp.eq.s32.totalorder %v7052_v8, %v10098_v56  ;;  %vm1226_vm5 = vcmp.eq.s32.totalorder %v7055_v9, %v10098_v56 }
 0x1f1   : > { %6722 = vmatpush.msk.msrb.mxu1 %vm840_vm6, %v6974_v13  ;;  %6791 = vmatpush.msk.msra.mxu2 %vm683_vm7, %v6974_v13  ;;  %vm587_vm6 = vcmp.eq.s32.totalorder %v7121_v18, %v10033_v40  ;;  %vm1099_vm7 = vcmp.eq.s32.totalorder %v7124_v19, %v10033_v40 }
 0x1f2   : > { %6807 = vmatpush.msk.msra.mxu3 %vm1195_vm8, %v6974_v13  ;;  %6707 = vmatpush.msk.msrb.mxu0 %vm296_vm9, %v6974_v13  ;;  %vm682_vm8 = vcmp.eq.s32.totalorder %v7061_v11, %v10098_v56  ;;  %vm1194_vm9 = vcmp.eq.s32.totalorder %v7064_v12, %v10098_v56 }
 0x1f3   : > { %6723 = vmatpush.msk.msrb.mxu1 %vm808_vm11, %v6974_v13  ;;  %4324 = vmatmul.f32.vlgmr.msra.gmra.mxu0 %v10061_v53  ;;  %vm555_vm11 = vcmp.eq.s32.totalorder %v7145_v20, %v10033_v40 }
 0x1f4   : > { %4344 = vmatmul.f32.vlgmr.msra.gmra.mxu1 %v10064_v54  ;;  %6756 = vmatpush.msk.msra.mxu0 %vm778_vm12, %v6974_v13  ;;  %vm1067_vm12 = vcmp.eq.s32.totalorder %v7148_v21, %v10033_v40 }
 0x1f5   : > { %6772 = vmatpush.msk.msra.mxu1 %vm1290_vm13, %v6974_v13  ;;  %6792 = vmatpush.msk.msra.mxu2 %vm651_vm14, %v6974_v13  ;;  %vm650_vm13 = vcmp.eq.s32.totalorder %v7077_v14, %v10098_v56  ;;  %vm1162_vm14 = vcmp.eq.s32.totalorder %v7080_v15, %v10098_v56 }
 0x1f6   : > { %6808 = vmatpush.msk.msra.mxu3 %vm1163_vm15, %v6974_v13  ;;  %6757 = vmatpush.msk.msra.mxu0 %vm746_vm0, %v6974_v13  ;;  %vm523_vm15 = vcmp.eq.s32.totalorder %v7169_v22, %v10033_v40  ;;  %vm1035_vm0 = vcmp.eq.s32.totalorder %v7172_v23, %v10033_v40 }
 0x1f7   : > { %6773 = vmatpush.msk.msra.mxu1 %vm1258_vm1, %v6974_v13  ;;  %6793 = vmatpush.msk.msra.mxu2 %vm619_vm2, %v6974_v13  ;;  %vm618_vm1 = vcmp.eq.s32.totalorder %v7103_v16, %v10098_v56  ;;  %vm1130_vm2 = vcmp.eq.s32.totalorder %v7106_v17, %v10098_v56 }
 0x1f8   : > { %6809 = vmatpush.msk.msra.mxu3 %vm1131_vm3, %v6974_v13  ;;  %6758 = vmatpush.msk.msra.mxu0 %vm714_vm4, %v6974_v13  ;;  %vm491_vm3 = vcmp.eq.s32.totalorder %v7193_v24, %v10033_v40  ;;  %vm1003_vm4 = vcmp.eq.s32.totalorder %v7196_v25, %v10033_v40 }
 0x1f9   : > { %6774 = vmatpush.msk.msra.mxu1 %vm1226_vm5, %v6974_v13  ;;  %6794 = vmatpush.msk.msra.mxu2 %vm587_vm6, %v6974_v13  ;;  %vm586_vm5 = vcmp.eq.s32.totalorder %v7121_v18, %v10098_v56  ;;  %vm1098_vm6 = vcmp.eq.s32.totalorder %v7124_v19, %v10098_v56 }
 0x1fa   : > { %6810 = vmatpush.msk.msra.mxu3 %vm1099_vm7, %v6974_v13  ;;  %6759 = vmatpush.msk.msra.mxu0 %vm682_vm8, %v6974_v13  ;;  %vm459_vm7 = vcmp.eq.s32.totalorder %v7217_v26, %v10033_v40  ;;  %vm971_vm8 = vcmp.eq.s32.totalorder %v7220_v27, %v10033_v40 }
 0x1fb   : > { %6775 = vmatpush.msk.msra.mxu1 %vm1194_vm9, %v6974_v13  ;;  %6795 = vmatpush.msk.msra.mxu2 %vm555_vm11, %v6974_v13  ;;  %vm554_vm9 = vcmp.eq.s32.totalorder %v7145_v20, %v10098_v56  ;;  %vm1066_vm11 = vcmp.eq.s32.totalorder %v7148_v21, %v10098_v56 }
 0x1fc   : > { %6811 = vmatpush.msk.msra.mxu3 %vm1067_vm12, %v6974_v13  ;;  %6760 = vmatpush.msk.msra.mxu0 %vm650_vm13, %v6974_v13  ;;  %vm427_vm12 = vcmp.eq.s32.totalorder %v7241_v28, %v10033_v40  ;;  %vm939_vm13 = vcmp.eq.s32.totalorder %v7244_v29, %v10033_v40 }
 0x1fd   : > { %6776 = vmatpush.msk.msra.mxu1 %vm1162_vm14, %v6974_v13  ;;  %6796 = vmatpush.msk.msra.mxu2 %vm523_vm15, %v6974_v13  ;;  %vm522_vm14 = vcmp.eq.s32.totalorder %v7169_v22, %v10098_v56  ;;  %vm1034_vm15 = vcmp.eq.s32.totalorder %v7172_v23, %v10098_v56 }
 0x1fe   : > { %6812 = vmatpush.msk.msra.mxu3 %vm1035_vm0, %v6974_v13  ;;  %6761 = vmatpush.msk.msra.mxu0 %vm618_vm1, %v6974_v13  ;;  %vm395_vm0 = vcmp.eq.s32.totalorder %v7266_v30, %v10033_v40  ;;  %vm907_vm1 = vcmp.eq.s32.totalorder %v7269_v31, %v10033_v40 }
 0x1ff   : > { %6777 = vmatpush.msk.msra.mxu1 %vm1130_vm2, %v6974_v13  ;;  %6797 = vmatpush.msk.msra.mxu2 %vm491_vm3, %v6974_v13  ;;  %vm490_vm2 = vcmp.eq.s32.totalorder %v7193_v24, %v10098_v56  ;;  %vm1002_vm3 = vcmp.eq.s32.totalorder %v7196_v25, %v10098_v56 }
 0x200   : > { %6813 = vmatpush.msk.msra.mxu3 %vm1003_vm4, %v6974_v13  ;;  %6762 = vmatpush.msk.msra.mxu0 %vm586_vm5, %v6974_v13  ;;  %vm363_vm4 = vcmp.eq.s32.totalorder %v7293_v32, %v10033_v40  ;;  %vm875_vm5 = vcmp.eq.s32.totalorder %v7296_v33, %v10033_v40 }
 0x201   : > { %6778 = vmatpush.msk.msra.mxu1 %vm1098_vm6, %v6974_v13  ;;  %6798 = vmatpush.msk.msra.mxu2 %vm459_vm7, %v6974_v13  ;;  %vm458_vm6 = vcmp.eq.s32.totalorder %v7217_v26, %v10098_v56  ;;  %vm970_vm7 = vcmp.eq.s32.totalorder %v7220_v27, %v10098_v56 }
 0x202   : > { %6814 = vmatpush.msk.msra.mxu3 %vm971_vm8, %v6974_v13  ;;  %6763 = vmatpush.msk.msra.mxu0 %vm554_vm9, %v6974_v13  ;;  %vm331_vm8 = vcmp.eq.s32.totalorder %v7317_v34, %v10033_v40  ;;  %vm843_vm9 = vcmp.eq.s32.totalorder %v7320_v35, %v10033_v40 }
 0x203   : > { %6779 = vmatpush.msk.msra.mxu1 %vm1066_vm11, %v6974_v13  ;;  %6799 = vmatpush.msk.msra.mxu2 %vm427_vm12, %v6974_v13  ;;  %vm426_vm11 = vcmp.eq.s32.totalorder %v7241_v28, %v10098_v56  ;;  %vm938_vm12 = vcmp.eq.s32.totalorder %v7244_v29, %v10098_v56 }
 0x204   : > { %6815 = vmatpush.msk.msra.mxu3 %vm939_vm13, %v6974_v13  ;;  %6764 = vmatpush.msk.msra.mxu0 %vm522_vm14, %v6974_v13  ;;  %vm299_vm13 = vcmp.eq.s32.totalorder %v7022_v1, %v10033_v40  ;;  %vm811_vm14 = vcmp.eq.s32.totalorder %v7347_v37, %v10033_v40 }
 0x205   : > { %6780 = vmatpush.msk.msra.mxu1 %vm1034_vm15, %v6974_v13  ;;  %6800 = vmatpush.msk.msra.mxu2 %vm395_vm0, %v6974_v13  ;;  %vm781_vm15 = vcmp.eq.s32.totalorder %v7034_v2, %v10247_v57  ;;  %vm1293_vm0 = vcmp.eq.s32.totalorder %v7037_v3, %v10247_v57 }
 0x206   : > { %6816 = vmatpush.msk.msra.mxu3 %vm907_vm1, %v6974_v13  ;;  %6765 = vmatpush.msk.msra.mxu0 %vm490_vm2, %v6974_v13  ;;  %vm394_vm1 = vcmp.eq.s32.totalorder %v7266_v30, %v10098_v56  ;;  %vm906_vm2 = vcmp.eq.s32.totalorder %v7269_v31, %v10098_v56 }
 0x207   : > { %6781 = vmatpush.msk.msra.mxu1 %vm1002_vm3, %v6974_v13  ;;  %6801 = vmatpush.msk.msra.mxu2 %vm363_vm4, %v6974_v13  ;;  %v4125_v58 = vpop.f32.mrf.mxu2  ;;  %vm749_vm3 = vcmp.eq.s32.totalorder %v7040_v4, %v10247_v57  ;;  %vm1261_vm4 = vcmp.eq.s32.totalorder %v7043_v5, %v10247_v57 }
 0x208   : > { %6817 = vmatpush.msk.msra.mxu3 %vm875_vm5, %v6974_v13  ;;  %v4145_v61 = vpop.f32.mrf.mxu3  ;;  %6766 = vmatpush.msk.msra.mxu0 %vm458_vm6, %v6974_v13  ;;  %vm362_vm5 = vcmp.eq.s32.totalorder %v7293_v32, %v10098_v56  ;;  %vm874_vm6 = vcmp.eq.s32.totalorder %v7296_v33, %v10098_v56 }
 0x209   : > { %6782 = vmatpush.msk.msra.mxu1 %vm970_vm7, %v6974_v13  ;;  %v4146_v62 = vadd.f32 %v4145_v61, %v4125_v58  ;;  %6802 = vmatpush.msk.msra.mxu2 %vm331_vm8, %v6974_v13  ;;  %vm717_vm7 = vcmp.eq.s32.totalorder %v7052_v8, %v10247_v57  ;;  %vm1229_vm8 = vcmp.eq.s32.totalorder %v7055_v9, %v10247_v57 }
 0x20a   : > { %6818 = vmatpush.msk.msra.mxu3 %vm843_vm9, %v6974_v13  ;;  %6767 = vmatpush.msk.msra.mxu0 %vm426_vm11, %v6974_v13  ;;  %v4085_v0 = vpop.f32.mrf.mxu0  ;;  %vm330_vm9 = vcmp.eq.s32.totalorder %v7317_v34, %v10098_v56  ;;  %vm842_vm11 = vcmp.eq.s32.totalorder %v7320_v35, %v10098_v56 }
 0x20b   : > { %6783 = vmatpush.msk.msra.mxu1 %vm938_vm12, %v6974_v13  ;;  %v4669_v63 = vrot.slane %v4146_v62, 4  ;;  %v4105_v59 = vpop.f32.mrf.mxu1  ;;  %6803 = vmatpush.msk.msra.mxu2 %vm299_vm13, %v6974_v13  ;;  %vm685_vm12 = vcmp.eq.s32.totalorder %v7061_v11, %v10247_v57  ;;  %vm1197_vm13 = vcmp.eq.s32.totalorder %v7064_v12, %v10247_v57 }
 0x20c   : > { %6819 = vmatpush.msk.msra.mxu3 %vm811_vm14, %v6974_v13  ;;  %v4106_v60 = vadd.f32 %v4105_v59, %v4085_v0  ;;  %4444 = vmatmul.f32.vlgmr.msrb.gmra.mxu2 %v10061_v53  ;;  %vm298_vm14 = vcmp.eq.s32.totalorder %v7022_v1, %v10098_v56 }
 0x20d   : > { %4464 = vmatmul.f32.vlgmr.msrb.gmra.mxu3 %v10064_v54  ;;  %6852 = vmatpush.msk.msrb.mxu2 %vm781_vm15, %v6974_v13  ;;  %vm810_vm15 = vcmp.eq.s32.totalorder %v7347_v37, %v10098_v56 }
 0x20e   : > { %6868 = vmatpush.msk.msrb.mxu3 %vm1293_vm0, %v6974_v13  ;;  %v4686_v6 = vsel %vm4676_vm10, %v4106_v60, %v4669_v63  ;;  %6768 = vmatpush.msk.msra.mxu0 %vm394_vm1, %v6974_v13  ;;  %vm780_vm0 = vcmp.eq.s32.totalorder %v7034_v2, %v10302_v7  ;;  %vm1292_vm1 = vcmp.eq.s32.totalorder %v7037_v3, %v10302_v7 }
 0x20f   : > { %6784 = vmatpush.msk.msra.mxu1 %vm906_vm2, %v6974_v13  ;;  %4718 = vst [vmem:[%s8401_s29 + $0x48] sm:$0xff] %v4686_v6  ;;  %6853 = vmatpush.msk.msrb.mxu2 %vm749_vm3, %v6974_v13  ;;  %vm653_vm2 = vcmp.eq.s32.totalorder %v7077_v14, %v10247_v57  ;;  %vm1165_vm3 = vcmp.eq.s32.totalorder %v7080_v15, %v10247_v57 }
 0x210   : > { %6869 = vmatpush.msk.msrb.mxu3 %vm1261_vm4, %v6974_v13  ;;  %6769 = vmatpush.msk.msra.mxu0 %vm362_vm5, %v6974_v13  ;;  %vm748_vm4 = vcmp.eq.s32.totalorder %v7040_v4, %v10302_v7  ;;  %vm1260_vm5 = vcmp.eq.s32.totalorder %v7043_v5, %v10302_v7 }
 0x211   : > { %6785 = vmatpush.msk.msra.mxu1 %vm874_vm6, %v6974_v13  ;;  %6854 = vmatpush.msk.msrb.mxu2 %vm717_vm7, %v6974_v13  ;;  %vm621_vm6 = vcmp.eq.s32.totalorder %v7103_v16, %v10247_v57  ;;  %vm1133_vm7 = vcmp.eq.s32.totalorder %v7106_v17, %v10247_v57 }
 0x212   : > { %6870 = vmatpush.msk.msrb.mxu3 %vm1229_vm8, %v6974_v13  ;;  %6770 = vmatpush.msk.msra.mxu0 %vm330_vm9, %v6974_v13  ;;  %vm716_vm8 = vcmp.eq.s32.totalorder %v7052_v8, %v10302_v7  ;;  %vm1228_vm9 = vcmp.eq.s32.totalorder %v7055_v9, %v10302_v7 }
 0x213   : > { %6786 = vmatpush.msk.msra.mxu1 %vm842_vm11, %v6974_v13  ;;  %6855 = vmatpush.msk.msrb.mxu2 %vm685_vm12, %v6974_v13  ;;  %vm589_vm11 = vcmp.eq.s32.totalorder %v7121_v18, %v10247_v57  ;;  %vm1101_vm12 = vcmp.eq.s32.totalorder %v7124_v19, %v10247_v57 }
 0x214   : > { %6871 = vmatpush.msk.msrb.mxu3 %vm1197_vm13, %v6974_v13  ;;  %6771 = vmatpush.msk.msra.mxu0 %vm298_vm14, %v6974_v13  ;;  %vm684_vm13 = vcmp.eq.s32.totalorder %v7061_v11, %v10302_v7  ;;  %vm1196_vm14 = vcmp.eq.s32.totalorder %v7064_v12, %v10302_v7 }
 0x215   : > { %6787 = vmatpush.msk.msra.mxu1 %vm810_vm15, %v6974_v13  ;;  %4404 = vmatmul.f32.vlgmr.msrb.gmra.mxu0 %v10061_v53  ;;  %vm557_vm15 = vcmp.eq.s32.totalorder %v7145_v20, %v10247_v57 }
 0x216   : > { %4424 = vmatmul.f32.vlgmr.msrb.gmra.mxu1 %v10064_v54  ;;  %6820 = vmatpush.msk.msrb.mxu0 %vm780_vm0, %v6974_v13  ;;  %vm1069_vm0 = vcmp.eq.s32.totalorder %v7148_v21, %v10247_v57 }
 0x217   : > { %6836 = vmatpush.msk.msrb.mxu1 %vm1292_vm1, %v6974_v13  ;;  %6856 = vmatpush.msk.msrb.mxu2 %vm653_vm2, %v6974_v13  ;;  %vm652_vm1 = vcmp.eq.s32.totalorder %v7077_v14, %v10302_v7  ;;  %vm1164_vm2 = vcmp.eq.s32.totalorder %v7080_v15, %v10302_v7 }
 0x218   : > { %6872 = vmatpush.msk.msrb.mxu3 %vm1165_vm3, %v6974_v13  ;;  %6821 = vmatpush.msk.msrb.mxu0 %vm748_vm4, %v6974_v13  ;;  %vm525_vm3 = vcmp.eq.s32.totalorder %v7169_v22, %v10247_v57  ;;  %vm1037_vm4 = vcmp.eq.s32.totalorder %v7172_v23, %v10247_v57 }
 0x219   : > { %6837 = vmatpush.msk.msrb.mxu1 %vm1260_vm5, %v6974_v13  ;;  %6857 = vmatpush.msk.msrb.mxu2 %vm621_vm6, %v6974_v13  ;;  %vm620_vm5 = vcmp.eq.s32.totalorder %v7103_v16, %v10302_v7  ;;  %vm1132_vm6 = vcmp.eq.s32.totalorder %v7106_v17, %v10302_v7 }
 0x21a   : > { %6873 = vmatpush.msk.msrb.mxu3 %vm1133_vm7, %v6974_v13  ;;  %6822 = vmatpush.msk.msrb.mxu0 %vm716_vm8, %v6974_v13  ;;  %vm493_vm7 = vcmp.eq.s32.totalorder %v7193_v24, %v10247_v57  ;;  %vm1005_vm8 = vcmp.eq.s32.totalorder %v7196_v25, %v10247_v57 }
 0x21b   : > { %6838 = vmatpush.msk.msrb.mxu1 %vm1228_vm9, %v6974_v13  ;;  %6858 = vmatpush.msk.msrb.mxu2 %vm589_vm11, %v6974_v13  ;;  %vm588_vm9 = vcmp.eq.s32.totalorder %v7121_v18, %v10302_v7  ;;  %vm1100_vm11 = vcmp.eq.s32.totalorder %v7124_v19, %v10302_v7 }
 0x21c   : > { %6874 = vmatpush.msk.msrb.mxu3 %vm1101_vm12, %v6974_v13  ;;  %6823 = vmatpush.msk.msrb.mxu0 %vm684_vm13, %v6974_v13  ;;  %vm461_vm12 = vcmp.eq.s32.totalorder %v7217_v26, %v10247_v57  ;;  %vm973_vm13 = vcmp.eq.s32.totalorder %v7220_v27, %v10247_v57 }
 0x21d   : > { %6839 = vmatpush.msk.msrb.mxu1 %vm1196_vm14, %v6974_v13  ;;  %6859 = vmatpush.msk.msrb.mxu2 %vm557_vm15, %v6974_v13  ;;  %vm556_vm14 = vcmp.eq.s32.totalorder %v7145_v20, %v10302_v7  ;;  %vm1068_vm15 = vcmp.eq.s32.totalorder %v7148_v21, %v10302_v7 }
 0x21e   : > { %6875 = vmatpush.msk.msrb.mxu3 %vm1069_vm0, %v6974_v13  ;;  %6824 = vmatpush.msk.msrb.mxu0 %vm652_vm1, %v6974_v13  ;;  %vm429_vm0 = vcmp.eq.s32.totalorder %v7241_v28, %v10247_v57  ;;  %vm941_vm1 = vcmp.eq.s32.totalorder %v7244_v29, %v10247_v57 }
 0x21f   : > { %6840 = vmatpush.msk.msrb.mxu1 %vm1164_vm2, %v6974_v13  ;;  %6860 = vmatpush.msk.msrb.mxu2 %vm525_vm3, %v6974_v13  ;;  %vm524_vm2 = vcmp.eq.s32.totalorder %v7169_v22, %v10302_v7  ;;  %vm1036_vm3 = vcmp.eq.s32.totalorder %v7172_v23, %v10302_v7 }
 0x220   : > { %6876 = vmatpush.msk.msrb.mxu3 %vm1037_vm4, %v6974_v13  ;;  %6825 = vmatpush.msk.msrb.mxu0 %vm620_vm5, %v6974_v13  ;;  %vm397_vm4 = vcmp.eq.s32.totalorder %v7266_v30, %v10247_v57  ;;  %vm909_vm5 = vcmp.eq.s32.totalorder %v7269_v31, %v10247_v57 }
 0x221   : > { %6841 = vmatpush.msk.msrb.mxu1 %vm1132_vm6, %v6974_v13  ;;  %6861 = vmatpush.msk.msrb.mxu2 %vm493_vm7, %v6974_v13  ;;  %vm492_vm6 = vcmp.eq.s32.totalorder %v7193_v24, %v10302_v7  ;;  %vm1004_vm7 = vcmp.eq.s32.totalorder %v7196_v25, %v10302_v7 }
 0x222   : > { %6877 = vmatpush.msk.msrb.mxu3 %vm1005_vm8, %v6974_v13  ;;  %6826 = vmatpush.msk.msrb.mxu0 %vm588_vm9, %v6974_v13  ;;  %vm365_vm8 = vcmp.eq.s32.totalorder %v7293_v32, %v10247_v57  ;;  %vm877_vm9 = vcmp.eq.s32.totalorder %v7296_v33, %v10247_v57 }
 0x223   : > { %6842 = vmatpush.msk.msrb.mxu1 %vm1100_vm11, %v6974_v13  ;;  %6862 = vmatpush.msk.msrb.mxu2 %vm461_vm12, %v6974_v13  ;;  %vm460_vm11 = vcmp.eq.s32.totalorder %v7217_v26, %v10302_v7  ;;  %vm972_vm12 = vcmp.eq.s32.totalorder %v7220_v27, %v10302_v7 }
 0x224   : > { %6878 = vmatpush.msk.msrb.mxu3 %vm973_vm13, %v6974_v13  ;;  %6827 = vmatpush.msk.msrb.mxu0 %vm556_vm14, %v6974_v13  ;;  %vm333_vm13 = vcmp.eq.s32.totalorder %v7317_v34, %v10247_v57  ;;  %vm845_vm14 = vcmp.eq.s32.totalorder %v7320_v35, %v10247_v57 }
 0x225   : > { %6843 = vmatpush.msk.msrb.mxu1 %vm1068_vm15, %v6974_v13  ;;  %6863 = vmatpush.msk.msrb.mxu2 %vm429_vm0, %v6974_v13  ;;  %vm428_vm15 = vcmp.eq.s32.totalorder %v7241_v28, %v10302_v7  ;;  %vm940_vm0 = vcmp.eq.s32.totalorder %v7244_v29, %v10302_v7 }
 0x226   : > { %6879 = vmatpush.msk.msrb.mxu3 %vm941_vm1, %v6974_v13  ;;  %4524 = vmatmul.f32.vlgmr.msra.gmra.mxu2 %v10061_v53  ;;  %vm301_vm1 = vcmp.eq.s32.totalorder %v7022_v1, %v10247_v57 }
 0x227   : > { %4544 = vmatmul.f32.vlgmr.msra.gmra.mxu3 %v10064_v54  ;;  %6828 = vmatpush.msk.msrb.mxu0 %vm524_vm2, %v6974_v13  ;;  %vm813_vm2 = vcmp.eq.s32.totalorder %v7347_v37, %v10247_v57 }
 0x228   : > { %6844 = vmatpush.msk.msrb.mxu1 %vm1036_vm3, %v6974_v13  ;;  %6864 = vmatpush.msk.msrb.mxu2 %vm397_vm4, %v6974_v13  ;;  %vm396_vm3 = vcmp.eq.s32.totalorder %v7266_v30, %v10302_v7  ;;  %vm908_vm4 = vcmp.eq.s32.totalorder %v7269_v31, %v10302_v7 }
 0x229   : > { %6880 = vmatpush.msk.msrb.mxu3 %vm909_vm5, %v6974_v13  ;;  %6829 = vmatpush.msk.msrb.mxu0 %vm492_vm6, %v6974_v13  ;;  %v4205_v2 = vpop.f32.mrf.mxu2  ;;  %vm364_vm5 = vcmp.eq.s32.totalorder %v7293_v32, %v10302_v7  ;;  %vm876_vm6 = vcmp.eq.s32.totalorder %v7296_v33, %v10302_v7 }
 0x22a   : > { %6845 = vmatpush.msk.msrb.mxu1 %vm1004_vm7, %v6974_v13  ;;  %v4225_v3 = vpop.f32.mrf.mxu3  ;;  %6865 = vmatpush.msk.msrb.mxu2 %vm365_vm8, %v6974_v13  ;;  %vm332_vm7 = vcmp.eq.s32.totalorder %v7317_v34, %v10302_v7  ;;  %vm844_vm8 = vcmp.eq.s32.totalorder %v7320_v35, %v10302_v7 }
 0x22b   : > { %6881 = vmatpush.msk.msrb.mxu3 %vm877_vm9, %v6974_v13  ;;  %v4226_v4 = vadd.f32 %v4225_v3, %v4205_v2  ;;  %6830 = vmatpush.msk.msrb.mxu0 %vm460_vm11, %v6974_v13  ;;  %vm300_vm9 = vcmp.eq.s32.totalorder %v7022_v1, %v10302_v7  ;;  %vm812_vm11 = vcmp.eq.s32.totalorder %v7347_v37, %v10302_v7 }
 0x22c   : > { %6846 = vmatpush.msk.msrb.mxu1 %vm972_vm12, %v6974_v13  ;;  %6866 = vmatpush.msk.msrb.mxu2 %vm333_vm13, %v6974_v13  ;;  %v4165_v8 = vpop.f32.mrf.mxu0 }
 0x22d   : > { %6882 = vmatpush.msk.msrb.mxu3 %vm845_vm14, %v6974_v13  ;;  %v4670_v5 = vrot.slane %v4226_v4, 4  ;;  %v4185_v9 = vpop.f32.mrf.mxu1  ;;  %6831 = vmatpush.msk.msrb.mxu0 %vm428_vm15, %v6974_v13 }
 0x22e   : > { %6847 = vmatpush.msk.msrb.mxu1 %vm940_vm0, %v6974_v13  ;;  %v4186_v11 = vadd.f32 %v4185_v9, %v4165_v8  ;;  %6867 = vmatpush.msk.msrb.mxu2 %vm301_vm1, %v6974_v13 }
 0x22f   : > { %6883 = vmatpush.msk.msrb.mxu3 %vm813_vm2, %v6974_v13  ;;  %4484 = vmatmul.f32.vlgmr.msra.gmra.mxu0 %v10061_v53 }
 0x230   : > { %4504 = vmatmul.f32.vlgmr.msra.gmra.mxu1 %v10064_v54  ;;  %v4687_v12 = vsel %vm4676_vm10, %v4186_v11, %v4670_v5  ;;  %4604 = vmatmul.f32.vlgmr.msrb.gmra.mxu2 %v10061_v53 }
 0x231   : > { %4624 = vmatmul.f32.vlgmr.msrb.gmra.mxu3 %v10064_v54  ;;  %4719 = vst [vmem:[%s8401_s29 + $0x50] sm:$0xff] %v4687_v12  ;;  %6832 = vmatpush.msk.msrb.mxu0 %vm396_vm3, %v6974_v13 }
 0x232   : > { %6848 = vmatpush.msk.msrb.mxu1 %vm908_vm4, %v6974_v13 }
 0x233   : > { %6833 = vmatpush.msk.msrb.mxu0 %vm364_vm5, %v6974_v13 }
 0x234   : > { %6849 = vmatpush.msk.msrb.mxu1 %vm876_vm6, %v6974_v13 }
 0x235   : > { %6834 = vmatpush.msk.msrb.mxu0 %vm332_vm7, %v6974_v13 }
 0x236   : > { %6850 = vmatpush.msk.msrb.mxu1 %vm844_vm8, %v6974_v13 }
 0x237   : > { %6835 = vmatpush.msk.msrb.mxu0 %vm300_vm9, %v6974_v13 }
 0x238   : > { %6851 = vmatpush.msk.msrb.mxu1 %vm812_vm11, %v6974_v13  ;;  %4564 = vmatmul.f32.vlgmr.msrb.gmra.mxu0 %v10061_v53 }
 0x239   : > { %4584 = vmatmul.f32.vlgmr.msrb.gmra.mxu1 %v10064_v54 }
 0x24b   : > { %v4285_v14 = vpop.f32.mrf.mxu2 }
 0x24c   : > { %v4305_v15 = vpop.f32.mrf.mxu3 }
 0x24d   : > { %v4306_v1 = vadd.f32 %v4305_v15, %v4285_v14 }
 0x24e   : > { %v4245_v17 = vpop.f32.mrf.mxu0 }
 0x24f   : > { %v4671_v16 = vrot.slane %v4306_v1, 4  ;;  %v4265_v18 = vpop.f32.mrf.mxu1 }
 0x250   : > { %v4266_v19 = vadd.f32 %v4265_v18, %v4245_v17 }
 0x252   : > { %v4688_v20 = vsel %vm4676_vm10, %v4266_v19, %v4671_v16 }
 0x253   : > { %4720 = vst [vmem:[%s8401_s29 + $0x58] sm:$0xff] %v4688_v20 }
 0x26d   : > { %v4365_v21 = vpop.f32.mrf.mxu2 }
 0x26e   : > { %v4385_v22 = vpop.f32.mrf.mxu3 }
 0x26f   : > { %v4386_v23 = vadd.f32 %v4385_v22, %v4365_v21 }
 0x270   : > { %v4325_v24 = vpop.f32.mrf.mxu0 }
 0x271   : > { %v4672_v13 = vrot.slane %v4386_v23, 4  ;;  %v4345_v25 = vpop.f32.mrf.mxu1 }
 0x272   : > { %v4346_v26 = vadd.f32 %v4345_v25, %v4325_v24 }
 0x274   : > { %v4689_v27 = vsel %vm4676_vm10, %v4346_v26, %v4672_v13 }
 0x275   : > { %4721 = vst [vmem:[%s8401_s29 + $0x60] sm:$0xff] %v4689_v27 }
 0x28f   : > { %v4445_v28 = vpop.f32.mrf.mxu2 }
 0x290   : > { %v4465_v29 = vpop.f32.mrf.mxu3 }
 0x291   : > { %v4466_v30 = vadd.f32 %v4465_v29, %v4445_v28 }
 0x292   : > { %v4405_v32 = vpop.f32.mrf.mxu0 }
 0x293   : > { %v4673_v31 = vrot.slane %v4466_v30, 4  ;;  %v4425_v33 = vpop.f32.mrf.mxu1 }
 0x294   : > { %v4426_v34 = vadd.f32 %v4425_v33, %v4405_v32 }
 0x296   : > { %v4690_v35 = vsel %vm4676_vm10, %v4426_v34, %v4673_v31 }
 0x297   : > { %4722 = vst [vmem:[%s8401_s29 + $0x68] sm:$0xff] %v4690_v35 }
 0x2a9   : > { %v4525_v37 = vpop.f32.mrf.mxu2 }
 0x2aa   : > { %v4545_v42 = vpop.f32.mrf.mxu3 }
 0x2ab   : > { %v4546_v10 = vadd.f32 %v4545_v42, %v4525_v37 }
 0x2ac   : > { %v4485_v38 = vpop.f32.mrf.mxu0 }
 0x2ad   : > { %v4674_v36 = vrot.slane %v4546_v10, 4  ;;  %v4505_v39 = vpop.f32.mrf.mxu1 }
 0x2ae   : > { %v4506_v43 = vadd.f32 %v4505_v39, %v4485_v38 }
 0x2b0   : > { %v4691_v44 = vsel %vm4676_vm10, %v4506_v43, %v4674_v36 }
 0x2b1   : > { %4723 = vst [vmem:[%s8401_s29 + $0x70] sm:$0xff] %v4691_v44 }
 0x2b3   : > { %v4605_v45 = vpop.f32.mrf.mxu2 }
 0x2b4   : > { %v4625_v46 = vpop.f32.mrf.mxu3 }
 0x2b5   : > { %v4626_v40 = vadd.f32 %v4625_v46, %v4605_v45  ;;  %v4565_v41 = vpop.f32.mrf.mxu0 }
 0x2b6   : > { %v4585_v47 = vpop.f32.mrf.mxu1 }
 0x2b7   : > { %v4675_v48 = vrot.slane %v4626_v40, 4  ;;  %v4586_v49 = vadd.f32 %v4585_v47, %v4565_v41 }
 0x2b9   : > { %v4692_v50 = vsel %vm4676_vm10, %v4586_v49, %v4675_v48 }
 0x2ba   : > { %4724 = vst [vmem:[%s8401_s29 + $0x78] sm:$0xff] %v4692_v50 }
 0x2bb PF: > { %s12_s13 = sadd.s32 1, %s6972_s13   ;;  %s10530_s9 = smov %s6964_s11 }
 0x2bc   : > { %p9_p7 = scmp.ge.s32.totalorder %s12_s13, 6   ;;  %s10531_s10 = smov %s6968_s12 }
 0x2bd   : > { %s10532_s11 = smov %s10535_s14  ;;  %s10533_s12 = smov %s10539_s15 }
 0x2be   :  { %11 = sbr.rel (!%p9_p7) target bundleno = 3 (0x3), region = 61 }

</bundles_post_ra>
